<compile_context>
chip_gen: v5e
topology: v5e:2x2
jax: 0.10.0
libtpu: 0.0.40
codegen_flags: <defaults>
</compile_context>

<pallas_src>
import numpy as np
import jax
import jax.numpy as jnp
from jax.experimental import pallas as pl
from jax.experimental.pallas import tpu as pltpu


def _round_up(x, m):
    return ((x + m - 1) // m) * m


def _cdiv(a, b):
    return (a + b - 1) // b


_TM_MAX = 512  # max row tile over flattened voxels


# ----------------------------------------------------------------------------
# Fused Pallas kernel:  y = [relu]( relu(x*ps+pt) @ W * es + et ) [+ r]
# ----------------------------------------------------------------------------
def _make_fused_kernel(has_prologue, relu_out, has_add):
    def kernel(*refs):
        i = 0
        x_ref = refs[i]; i += 1
        if has_prologue:
            ps_ref, pt_ref = refs[i], refs[i + 1]; i += 2
        w_ref, es_ref, et_ref = refs[i], refs[i + 1], refs[i + 2]; i += 3
        if has_add:
            r_ref = refs[i]; i += 1
        o_ref = refs[i]

        x = x_ref[...]                          # bf16 in VMEM
        if has_prologue:                        # fused BN + ReLU on the input (f32 math)
            xf = x.astype(jnp.float32) * ps_ref[...] + pt_ref[...]
            x = jnp.maximum(xf, 0.0).astype(jnp.bfloat16)
        acc = jnp.dot(x, w_ref[...], preferred_element_type=jnp.float32)
        y = acc * es_ref[...] + et_ref[...]     # fused bias / BN scale-shift (f32)
        if relu_out:
            y = jnp.maximum(y, 0.0)
        if has_add:
            y = y + r_ref[...].astype(jnp.float32)   # fused residual add
        o_ref[...] = y.astype(o_ref.dtype)      # bf16 writeback
    return kernel


def fused_matmul(x, w, *, prologue=None, epi_scale=None, epi_shift=None,
                 relu_out=False, add=None, out_dtype=jnp.bfloat16):
    """One Pallas call: optional BN+ReLU prologue, bf16 MXU matmul, fused epilogue.

    No HBM-side padding: K and N blocks equal the full array dims, the row grid is
    cdiv(M, TM) (Pallas masks the tail block), and all large operands are bf16.
    """
    M, K = x.shape
    N = w.shape[1]

    # Row tiling: never pad M; guarantee >=2 grid steps (both v7x TensorCores busy).
    if M > 16:
        n_tiles = max(2, _cdiv(M, _TM_MAX))
        TM = _round_up(_cdiv(M, n_tiles), 8)
    else:
        TM = M                                   # block == full dim is always legal
    grid = (_cdiv(M, TM),)

    xb = x.astype(jnp.bfloat16)
    wb = w.astype(jnp.bfloat16)
    if epi_scale is None:
        epi_scale = jnp.ones((N,), jnp.float32)
    if epi_shift is None:
        epi_shift = jnp.zeros((N,), jnp.float32)
    es = epi_scale.astype(jnp.float32).reshape(1, N)
    et = epi_shift.astype(jnp.float32).reshape(1, N)

    operands = [xb]
    in_specs = [pl.BlockSpec((TM, K), lambda i: (i, 0))]
    if prologue is not None:
        ps, pt = prologue
        operands += [ps.astype(jnp.float32).reshape(1, K),
                     pt.astype(jnp.float32).reshape(1, K)]
        in_specs += [pl.BlockSpec((1, K), lambda i: (0, 0)),
                     pl.BlockSpec((1, K), lambda i: (0, 0))]
    operands += [wb, es, et]
    in_specs += [pl.BlockSpec((K, N), lambda i: (0, 0)),
                 pl.BlockSpec((1, N), lambda i: (0, 0)),
                 pl.BlockSpec((1, N), lambda i: (0, 0))]
    if add is not None:
        operands += [add.astype(jnp.bfloat16)]
        in_specs += [pl.BlockSpec((TM, N), lambda i: (i, 0))]

    out = pl.pallas_call(
        _make_fused_kernel(prologue is not None, relu_out, add is not None),
        out_shape=jax.ShapeDtypeStruct((M, N), out_dtype),
        grid=grid,
        in_specs=in_specs,
        out_specs=pl.BlockSpec((TM, N), lambda i: (i, 0)),
        compiler_params=pltpu.CompilerParams(
            dimension_semantics=("parallel",),
            vmem_limit_bytes=32 * 1024 * 1024),
    )(*operands)
    return out


# ----------------------------------------------------------------------------
# Dense-grid analogs of the MinkowskiEngine layers
# ----------------------------------------------------------------------------
def _bn_scale_shift(bn, eps=1e-5):
    gamma, beta, mean, var = bn
    scale = gamma / jnp.sqrt(var + eps)
    shift = beta - mean * scale
    return scale, shift


def _im2col(x_nhwc, ksize, stride=1, dilation=1, padding=0):
    N, H, W, C = x_nhwc.shape
    xp = jnp.pad(x_nhwc, ((0, 0), (padding, padding), (padding, padding), (0, 0)))
    Hout = (H + 2 * padding - dilation * (ksize - 1) - 1) // stride + 1
    Wout = (W + 2 * padding - dilation * (ksize - 1) - 1) // stride + 1
    cols = []
    for di in range(ksize):
        for dj in range(ksize):
            cols.append(xp[:, di * dilation: di * dilation + stride * (Hout - 1) + 1: stride,
                            dj * dilation: dj * dilation + stride * (Wout - 1) + 1: stride, :])
    col = jnp.concatenate(cols, axis=-1).reshape(N * Hout * Wout, ksize * ksize * C)
    return col, Hout, Wout


def conv2d(x_nhwc, w, b, ksize, stride=1, dilation=1, padding=0, bn_prologue=None):
    """MinkowskiConvolution dense analog, optional fused BN+ReLU before the conv."""
    N, H, W, C = x_nhwc.shape
    if ksize == 1 and stride == 1:
        col, Hout, Wout = x_nhwc.reshape(N * H * W, C), H, W
    else:
        col, Hout, Wout = _im2col(x_nhwc, ksize, stride, dilation, padding)
    prologue = None
    if bn_prologue is not None:
        s, t = _bn_scale_shift(bn_prologue)
        prologue = (jnp.tile(s, ksize * ksize), jnp.tile(t, ksize * ksize))
    out = fused_matmul(col, w, prologue=prologue, epi_shift=b)
    return out.reshape(N, Hout, Wout, -1)


def conv_transpose2d_k2s2(x_nhwc, w, b, bn_prologue):
    """MinkowskiBatchNorm+ReLU+ConvTranspose(k=2,s=2) dense analog, fused matmul."""
    N, H, W, C = x_nhwc.shape
    Cout = w.shape[1] // 4
    s, t = _bn_scale_shift(bn_prologue)
    out = fused_matmul(x_nhwc.reshape(N * H * W, C), w,
                       prologue=(s, t), epi_shift=jnp.tile(b, 4))
    out = out.reshape(N, H, W, 2, 2, Cout)
    # TODO(synk): the 2x2 spatial interleave is an XLA transpose of a bf16 tensor
    #             (fused under jit); a strided-store Pallas variant would remove it.
    return out.transpose(0, 1, 3, 2, 4, 5).reshape(N, 2 * H, 2 * W, Cout)


# ----------------------------------------------------------------------------
# Parameter initialization (deterministic, PRNGKey(0) derived)
# ----------------------------------------------------------------------------
def _bn_init(c):
    return (jnp.ones((c,), jnp.float32), jnp.zeros((c,), jnp.float32),
            jnp.zeros((c,), jnp.float32), jnp.ones((c,), jnp.float32))


def _conv_init(key, ksize, cin, cout):
    fan_in = ksize * ksize * cin
    w = jax.random.normal(key, (fan_in, cout), jnp.float32) / np.sqrt(fan_in)
    return {"w": w, "b": jnp.zeros((cout,), jnp.float32)}


def _dilation_groups(cardinality, dilations, width):
    ds = [dilations[c % len(dilations)] for c in range(cardinality)]
    groups, start = [], 0
    for c in range(1, cardinality + 1):
        if c == cardinality or ds[c] != ds[start]:
            groups.append({"dilation": ds[start],
                           "paths": list(range(start, c)),
                           "lo": start * width, "hi": c * width})
            start = c
    return groups


def _resnext_block_init(key, fin, fout, cardinality, dilations):
    width = fout // cardinality
    groups = _dilation_groups(cardinality, dilations, width)
    k1, k2, kr = jax.random.split(key, 3)

    # all cardinality-path 1x1 convs merged column-wise
    w1 = jax.random.normal(k1, (fin, fout), jnp.float32) / np.sqrt(fin)
    b1 = jnp.zeros((fout,), jnp.float32)

    # per-path dilated 3x3 convs assembled into one block-diagonal matrix whose
    # K layout matches the grouped im2col built in resnext_block()
    per_path = np.asarray(
        jax.random.normal(k2, (cardinality, 9 * width, width), jnp.float32)
        / np.sqrt(9 * width))
    w2 = np.zeros((9 * fout, fout), np.float32)
    k_off = 0
    for g in groups:
        gw = len(g["paths"]) * width
        for lp, pidx in enumerate(g["paths"]):
            for tap in range(9):
                r0 = k_off + tap * gw + lp * width
                c0 = pidx * width
                w2[r0:r0 + width, c0:c0 + width] = \
                    per_path[pidx, tap * width:(tap + 1) * width, :]
        k_off += 9 * gw
    w2 = jnp.asarray(w2)
    b2 = jnp.zeros((fout,), jnp.float32)

    residual = None
    if fin != fout:
        residual = {"w": jax.random.normal(kr, (fin, fout), jnp.float32) / np.sqrt(fin),
                    "b": jnp.zeros((fout,), jnp.float32)}

    # TODO(synk): PyTorch ResNeXtBlock has one BatchNorm per cardinality path; with
    #             eval-mode default stats they are identical, so a shared BN is used.
    return {"bn1": _bn_init(fin), "w1": w1, "b1": b1,
            "bn2": _bn_init(fout), "w2": w2, "b2": b2,
            "groups": groups, "residual": residual}


def init_uresnext(key, cfg):
    depth, nf = cfg["depth"], cfg["num_filters"]
    card, reps = cfg["cardinality"], cfg["reps"]
    num_input, ik = cfg["num_input"], cfg["input_kernel"]
    dilations = [1, 1, 1, 1, 2, 2, 4, 4]
    assert nf % card == 0
    nPlanes = [(i + 1) * nf for i in range(depth)]

    keys = iter(jax.random.split(key, 256))
    params = {"nPlanes": nPlanes}
    params["input_layer"] = _conv_init(next(keys), ik, num_input, nf)

    enc_blocks, enc_convs = [], []
    for i, F in enumerate(nPlanes):
        enc_blocks.append([_resnext_block_init(next(keys), F, F, card, dilations)
                           for _ in range(reps)])
        if i < depth - 1:
            enc_convs.append({"bn": _bn_init(F),
                              "conv": _conv_init(next(keys), 2, F, nPlanes[i + 1])})
        else:
            enc_convs.append(None)
    params["encoding_block"] = enc_blocks
    params["encoding_conv"] = enc_convs

    dec_convs, dec_blocks = [], []
    for i in range(depth - 2, -1, -1):
        cin, cout = nPlanes[i + 1], nPlanes[i]
        # TODO(synk): (2,2) tap ordering / fan-in of this transpose-conv init is
        #             self-consistent here but must be re-checked if real PyTorch
        #             ConvTranspose weights are ever loaded.
        w = jax.random.normal(next(keys), (cin, 4 * cout), jnp.float32) / np.sqrt(4 * cin)
        dec_convs.append({"bn": _bn_init(cin), "w": w,
                          "b": jnp.zeros((cout,), jnp.float32)})
        blocks = []
        for j in range(reps):
            fin = cout * (2 if j == 0 else 1)
            blocks.append(_resnext_block_init(next(keys), fin, cout, card, dilations))
        dec_blocks.append(blocks)
    params["decoding_conv"] = dec_convs
    params["decoding_block"] = dec_blocks
    return params


# ----------------------------------------------------------------------------
# Forward pass (mirrors UResNeXt.encoder / UResNeXt.decoder / forward)
# ----------------------------------------------------------------------------
def resnext_block(x, p):
    N, H, W, Cin = x.shape
    fout = p["w1"].shape[1]
    s1, t1 = _bn_scale_shift(p["bn1"])
    s2, t2 = _bn_scale_shift(p["bn2"])
    xm = x.reshape(N * H * W, Cin)

    # Call 1: BN1+ReLU prologue -> merged 1x1 conv (all paths) -> bias+BN2+ReLU epilogue
    h = fused_matmul(
        xm, p["w1"],
        prologue=(s1, t1),
        epi_scale=s2,
        epi_shift=p["b1"] * s2 + t2,
        relu_out=True,
    ).reshape(N, H, W, fout)

    # Call 2: all dilation groups' 3x3 convs as ONE block-diagonal matmul; the
    # 1x1 residual projection (if any) is fused into the same matmul by appending
    # the raw block input to K, otherwise the identity residual is a fused add.
    cols = []
    for g in p["groups"]:
        d, lo, hi = g["dilation"], g["lo"], g["hi"]
        hg = jnp.pad(h[..., lo:hi], ((0, 0), (d, d), (d, d), (0, 0)))
        for a in range(3):
            for bb in range(3):
                cols.append(hg[:, a * d: a * d + H, bb * d: bb * d + W, :])
    if p["residual"] is not None:
        cols.append(x)                                        # raw input as extra K cols
        w2 = jnp.concatenate([p["w2"], p["residual"]["w"]], axis=0)
        b2 = p["b2"] + p["residual"]["b"]
        add = None
    else:
        w2, b2 = p["w2"], p["b2"]
        add = xm                                              # identity residual, fused add
    col = jnp.concatenate(cols, axis=-1).reshape(N * H * W, -1)
    out = fused_matmul(col, w2, epi_shift=b2, add=add)
    return out.reshape(N, H, W, fout)


def uresnext_forward(x_nchw, params, cfg):
    depth, ik = cfg["depth"], cfg["input_kernel"]
    # NCHW (PyTorch dense analog) -> NHWC (TPU lane-dense), bf16 activations
    x = jnp.transpose(x_nchw, (0, 2, 3, 1)).astype(jnp.bfloat16)

    il = params["input_layer"]
    x = conv2d(x, il["w"], il["b"], ksize=ik, padding=ik // 2)

    # ---- encoder ----
    encoderTensors = [x]
    for i in range(depth):
        for bp in params["encoding_block"][i]:
            x = resnext_block(x, bp)
        encoderTensors.append(x)
        ec = params["encoding_conv"][i]
        if ec is not None:
            # BN+ReLU fused as prologue of the strided-conv matmul
            x = conv2d(x, ec["conv"]["w"], ec["conv"]["b"], ksize=2, stride=2,
                       bn_prologue=ec["bn"])
    finalTensor = x

    # ---- decoder ----
    decoderTensors = []
    for j in range(depth - 1):
        eT = encoderTensors[-j - 2]
        dc = params["decoding_conv"][j]
        x = conv_transpose2d_k2s2(x, dc["w"], dc["b"], dc["bn"])
        x = jnp.concatenate([eT, x], axis=-1)   # ME.cat((eTensor, x))
        for bp in params["decoding_block"][j]:
            x = resnext_block(x, bp)
        decoderTensors.append(x)

    return {"encoderTensors": encoderTensors,
            "decoderTensors": decoderTensors,
            "finalTensor": finalTensor}


# ----------------------------------------------------------------------------
if __name__ == "__main__":
    cfg = dict(
        D=2,            # dense 2-D analog of the sparse ME convs
        num_input=2,
        num_filters=8,
        depth=3,
        cardinality=8,
        reps=1,
        input_kernel=3,
    )
    key = jax.random.PRNGKey(0)
    kp, kx = jax.random.split(key)
    params = init_uresnext(kp, cfg)

    # Dense analog input: batch=2, channels=num_input, 16x16 grid (NCHW).
    x = jax.random.normal(kx, (2, cfg["num_input"], 16, 16), jnp.float32)

    # End-to-end jit: pad/slice/im2col glue fuses, one dispatch for the whole net.
    fwd = jax.jit(lambda xin: uresnext_forward(xin, params, cfg))
    out = fwd(x)
    for leaf in jax.tree_util.tree_leaves(out):
        jax.block_until_ready(leaf)

    nP = params["nPlanes"]
    assert out["finalTensor"].shape == (2, 4, 4, nP[-1])
    assert out["decoderTensors"][-1].shape == (2, 16, 16, nP[0])
    assert len(out["encoderTensors"]) == cfg["depth"] + 1
    assert all(bool(jnp.isfinite(t.astype(jnp.float32)).all())
               for t in out["decoderTensors"])
    print("KERNEL_OK")
</pallas_src>

<mosaic_0001>
module attributes {stable_mosaic.version = 11 : i64} {
  func.func @kernel(%arg0: i32, %arg1: memref<256x18xbf16, #tpu.memory_space<vmem>>, %arg2: memref<18x8xbf16, #tpu.memory_space<vmem>>, %arg3: memref<1x8xf32, #tpu.memory_space<vmem>>, %arg4: memref<1x8xf32, #tpu.memory_space<vmem>>, %arg5: memref<256x8xbf16, #tpu.memory_space<vmem>>) attributes {dimension_semantics = [#tpu.dimension_semantics<parallel>], iteration_bounds = array<i64: 2>, scalar_prefetch = 0 : i64, scratch_operands = 0 : i64, tpu.core_type = #tpu.core_type<tc>, window_params = [{transform_indices = @transform_0, window_bounds = array<i64: 256, 18>}, {pipeline_mode = #tpu.pipeline_mode<synchronous>, transform_indices = @transform_1, window_bounds = array<i64: 18, 8>}, {pipeline_mode = #tpu.pipeline_mode<synchronous>, transform_indices = @transform_2, window_bounds = array<i64: 1, 8>}, {pipeline_mode = #tpu.pipeline_mode<synchronous>, transform_indices = @transform_3, window_bounds = array<i64: 1, 8>}, {transform_indices = @transform_4, window_bounds = array<i64: 256, 8>}]} {
    %c0 = arith.constant 0 : index
    %c0_0 = arith.constant 0 : index
    %0 = vector.load %arg1[%c0, %c0_0] : memref<256x18xbf16, #tpu.memory_space<vmem>>, vector<256x18xbf16>
    %c0_1 = arith.constant 0 : index
    %c0_2 = arith.constant 0 : index
    %1 = vector.load %arg2[%c0_1, %c0_2] : memref<18x8xbf16, #tpu.memory_space<vmem>>, vector<18x8xbf16>
    %cst = arith.constant dense<0.000000e+00> : vector<256x8xf32>
    %2 = tpu.matmul %0, %1, %cst {dimension_numbers = #tpu.dot_dimension_numbers<[1], [0], [0], [1], [0, 0, 1, 1], [], []>} : vector<256x18xbf16>, vector<18x8xbf16>, vector<256x8xf32> -> vector<256x8xf32>
    %c0_3 = arith.constant 0 : index
    %c0_4 = arith.constant 0 : index
    %3 = vector.load %arg3[%c0_3, %c0_4] : memref<1x8xf32, #tpu.memory_space<vmem>>, vector<1x8xf32>
    %4 = vector.broadcast %3 : vector<1x8xf32> to vector<256x8xf32>
    %5 = arith.mulf %2, %4 : vector<256x8xf32>
    %c0_5 = arith.constant 0 : index
    %c0_6 = arith.constant 0 : index
    %6 = vector.load %arg4[%c0_5, %c0_6] : memref<1x8xf32, #tpu.memory_space<vmem>>, vector<1x8xf32>
    %7 = vector.broadcast %6 : vector<1x8xf32> to vector<256x8xf32>
    %8 = arith.addf %5, %7 : vector<256x8xf32>
    %9 = arith.truncf %8 : vector<256x8xf32> to vector<256x8xbf16>
    %c0_7 = arith.constant 0 : index
    %c0_8 = arith.constant 0 : index
    %10 = vector.load %arg5[%c0_7, %c0_8] : memref<256x8xbf16, #tpu.memory_space<vmem>>, vector<256x8xbf16>
    tpu.vector_store %arg5[%c0_7, %c0_8], %9 {strides = array<i32>} : memref<256x8xbf16, #tpu.memory_space<vmem>>, vector<256x8xbf16>,
    return
  }
  func.func @transform_0(%arg0: i32) -> (i32, i32) {
    %c0_i32 = arith.constant 0 : i32
    %c0_i32_0 = arith.constant 0 : i32
    return %arg0, %c0_i32 : i32, i32
  }
  func.func @transform_1(%arg0: i32) -> (i32, i32) {
    %c0_i32 = arith.constant 0 : i32
    %c0_i32_0 = arith.constant 0 : i32
    %c0_i32_1 = arith.constant 0 : i32
    return %c0_i32, %c0_i32_0 : i32, i32
  }
  func.func @transform_2(%arg0: i32) -> (i32, i32) {
    %c0_i32 = arith.constant 0 : i32
    %c0_i32_0 = arith.constant 0 : i32
    %c0_i32_1 = arith.constant 0 : i32
    return %c0_i32, %c0_i32_0 : i32, i32
  }
  func.func @transform_3(%arg0: i32) -> (i32, i32) {
    %c0_i32 = arith.constant 0 : i32
    %c0_i32_0 = arith.constant 0 : i32
    %c0_i32_1 = arith.constant 0 : i32
    return %c0_i32, %c0_i32_0 : i32, i32
  }
  func.func @transform_4(%arg0: i32) -> (i32, i32) {
    %c0_i32 = arith.constant 0 : i32
    %c0_i32_0 = arith.constant 0 : i32
    return %arg0, %c0_i32 : i32, i32
  }
}

module attributes {stable_mosaic.version = 11 : i64} {
  func.func @kernel(%arg0: i32, %arg1: memref<256x8xbf16, #tpu.memory_space<vmem>>, %arg2: memref<1x8xf32, #tpu.memory_space<vmem>>, %arg3: memref<1x8xf32, #tpu.memory_space<vmem>>, %arg4: memref<8x8xbf16, #tpu.memory_space<vmem>>, %arg5: memref<1x8xf32, #tpu.memory_space<vmem>>, %arg6: memref<1x8xf32, #tpu.memory_space<vmem>>, %arg7: memref<256x8xbf16, #tpu.memory_space<vmem>>) attributes {dimension_semantics = [#tpu.dimension_semantics<parallel>], iteration_bounds = array<i64: 2>, scalar_prefetch = 0 : i64, scratch_operands = 0 : i64, tpu.core_type = #tpu.core_type<tc>, window_params = [{transform_indices = @transform_0, window_bounds = array<i64: 256, 8>}, {pipeline_mode = #tpu.pipeline_mode<synchronous>, transform_indices = @transform_1, window_bounds = array<i64: 1, 8>}, {pipeline_mode = #tpu.pipeline_mode<synchronous>, transform_indices = @transform_2, window_bounds = array<i64: 1, 8>}, {pipeline_mode = #tpu.pipeline_mode<synchronous>, transform_indices = @transform_3, window_bounds = array<i64: 8, 8>}, {pipeline_mode = #tpu.pipeline_mode<synchronous>, transform_indices = @transform_4, window_bounds = array<i64: 1, 8>}, {pipeline_mode = #tpu.pipeline_mode<synchronous>, transform_indices = @transform_5, window_bounds = array<i64: 1, 8>}, {transform_indices = @transform_6, window_bounds = array<i64: 256, 8>}]} {
    %c0 = arith.constant 0 : index
    %c0_0 = arith.constant 0 : index
    %0 = vector.load %arg1[%c0, %c0_0] : memref<256x8xbf16, #tpu.memory_space<vmem>>, vector<256x8xbf16>
    %1 = arith.extf %0 : vector<256x8xbf16> to vector<256x8xf32>
    %c0_1 = arith.constant 0 : index
    %c0_2 = arith.constant 0 : index
    %2 = vector.load %arg2[%c0_1, %c0_2] : memref<1x8xf32, #tpu.memory_space<vmem>>, vector<1x8xf32>
    %3 = vector.broadcast %2 : vector<1x8xf32> to vector<256x8xf32>
    %4 = arith.mulf %1, %3 : vector<256x8xf32>
    %c0_3 = arith.constant 0 : index
    %c0_4 = arith.constant 0 : index
    %5 = vector.load %arg3[%c0_3, %c0_4] : memref<1x8xf32, #tpu.memory_space<vmem>>, vector<1x8xf32>
    %6 = vector.broadcast %5 : vector<1x8xf32> to vector<256x8xf32>
    %7 = arith.addf %4, %6 : vector<256x8xf32>
    %cst = arith.constant 0.000000e+00 : f32
    %8 = vector.broadcast %cst : f32 to vector<256x8xf32>
    %9 = arith.maximumf %7, %8 : vector<256x8xf32>
    %10 = arith.truncf %9 : vector<256x8xf32> to vector<256x8xbf16>
    %c0_5 = arith.constant 0 : index
    %c0_6 = arith.constant 0 : index
    %11 = vector.load %arg4[%c0_5, %c0_6] : memref<8x8xbf16, #tpu.memory_space<vmem>>, vector<8x8xbf16>
    %cst_7 = arith.constant dense<0.000000e+00> : vector<256x8xf32>
    %12 = tpu.matmul %10, %11, %cst_7 {dimension_numbers = #tpu.dot_dimension_numbers<[1], [0], [0], [1], [0, 0, 1, 1], [], []>} : vector<256x8xbf16>, vector<8x8xbf16>, vector<256x8xf32> -> vector<256x8xf32>
    %c0_8 = arith.constant 0 : index
    %c0_9 = arith.constant 0 : index
    %13 = vector.load %arg5[%c0_8, %c0_9] : memref<1x8xf32, #tpu.memory_space<vmem>>, vector<1x8xf32>
    %14 = vector.broadcast %13 : vector<1x8xf32> to vector<256x8xf32>
    %15 = arith.mulf %12, %14 : vector<256x8xf32>
    %c0_10 = arith.constant 0 : index
    %c0_11 = arith.constant 0 : index
    %16 = vector.load %arg6[%c0_10, %c0_11] : memref<1x8xf32, #tpu.memory_space<vmem>>, vector<1x8xf32>
    %17 = vector.broadcast %16 : vector<1x8xf32> to vector<256x8xf32>
    %18 = arith.addf %15, %17 : vector<256x8xf32>
    %cst_12 = arith.constant 0.000000e+00 : f32
    %19 = vector.broadcast %cst_12 : f32 to vector<256x8xf32>
    %20 = arith.maximumf %18, %19 : vector<256x8xf32>
    %21 = arith.truncf %20 : vector<256x8xf32> to vector<256x8xbf16>
    %c0_13 = arith.constant 0 : index
    %c0_14 = arith.constant 0 : index
    %22 = vector.load %arg7[%c0_13, %c0_14] : memref<256x8xbf16, #tpu.memory_space<vmem>>, vector<256x8xbf16>
    tpu.vector_store %arg7[%c0_13, %c0_14], %21 {strides = array<i32>} : memref<256x8xbf16, #tpu.memory_space<vmem>>, vector<256x8xbf16>,
    return
  }
  func.func @transform_0(%arg0: i32) -> (i32, i32) {
    %c0_i32 = arith.constant 0 : i32
    %c0_i32_0 = arith.constant 0 : i32
    return %arg0, %c0_i32 : i32, i32
  }
  func.func @transform_1(%arg0: i32) -> (i32, i32) {
    %c0_i32 = arith.constant 0 : i32
    %c0_i32_0 = arith.constant 0 : i32
    %c0_i32_1 = arith.constant 0 : i32
    return %c0_i32, %c0_i32_0 : i32, i32
  }
  func.func @transform_2(%arg0: i32) -> (i32, i32) {
    %c0_i32 = arith.constant 0 : i32
    %c0_i32_0 = arith.constant 0 : i32
    %c0_i32_1 = arith.constant 0 : i32
    return %c0_i32, %c0_i32_0 : i32, i32
  }
  func.func @transform_3(%arg0: i32) -> (i32, i32) {
    %c0_i32 = arith.constant 0 : i32
    %c0_i32_0 = arith.constant 0 : i32
    %c0_i32_1 = arith.constant 0 : i32
    return %c0_i32, %c0_i32_0 : i32, i32
  }
  func.func @transform_4(%arg0: i32) -> (i32, i32) {
    %c0_i32 = arith.constant 0 : i32
    %c0_i32_0 = arith.constant 0 : i32
    %c0_i32_1 = arith.constant 0 : i32
    return %c0_i32, %c0_i32_0 : i32, i32
  }
  func.func @transform_5(%arg0: i32) -> (i32, i32) {
    %c0_i32 = arith.constant 0 : i32
    %c0_i32_0 = arith.constant 0 : i32
    %c0_i32_1 = arith.constant 0 : i32
    return %c0_i32, %c0_i32_0 : i32, i32
  }
  func.func @transform_6(%arg0: i32) -> (i32, i32) {
    %c0_i32 = arith.constant 0 : i32
    %c0_i32_0 = arith.constant 0 : i32
    return %arg0, %c0_i32 : i32, i32
  }
}

module attributes {stable_mosaic.version = 11 : i64} {
  func.func @kernel(%arg0: i32, %arg1: memref<256x72xbf16, #tpu.memory_space<vmem>>, %arg2: memref<72x8xbf16, #tpu.memory_space<vmem>>, %arg3: memref<1x8xf32, #tpu.memory_space<vmem>>, %arg4: memref<1x8xf32, #tpu.memory_space<vmem>>, %arg5: memref<256x8xbf16, #tpu.memory_space<vmem>>, %arg6: memref<256x8xbf16, #tpu.memory_space<vmem>>) attributes {dimension_semantics = [#tpu.dimension_semantics<parallel>], iteration_bounds = array<i64: 2>, scalar_prefetch = 0 : i64, scratch_operands = 0 : i64, tpu.core_type = #tpu.core_type<tc>, window_params = [{transform_indices = @transform_0, window_bounds = array<i64: 256, 72>}, {pipeline_mode = #tpu.pipeline_mode<synchronous>, transform_indices = @transform_1, window_bounds = array<i64: 72, 8>}, {pipeline_mode = #tpu.pipeline_mode<synchronous>, transform_indices = @transform_2, window_bounds = array<i64: 1, 8>}, {pipeline_mode = #tpu.pipeline_mode<synchronous>, transform_indices = @transform_3, window_bounds = array<i64: 1, 8>}, {transform_indices = @transform_4, window_bounds = array<i64: 256, 8>}, {transform_indices = @transform_5, window_bounds = array<i64: 256, 8>}]} {
    %c0 = arith.constant 0 : index
    %c0_0 = arith.constant 0 : index
    %0 = vector.load %arg1[%c0, %c0_0] : memref<256x72xbf16, #tpu.memory_space<vmem>>, vector<256x72xbf16>
    %c0_1 = arith.constant 0 : index
    %c0_2 = arith.constant 0 : index
    %1 = vector.load %arg2[%c0_1, %c0_2] : memref<72x8xbf16, #tpu.memory_space<vmem>>, vector<72x8xbf16>
    %cst = arith.constant dense<0.000000e+00> : vector<256x8xf32>
    %2 = tpu.matmul %0, %1, %cst {dimension_numbers = #tpu.dot_dimension_numbers<[1], [0], [0], [1], [0, 0, 1, 1], [], []>} : vector<256x72xbf16>, vector<72x8xbf16>, vector<256x8xf32> -> vector<256x8xf32>
    %c0_3 = arith.constant 0 : index
    %c0_4 = arith.constant 0 : index
    %3 = vector.load %arg3[%c0_3, %c0_4] : memref<1x8xf32, #tpu.memory_space<vmem>>, vector<1x8xf32>
    %4 = vector.broadcast %3 : vector<1x8xf32> to vector<256x8xf32>
    %5 = arith.mulf %2, %4 : vector<256x8xf32>
    %c0_5 = arith.constant 0 : index
    %c0_6 = arith.constant 0 : index
    %6 = vector.load %arg4[%c0_5, %c0_6] : memref<1x8xf32, #tpu.memory_space<vmem>>, vector<1x8xf32>
    %7 = vector.broadcast %6 : vector<1x8xf32> to vector<256x8xf32>
    %8 = arith.addf %5, %7 : vector<256x8xf32>
    %c0_7 = arith.constant 0 : index
    %c0_8 = arith.constant 0 : index
    %9 = vector.load %arg5[%c0_7, %c0_8] : memref<256x8xbf16, #tpu.memory_space<vmem>>, vector<256x8xbf16>
    %10 = arith.extf %9 : vector<256x8xbf16> to vector<256x8xf32>
    %11 = arith.addf %8, %10 : vector<256x8xf32>
    %12 = arith.truncf %11 : vector<256x8xf32> to vector<256x8xbf16>
    %c0_9 = arith.constant 0 : index
    %c0_10 = arith.constant 0 : index
    %13 = vector.load %arg6[%c0_9, %c0_10] : memref<256x8xbf16, #tpu.memory_space<vmem>>, vector<256x8xbf16>
    tpu.vector_store %arg6[%c0_9, %c0_10], %12 {strides = array<i32>} : memref<256x8xbf16, #tpu.memory_space<vmem>>, vector<256x8xbf16>,
    return
  }
  func.func @transform_0(%arg0: i32) -> (i32, i32) {
    %c0_i32 = arith.constant 0 : i32
    %c0_i32_0 = arith.constant 0 : i32
    return %arg0, %c0_i32 : i32, i32
  }
  func.func @transform_1(%arg0: i32) -> (i32, i32) {
    %c0_i32 = arith.constant 0 : i32
    %c0_i32_0 = arith.constant 0 : i32
    %c0_i32_1 = arith.constant 0 : i32
    return %c0_i32, %c0_i32_0 : i32, i32
  }
  func.func @transform_2(%arg0: i32) -> (i32, i32) {
    %c0_i32 = arith.constant 0 : i32
    %c0_i32_0 = arith.constant 0 : i32
    %c0_i32_1 = arith.constant 0 : i32
    return %c0_i32, %c0_i32_0 : i32, i32
  }
  func.func @transform_3(%arg0: i32) -> (i32, i32) {
    %c0_i32 = arith.constant 0 : i32
    %c0_i32_0 = arith.constant 0 : i32
    %c0_i32_1 = arith.constant 0 : i32
    return %c0_i32, %c0_i32_0 : i32, i32
  }
  func.func @transform_4(%arg0: i32) -> (i32, i32) {
    %c0_i32 = arith.constant 0 : i32
    %c0_i32_0 = arith.constant 0 : i32
    return %arg0, %c0_i32 : i32, i32
  }
  func.func @transform_5(%arg0: i32) -> (i32, i32) {
    %c0_i32 = arith.constant 0 : i32
    %c0_i32_0 = arith.constant 0 : i32
    return %arg0, %c0_i32 : i32, i32
  }
}

module attributes {stable_mosaic.version = 11 : i64} {
  func.func @kernel(%arg0: i32, %arg1: memref<64x32xbf16, #tpu.memory_space<vmem>>, %arg2: memref<1x32xf32, #tpu.memory_space<vmem>>, %arg3: memref<1x32xf32, #tpu.memory_space<vmem>>, %arg4: memref<32x16xbf16, #tpu.memory_space<vmem>>, %arg5: memref<1x16xf32, #tpu.memory_space<vmem>>, %arg6: memref<1x16xf32, #tpu.memory_space<vmem>>, %arg7: memref<64x16xbf16, #tpu.memory_space<vmem>>) attributes {dimension_semantics = [#tpu.dimension_semantics<parallel>], iteration_bounds = array<i64: 2>, scalar_prefetch = 0 : i64, scratch_operands = 0 : i64, tpu.core_type = #tpu.core_type<tc>, window_params = [{transform_indices = @transform_0, window_bounds = array<i64: 64, 32>}, {pipeline_mode = #tpu.pipeline_mode<synchronous>, transform_indices = @transform_1, window_bounds = array<i64: 1, 32>}, {pipeline_mode = #tpu.pipeline_mode<synchronous>, transform_indices = @transform_2, window_bounds = array<i64: 1, 32>}, {pipeline_mode = #tpu.pipeline_mode<synchronous>, transform_indices = @transform_3, window_bounds = array<i64: 32, 16>}, {pipeline_mode = #tpu.pipeline_mode<synchronous>, transform_indices = @transform_4, window_bounds = array<i64: 1, 16>}, {pipeline_mode = #tpu.pipeline_mode<synchronous>, transform_indices = @transform_5, window_bounds = array<i64: 1, 16>}, {transform_indices = @transform_6, window_bounds = array<i64: 64, 16>}]} {
    %c0 = arith.constant 0 : index
    %c0_0 = arith.constant 0 : index
    %0 = vector.load %arg1[%c0, %c0_0] : memref<64x32xbf16, #tpu.memory_space<vmem>>, vector<64x32xbf16>
    %1 = arith.extf %0 : vector<64x32xbf16> to vector<64x32xf32>
    %c0_1 = arith.constant 0 : index
    %c0_2 = arith.constant 0 : index
    %2 = vector.load %arg2[%c0_1, %c0_2] : memref<1x32xf32, #tpu.memory_space<vmem>>, vector<1x32xf32>
    %3 = vector.broadcast %2 : vector<1x32xf32> to vector<64x32xf32>
    %4 = arith.mulf %1, %3 : vector<64x32xf32>
    %c0_3 = arith.constant 0 : index
    %c0_4 = arith.constant 0 : index
    %5 = vector.load %arg3[%c0_3, %c0_4] : memref<1x32xf32, #tpu.memory_space<vmem>>, vector<1x32xf32>
    %6 = vector.broadcast %5 : vector<1x32xf32> to vector<64x32xf32>
    %7 = arith.addf %4, %6 : vector<64x32xf32>
    %cst = arith.constant 0.000000e+00 : f32
    %8 = vector.broadcast %cst : f32 to vector<64x32xf32>
    %9 = arith.maximumf %7, %8 : vector<64x32xf32>
    %10 = arith.truncf %9 : vector<64x32xf32> to vector<64x32xbf16>
    %c0_5 = arith.constant 0 : index
    %c0_6 = arith.constant 0 : index
    %11 = vector.load %arg4[%c0_5, %c0_6] : memref<32x16xbf16, #tpu.memory_space<vmem>>, vector<32x16xbf16>
    %cst_7 = arith.constant dense<0.000000e+00> : vector<64x16xf32>
    %12 = tpu.matmul %10, %11, %cst_7 {dimension_numbers = #tpu.dot_dimension_numbers<[1], [0], [0], [1], [0, 0, 1, 1], [], []>} : vector<64x32xbf16>, vector<32x16xbf16>, vector<64x16xf32> -> vector<64x16xf32>
    %c0_8 = arith.constant 0 : index
    %c0_9 = arith.constant 0 : index
    %13 = vector.load %arg5[%c0_8, %c0_9] : memref<1x16xf32, #tpu.memory_space<vmem>>, vector<1x16xf32>
    %14 = vector.broadcast %13 : vector<1x16xf32> to vector<64x16xf32>
    %15 = arith.mulf %12, %14 : vector<64x16xf32>
    %c0_10 = arith.constant 0 : index
    %c0_11 = arith.constant 0 : index
    %16 = vector.load %arg6[%c0_10, %c0_11] : memref<1x16xf32, #tpu.memory_space<vmem>>, vector<1x16xf32>
    %17 = vector.broadcast %16 : vector<1x16xf32> to vector<64x16xf32>
    %18 = arith.addf %15, %17 : vector<64x16xf32>
    %19 = arith.truncf %18 : vector<64x16xf32> to vector<64x16xbf16>
    %c0_12 = arith.constant 0 : index
    %c0_13 = arith.constant 0 : index
    %20 = vector.load %arg7[%c0_12, %c0_13] : memref<64x16xbf16, #tpu.memory_space<vmem>>, vector<64x16xbf16>
    tpu.vector_store %arg7[%c0_12, %c0_13], %19 {strides = array<i32>} : memref<64x16xbf16, #tpu.memory_space<vmem>>, vector<64x16xbf16>,
    return
  }
  func.func @transform_0(%arg0: i32) -> (i32, i32) {
    %c0_i32 = arith.constant 0 : i32
    %c0_i32_0 = arith.constant 0 : i32
    return %arg0, %c0_i32 : i32, i32
  }
  func.func @transform_1(%arg0: i32) -> (i32, i32) {
    %c0_i32 = arith.constant 0 : i32
    %c0_i32_0 = arith.constant 0 : i32
    %c0_i32_1 = arith.constant 0 : i32
    return %c0_i32, %c0_i32_0 : i32, i32
  }
  func.func @transform_2(%arg0: i32) -> (i32, i32) {
    %c0_i32 = arith.constant 0 : i32
    %c0_i32_0 = arith.constant 0 : i32
    %c0_i32_1 = arith.constant 0 : i32
    return %c0_i32, %c0_i32_0 : i32, i32
  }
  func.func @transform_3(%arg0: i32) -> (i32, i32) {
    %c0_i32 = arith.constant 0 : i32
    %c0_i32_0 = arith.constant 0 : i32
    %c0_i32_1 = arith.constant 0 : i32
    return %c0_i32, %c0_i32_0 : i32, i32
  }
  func.func @transform_4(%arg0: i32) -> (i32, i32) {
    %c0_i32 = arith.constant 0 : i32
    %c0_i32_0 = arith.constant 0 : i32
    %c0_i32_1 = arith.constant 0 : i32
    return %c0_i32, %c0_i32_0 : i32, i32
  }
  func.func @transform_5(%arg0: i32) -> (i32, i32) {
    %c0_i32 = arith.constant 0 : i32
    %c0_i32_0 = arith.constant 0 : i32
    %c0_i32_1 = arith.constant 0 : i32
    return %c0_i32, %c0_i32_0 : i32, i32
  }
  func.func @transform_6(%arg0: i32) -> (i32, i32) {
    %c0_i32 = arith.constant 0 : i32
    %c0_i32_0 = arith.constant 0 : i32
    return %arg0, %c0_i32 : i32, i32
  }
}

module attributes {stable_mosaic.version = 11 : i64} {
  func.func @kernel(%arg0: i32, %arg1: memref<64x16xbf16, #tpu.memory_space<vmem>>, %arg2: memref<1x16xf32, #tpu.memory_space<vmem>>, %arg3: memref<1x16xf32, #tpu.memory_space<vmem>>, %arg4: memref<16x16xbf16, #tpu.memory_space<vmem>>, %arg5: memref<1x16xf32, #tpu.memory_space<vmem>>, %arg6: memref<1x16xf32, #tpu.memory_space<vmem>>, %arg7: memref<64x16xbf16, #tpu.memory_space<vmem>>) attributes {dimension_semantics = [#tpu.dimension_semantics<parallel>], iteration_bounds = array<i64: 2>, scalar_prefetch = 0 : i64, scratch_operands = 0 : i64, tpu.core_type = #tpu.core_type<tc>, window_params = [{transform_indices = @transform_0, window_bounds = array<i64: 64, 16>}, {pipeline_mode = #tpu.pipeline_mode<synchronous>, transform_indices = @transform_1, window_bounds = array<i64: 1, 16>}, {pipeline_mode = #tpu.pipeline_mode<synchronous>, transform_indices = @transform_2, window_bounds = array<i64: 1, 16>}, {pipeline_mode = #tpu.pipeline_mode<synchronous>, transform_indices = @transform_3, window_bounds = array<i64: 16, 16>}, {pipeline_mode = #tpu.pipeline_mode<synchronous>, transform_indices = @transform_4, window_bounds = array<i64: 1, 16>}, {pipeline_mode = #tpu.pipeline_mode<synchronous>, transform_indices = @transform_5, window_bounds = array<i64: 1, 16>}, {transform_indices = @transform_6, window_bounds = array<i64: 64, 16>}]} {
    %c0 = arith.constant 0 : index
    %c0_0 = arith.constant 0 : index
    %0 = vector.load %arg1[%c0, %c0_0] : memref<64x16xbf16, #tpu.memory_space<vmem>>, vector<64x16xbf16>
    %1 = arith.extf %0 : vector<64x16xbf16> to vector<64x16xf32>
    %c0_1 = arith.constant 0 : index
    %c0_2 = arith.constant 0 : index
    %2 = vector.load %arg2[%c0_1, %c0_2] : memref<1x16xf32, #tpu.memory_space<vmem>>, vector<1x16xf32>
    %3 = vector.broadcast %2 : vector<1x16xf32> to vector<64x16xf32>
    %4 = arith.mulf %1, %3 : vector<64x16xf32>
    %c0_3 = arith.constant 0 : index
    %c0_4 = arith.constant 0 : index
    %5 = vector.load %arg3[%c0_3, %c0_4] : memref<1x16xf32, #tpu.memory_space<vmem>>, vector<1x16xf32>
    %6 = vector.broadcast %5 : vector<1x16xf32> to vector<64x16xf32>
    %7 = arith.addf %4, %6 : vector<64x16xf32>
    %cst = arith.constant 0.000000e+00 : f32
    %8 = vector.broadcast %cst : f32 to vector<64x16xf32>
    %9 = arith.maximumf %7, %8 : vector<64x16xf32>
    %10 = arith.truncf %9 : vector<64x16xf32> to vector<64x16xbf16>
    %c0_5 = arith.constant 0 : index
    %c0_6 = arith.constant 0 : index
    %11 = vector.load %arg4[%c0_5, %c0_6] : memref<16x16xbf16, #tpu.memory_space<vmem>>, vector<16x16xbf16>
    %cst_7 = arith.constant dense<0.000000e+00> : vector<64x16xf32>
    %12 = tpu.matmul %10, %11, %cst_7 {dimension_numbers = #tpu.dot_dimension_numbers<[1], [0], [0], [1], [0, 0, 1, 1], [], []>} : vector<64x16xbf16>, vector<16x16xbf16>, vector<64x16xf32> -> vector<64x16xf32>
    %c0_8 = arith.constant 0 : index
    %c0_9 = arith.constant 0 : index
    %13 = vector.load %arg5[%c0_8, %c0_9] : memref<1x16xf32, #tpu.memory_space<vmem>>, vector<1x16xf32>
    %14 = vector.broadcast %13 : vector<1x16xf32> to vector<64x16xf32>
    %15 = arith.mulf %12, %14 : vector<64x16xf32>
    %c0_10 = arith.constant 0 : index
    %c0_11 = arith.constant 0 : index
    %16 = vector.load %arg6[%c0_10, %c0_11] : memref<1x16xf32, #tpu.memory_space<vmem>>, vector<1x16xf32>
    %17 = vector.broadcast %16 : vector<1x16xf32> to vector<64x16xf32>
    %18 = arith.addf %15, %17 : vector<64x16xf32>
    %cst_12 = arith.constant 0.000000e+00 : f32
    %19 = vector.broadcast %cst_12 : f32 to vector<64x16xf32>
    %20 = arith.maximumf %18, %19 : vector<64x16xf32>
    %21 = arith.truncf %20 : vector<64x16xf32> to vector<64x16xbf16>
    %c0_13 = arith.constant 0 : index
    %c0_14 = arith.constant 0 : index
    %22 = vector.load %arg7[%c0_13, %c0_14] : memref<64x16xbf16, #tpu.memory_space<vmem>>, vector<64x16xbf16>
    tpu.vector_store %arg7[%c0_13, %c0_14], %21 {strides = array<i32>} : memref<64x16xbf16, #tpu.memory_space<vmem>>, vector<64x16xbf16>,
    return
  }
  func.func @transform_0(%arg0: i32) -> (i32, i32) {
    %c0_i32 = arith.constant 0 : i32
    %c0_i32_0 = arith.constant 0 : i32
    return %arg0, %c0_i32 : i32, i32
  }
  func.func @transform_1(%arg0: i32) -> (i32, i32) {
    %c0_i32 = arith.constant 0 : i32
    %c0_i32_0 = arith.constant 0 : i32
    %c0_i32_1 = arith.constant 0 : i32
    return %c0_i32, %c0_i32_0 : i32, i32
  }
  func.func @transform_2(%arg0: i32) -> (i32, i32) {
    %c0_i32 = arith.constant 0 : i32
    %c0_i32_0 = arith.constant 0 : i32
    %c0_i32_1 = arith.constant 0 : i32
    return %c0_i32, %c0_i32_0 : i32, i32
  }
  func.func @transform_3(%arg0: i32) -> (i32, i32) {
    %c0_i32 = arith.constant 0 : i32
    %c0_i32_0 = arith.constant 0 : i32
    %c0_i32_1 = arith.constant 0 : i32
    return %c0_i32, %c0_i32_0 : i32, i32
  }
  func.func @transform_4(%arg0: i32) -> (i32, i32) {
    %c0_i32 = arith.constant 0 : i32
    %c0_i32_0 = arith.constant 0 : i32
    %c0_i32_1 = arith.constant 0 : i32
    return %c0_i32, %c0_i32_0 : i32, i32
  }
  func.func @transform_5(%arg0: i32) -> (i32, i32) {
    %c0_i32 = arith.constant 0 : i32
    %c0_i32_0 = arith.constant 0 : i32
    %c0_i32_1 = arith.constant 0 : i32
    return %c0_i32, %c0_i32_0 : i32, i32
  }
  func.func @transform_6(%arg0: i32) -> (i32, i32) {
    %c0_i32 = arith.constant 0 : i32
    %c0_i32_0 = arith.constant 0 : i32
    return %arg0, %c0_i32 : i32, i32
  }
}

module attributes {stable_mosaic.version = 11 : i64} {
  func.func @kernel(%arg0: i32, %arg1: memref<64x144xbf16, #tpu.memory_space<vmem>>, %arg2: memref<144x16xbf16, #tpu.memory_space<vmem>>, %arg3: memref<1x16xf32, #tpu.memory_space<vmem>>, %arg4: memref<1x16xf32, #tpu.memory_space<vmem>>, %arg5: memref<64x16xbf16, #tpu.memory_space<vmem>>, %arg6: memref<64x16xbf16, #tpu.memory_space<vmem>>) attributes {dimension_semantics = [#tpu.dimension_semantics<parallel>], iteration_bounds = array<i64: 2>, scalar_prefetch = 0 : i64, scratch_operands = 0 : i64, tpu.core_type = #tpu.core_type<tc>, window_params = [{transform_indices = @transform_0, window_bounds = array<i64: 64, 144>}, {pipeline_mode = #tpu.pipeline_mode<synchronous>, transform_indices = @transform_1, window_bounds = array<i64: 144, 16>}, {pipeline_mode = #tpu.pipeline_mode<synchronous>, transform_indices = @transform_2, window_bounds = array<i64: 1, 16>}, {pipeline_mode = #tpu.pipeline_mode<synchronous>, transform_indices = @transform_3, window_bounds = array<i64: 1, 16>}, {transform_indices = @transform_4, window_bounds = array<i64: 64, 16>}, {transform_indices = @transform_5, window_bounds = array<i64: 64, 16>}]} {
    %c0 = arith.constant 0 : index
    %c0_0 = arith.constant 0 : index
    %0 = vector.load %arg1[%c0, %c0_0] : memref<64x144xbf16, #tpu.memory_space<vmem>>, vector<64x144xbf16>
    %c0_1 = arith.constant 0 : index
    %c0_2 = arith.constant 0 : index
    %1 = vector.load %arg2[%c0_1, %c0_2] : memref<144x16xbf16, #tpu.memory_space<vmem>>, vector<144x16xbf16>
    %cst = arith.constant dense<0.000000e+00> : vector<64x16xf32>
    %2 = tpu.matmul %0, %1, %cst {dimension_numbers = #tpu.dot_dimension_numbers<[1], [0], [0], [1], [0, 0, 1, 1], [], []>} : vector<64x144xbf16>, vector<144x16xbf16>, vector<64x16xf32> -> vector<64x16xf32>
    %c0_3 = arith.constant 0 : index
    %c0_4 = arith.constant 0 : index
    %3 = vector.load %arg3[%c0_3, %c0_4] : memref<1x16xf32, #tpu.memory_space<vmem>>, vector<1x16xf32>
    %4 = vector.broadcast %3 : vector<1x16xf32> to vector<64x16xf32>
    %5 = arith.mulf %2, %4 : vector<64x16xf32>
    %c0_5 = arith.constant 0 : index
    %c0_6 = arith.constant 0 : index
    %6 = vector.load %arg4[%c0_5, %c0_6] : memref<1x16xf32, #tpu.memory_space<vmem>>, vector<1x16xf32>
    %7 = vector.broadcast %6 : vector<1x16xf32> to vector<64x16xf32>
    %8 = arith.addf %5, %7 : vector<64x16xf32>
    %c0_7 = arith.constant 0 : index
    %c0_8 = arith.constant 0 : index
    %9 = vector.load %arg5[%c0_7, %c0_8] : memref<64x16xbf16, #tpu.memory_space<vmem>>, vector<64x16xbf16>
    %10 = arith.extf %9 : vector<64x16xbf16> to vector<64x16xf32>
    %11 = arith.addf %8, %10 : vector<64x16xf32>
    %12 = arith.truncf %11 : vector<64x16xf32> to vector<64x16xbf16>
    %c0_9 = arith.constant 0 : index
    %c0_10 = arith.constant 0 : index
    %13 = vector.load %arg6[%c0_9, %c0_10] : memref<64x16xbf16, #tpu.memory_space<vmem>>, vector<64x16xbf16>
    tpu.vector_store %arg6[%c0_9, %c0_10], %12 {strides = array<i32>} : memref<64x16xbf16, #tpu.memory_space<vmem>>, vector<64x16xbf16>,
    return
  }
  func.func @transform_0(%arg0: i32) -> (i32, i32) {
    %c0_i32 = arith.constant 0 : i32
    %c0_i32_0 = arith.constant 0 : i32
    return %arg0, %c0_i32 : i32, i32
  }
  func.func @transform_1(%arg0: i32) -> (i32, i32) {
    %c0_i32 = arith.constant 0 : i32
    %c0_i32_0 = arith.constant 0 : i32
    %c0_i32_1 = arith.constant 0 : i32
    return %c0_i32, %c0_i32_0 : i32, i32
  }
  func.func @transform_2(%arg0: i32) -> (i32, i32) {
    %c0_i32 = arith.constant 0 : i32
    %c0_i32_0 = arith.constant 0 : i32
    %c0_i32_1 = arith.constant 0 : i32
    return %c0_i32, %c0_i32_0 : i32, i32
  }
  func.func @transform_3(%arg0: i32) -> (i32, i32) {
    %c0_i32 = arith.constant 0 : i32
    %c0_i32_0 = arith.constant 0 : i32
    %c0_i32_1 = arith.constant 0 : i32
    return %c0_i32, %c0_i32_0 : i32, i32
  }
  func.func @transform_4(%arg0: i32) -> (i32, i32) {
    %c0_i32 = arith.constant 0 : i32
    %c0_i32_0 = arith.constant 0 : i32
    return %arg0, %c0_i32 : i32, i32
  }
  func.func @transform_5(%arg0: i32) -> (i32, i32) {
    %c0_i32 = arith.constant 0 : i32
    %c0_i32_0 = arith.constant 0 : i32
    return %arg0, %c0_i32 : i32, i32
  }
}

module attributes {stable_mosaic.version = 11 : i64} {
  func.func @kernel(%arg0: i32, %arg1: memref<16x64xbf16, #tpu.memory_space<vmem>>, %arg2: memref<1x64xf32, #tpu.memory_space<vmem>>, %arg3: memref<1x64xf32, #tpu.memory_space<vmem>>, %arg4: memref<64x24xbf16, #tpu.memory_space<vmem>>, %arg5: memref<1x24xf32, #tpu.memory_space<vmem>>, %arg6: memref<1x24xf32, #tpu.memory_space<vmem>>, %arg7: memref<16x24xbf16, #tpu.memory_space<vmem>>) attributes {dimension_semantics = [#tpu.dimension_semantics<parallel>], iteration_bounds = array<i64: 2>, scalar_prefetch = 0 : i64, scratch_operands = 0 : i64, tpu.core_type = #tpu.core_type<tc>, window_params = [{transform_indices = @transform_0, window_bounds = array<i64: 16, 64>}, {pipeline_mode = #tpu.pipeline_mode<synchronous>, transform_indices = @transform_1, window_bounds = array<i64: 1, 64>}, {pipeline_mode = #tpu.pipeline_mode<synchronous>, transform_indices = @transform_2, window_bounds = array<i64: 1, 64>}, {pipeline_mode = #tpu.pipeline_mode<synchronous>, transform_indices = @transform_3, window_bounds = array<i64: 64, 24>}, {pipeline_mode = #tpu.pipeline_mode<synchronous>, transform_indices = @transform_4, window_bounds = array<i64: 1, 24>}, {pipeline_mode = #tpu.pipeline_mode<synchronous>, transform_indices = @transform_5, window_bounds = array<i64: 1, 24>}, {transform_indices = @transform_6, window_bounds = array<i64: 16, 24>}]} {
    %c0 = arith.constant 0 : index
    %c0_0 = arith.constant 0 : index
    %0 = vector.load %arg1[%c0, %c0_0] : memref<16x64xbf16, #tpu.memory_space<vmem>>, vector<16x64xbf16>
    %1 = arith.extf %0 : vector<16x64xbf16> to vector<16x64xf32>
    %c0_1 = arith.constant 0 : index
    %c0_2 = arith.constant 0 : index
    %2 = vector.load %arg2[%c0_1, %c0_2] : memref<1x64xf32, #tpu.memory_space<vmem>>, vector<1x64xf32>
    %3 = vector.broadcast %2 : vector<1x64xf32> to vector<16x64xf32>
    %4 = arith.mulf %1, %3 : vector<16x64xf32>
    %c0_3 = arith.constant 0 : index
    %c0_4 = arith.constant 0 : index
    %5 = vector.load %arg3[%c0_3, %c0_4] : memref<1x64xf32, #tpu.memory_space<vmem>>, vector<1x64xf32>
    %6 = vector.broadcast %5 : vector<1x64xf32> to vector<16x64xf32>
    %7 = arith.addf %4, %6 : vector<16x64xf32>
    %cst = arith.constant 0.000000e+00 : f32
    %8 = vector.broadcast %cst : f32 to vector<16x64xf32>
    %9 = arith.maximumf %7, %8 : vector<16x64xf32>
    %10 = arith.truncf %9 : vector<16x64xf32> to vector<16x64xbf16>
    %c0_5 = arith.constant 0 : index
    %c0_6 = arith.constant 0 : index
    %11 = vector.load %arg4[%c0_5, %c0_6] : memref<64x24xbf16, #tpu.memory_space<vmem>>, vector<64x24xbf16>
    %cst_7 = arith.constant dense<0.000000e+00> : vector<16x24xf32>
    %12 = tpu.matmul %10, %11, %cst_7 {dimension_numbers = #tpu.dot_dimension_numbers<[1], [0], [0], [1], [0, 0, 1, 1], [], []>} : vector<16x64xbf16>, vector<64x24xbf16>, vector<16x24xf32> -> vector<16x24xf32>
    %c0_8 = arith.constant 0 : index
    %c0_9 = arith.constant 0 : index
    %13 = vector.load %arg5[%c0_8, %c0_9] : memref<1x24xf32, #tpu.memory_space<vmem>>, vector<1x24xf32>
    %14 = vector.broadcast %13 : vector<1x24xf32> to vector<16x24xf32>
    %15 = arith.mulf %12, %14 : vector<16x24xf32>
    %c0_10 = arith.constant 0 : index
    %c0_11 = arith.constant 0 : index
    %16 = vector.load %arg6[%c0_10, %c0_11] : memref<1x24xf32, #tpu.memory_space<vmem>>, vector<1x24xf32>
    %17 = vector.broadcast %16 : vector<1x24xf32> to vector<16x24xf32>
    %18 = arith.addf %15, %17 : vector<16x24xf32>
    %19 = arith.truncf %18 : vector<16x24xf32> to vector<16x24xbf16>
    %c0_12 = arith.constant 0 : index
    %c0_13 = arith.constant 0 : index
    %20 = vector.load %arg7[%c0_12, %c0_13] : memref<16x24xbf16, #tpu.memory_space<vmem>>, vector<16x24xbf16>
    tpu.vector_store %arg7[%c0_12, %c0_13], %19 {strides = array<i32>} : memref<16x24xbf16, #tpu.memory_space<vmem>>, vector<16x24xbf16>,
    return
  }
  func.func @transform_0(%arg0: i32) -> (i32, i32) {
    %c0_i32 = arith.constant 0 : i32
    %c0_i32_0 = arith.constant 0 : i32
    return %arg0, %c0_i32 : i32, i32
  }
  func.func @transform_1(%arg0: i32) -> (i32, i32) {
    %c0_i32 = arith.constant 0 : i32
    %c0_i32_0 = arith.constant 0 : i32
    %c0_i32_1 = arith.constant 0 : i32
    return %c0_i32, %c0_i32_0 : i32, i32
  }
  func.func @transform_2(%arg0: i32) -> (i32, i32) {
    %c0_i32 = arith.constant 0 : i32
    %c0_i32_0 = arith.constant 0 : i32
    %c0_i32_1 = arith.constant 0 : i32
    return %c0_i32, %c0_i32_0 : i32, i32
  }
  func.func @transform_3(%arg0: i32) -> (i32, i32) {
    %c0_i32 = arith.constant 0 : i32
    %c0_i32_0 = arith.constant 0 : i32
    %c0_i32_1 = arith.constant 0 : i32
    return %c0_i32, %c0_i32_0 : i32, i32
  }
  func.func @transform_4(%arg0: i32) -> (i32, i32) {
    %c0_i32 = arith.constant 0 : i32
    %c0_i32_0 = arith.constant 0 : i32
    %c0_i32_1 = arith.constant 0 : i32
    return %c0_i32, %c0_i32_0 : i32, i32
  }
  func.func @transform_5(%arg0: i32) -> (i32, i32) {
    %c0_i32 = arith.constant 0 : i32
    %c0_i32_0 = arith.constant 0 : i32
    %c0_i32_1 = arith.constant 0 : i32
    return %c0_i32, %c0_i32_0 : i32, i32
  }
  func.func @transform_6(%arg0: i32) -> (i32, i32) {
    %c0_i32 = arith.constant 0 : i32
    %c0_i32_0 = arith.constant 0 : i32
    return %arg0, %c0_i32 : i32, i32
  }
}

module attributes {stable_mosaic.version = 11 : i64} {
  func.func @kernel(%arg0: i32, %arg1: memref<16x24xbf16, #tpu.memory_space<vmem>>, %arg2: memref<1x24xf32, #tpu.memory_space<vmem>>, %arg3: memref<1x24xf32, #tpu.memory_space<vmem>>, %arg4: memref<24x24xbf16, #tpu.memory_space<vmem>>, %arg5: memref<1x24xf32, #tpu.memory_space<vmem>>, %arg6: memref<1x24xf32, #tpu.memory_space<vmem>>, %arg7: memref<16x24xbf16, #tpu.memory_space<vmem>>) attributes {dimension_semantics = [#tpu.dimension_semantics<parallel>], iteration_bounds = array<i64: 2>, scalar_prefetch = 0 : i64, scratch_operands = 0 : i64, tpu.core_type = #tpu.core_type<tc>, window_params = [{transform_indices = @transform_0, window_bounds = array<i64: 16, 24>}, {pipeline_mode = #tpu.pipeline_mode<synchronous>, transform_indices = @transform_1, window_bounds = array<i64: 1, 24>}, {pipeline_mode = #tpu.pipeline_mode<synchronous>, transform_indices = @transform_2, window_bounds = array<i64: 1, 24>}, {pipeline_mode = #tpu.pipeline_mode<synchronous>, transform_indices = @transform_3, window_bounds = array<i64: 24, 24>}, {pipeline_mode = #tpu.pipeline_mode<synchronous>, transform_indices = @transform_4, window_bounds = array<i64: 1, 24>}, {pipeline_mode = #tpu.pipeline_mode<synchronous>, transform_indices = @transform_5, window_bounds = array<i64: 1, 24>}, {transform_indices = @transform_6, window_bounds = array<i64: 16, 24>}]} {
    %c0 = arith.constant 0 : index
    %c0_0 = arith.constant 0 : index
    %0 = vector.load %arg1[%c0, %c0_0] : memref<16x24xbf16, #tpu.memory_space<vmem>>, vector<16x24xbf16>
    %1 = arith.extf %0 : vector<16x24xbf16> to vector<16x24xf32>
    %c0_1 = arith.constant 0 : index
    %c0_2 = arith.constant 0 : index
    %2 = vector.load %arg2[%c0_1, %c0_2] : memref<1x24xf32, #tpu.memory_space<vmem>>, vector<1x24xf32>
    %3 = vector.broadcast %2 : vector<1x24xf32> to vector<16x24xf32>
    %4 = arith.mulf %1, %3 : vector<16x24xf32>
    %c0_3 = arith.constant 0 : index
    %c0_4 = arith.constant 0 : index
    %5 = vector.load %arg3[%c0_3, %c0_4] : memref<1x24xf32, #tpu.memory_space<vmem>>, vector<1x24xf32>
    %6 = vector.broadcast %5 : vector<1x24xf32> to vector<16x24xf32>
    %7 = arith.addf %4, %6 : vector<16x24xf32>
    %cst = arith.constant 0.000000e+00 : f32
    %8 = vector.broadcast %cst : f32 to vector<16x24xf32>
    %9 = arith.maximumf %7, %8 : vector<16x24xf32>
    %10 = arith.truncf %9 : vector<16x24xf32> to vector<16x24xbf16>
    %c0_5 = arith.constant 0 : index
    %c0_6 = arith.constant 0 : index
    %11 = vector.load %arg4[%c0_5, %c0_6] : memref<24x24xbf16, #tpu.memory_space<vmem>>, vector<24x24xbf16>
    %cst_7 = arith.constant dense<0.000000e+00> : vector<16x24xf32>
    %12 = tpu.matmul %10, %11, %cst_7 {dimension_numbers = #tpu.dot_dimension_numbers<[1], [0], [0], [1], [0, 0, 1, 1], [], []>} : vector<16x24xbf16>, vector<24x24xbf16>, vector<16x24xf32> -> vector<16x24xf32>
    %c0_8 = arith.constant 0 : index
    %c0_9 = arith.constant 0 : index
    %13 = vector.load %arg5[%c0_8, %c0_9] : memref<1x24xf32, #tpu.memory_space<vmem>>, vector<1x24xf32>
    %14 = vector.broadcast %13 : vector<1x24xf32> to vector<16x24xf32>
    %15 = arith.mulf %12, %14 : vector<16x24xf32>
    %c0_10 = arith.constant 0 : index
    %c0_11 = arith.constant 0 : index
    %16 = vector.load %arg6[%c0_10, %c0_11] : memref<1x24xf32, #tpu.memory_space<vmem>>, vector<1x24xf32>
    %17 = vector.broadcast %16 : vector<1x24xf32> to vector<16x24xf32>
    %18 = arith.addf %15, %17 : vector<16x24xf32>
    %cst_12 = arith.constant 0.000000e+00 : f32
    %19 = vector.broadcast %cst_12 : f32 to vector<16x24xf32>
    %20 = arith.maximumf %18, %19 : vector<16x24xf32>
    %21 = arith.truncf %20 : vector<16x24xf32> to vector<16x24xbf16>
    %c0_13 = arith.constant 0 : index
    %c0_14 = arith.constant 0 : index
    %22 = vector.load %arg7[%c0_13, %c0_14] : memref<16x24xbf16, #tpu.memory_space<vmem>>, vector<16x24xbf16>
    tpu.vector_store %arg7[%c0_13, %c0_14], %21 {strides = array<i32>} : memref<16x24xbf16, #tpu.memory_space<vmem>>, vector<16x24xbf16>,
    return
  }
  func.func @transform_0(%arg0: i32) -> (i32, i32) {
    %c0_i32 = arith.constant 0 : i32
    %c0_i32_0 = arith.constant 0 : i32
    return %arg0, %c0_i32 : i32, i32
  }
  func.func @transform_1(%arg0: i32) -> (i32, i32) {
    %c0_i32 = arith.constant 0 : i32
    %c0_i32_0 = arith.constant 0 : i32
    %c0_i32_1 = arith.constant 0 : i32
    return %c0_i32, %c0_i32_0 : i32, i32
  }
  func.func @transform_2(%arg0: i32) -> (i32, i32) {
    %c0_i32 = arith.constant 0 : i32
    %c0_i32_0 = arith.constant 0 : i32
    %c0_i32_1 = arith.constant 0 : i32
    return %c0_i32, %c0_i32_0 : i32, i32
  }
  func.func @transform_3(%arg0: i32) -> (i32, i32) {
    %c0_i32 = arith.constant 0 : i32
    %c0_i32_0 = arith.constant 0 : i32
    %c0_i32_1 = arith.constant 0 : i32
    return %c0_i32, %c0_i32_0 : i32, i32
  }
  func.func @transform_4(%arg0: i32) -> (i32, i32) {
    %c0_i32 = arith.constant 0 : i32
    %c0_i32_0 = arith.constant 0 : i32
    %c0_i32_1 = arith.constant 0 : i32
    return %c0_i32, %c0_i32_0 : i32, i32
  }
  func.func @transform_5(%arg0: i32) -> (i32, i32) {
    %c0_i32 = arith.constant 0 : i32
    %c0_i32_0 = arith.constant 0 : i32
    %c0_i32_1 = arith.constant 0 : i32
    return %c0_i32, %c0_i32_0 : i32, i32
  }
  func.func @transform_6(%arg0: i32) -> (i32, i32) {
    %c0_i32 = arith.constant 0 : i32
    %c0_i32_0 = arith.constant 0 : i32
    return %arg0, %c0_i32 : i32, i32
  }
}

module attributes {stable_mosaic.version = 11 : i64} {
  func.func @kernel(%arg0: i32, %arg1: memref<16x216xbf16, #tpu.memory_space<vmem>>, %arg2: memref<216x24xbf16, #tpu.memory_space<vmem>>, %arg3: memref<1x24xf32, #tpu.memory_space<vmem>>, %arg4: memref<1x24xf32, #tpu.memory_space<vmem>>, %arg5: memref<16x24xbf16, #tpu.memory_space<vmem>>, %arg6: memref<16x24xbf16, #tpu.memory_space<vmem>>) attributes {dimension_semantics = [#tpu.dimension_semantics<parallel>], iteration_bounds = array<i64: 2>, scalar_prefetch = 0 : i64, scratch_operands = 0 : i64, tpu.core_type = #tpu.core_type<tc>, window_params = [{transform_indices = @transform_0, window_bounds = array<i64: 16, 216>}, {pipeline_mode = #tpu.pipeline_mode<synchronous>, transform_indices = @transform_1, window_bounds = array<i64: 216, 24>}, {pipeline_mode = #tpu.pipeline_mode<synchronous>, transform_indices = @transform_2, window_bounds = array<i64: 1, 24>}, {pipeline_mode = #tpu.pipeline_mode<synchronous>, transform_indices = @transform_3, window_bounds = array<i64: 1, 24>}, {transform_indices = @transform_4, window_bounds = array<i64: 16, 24>}, {transform_indices = @transform_5, window_bounds = array<i64: 16, 24>}]} {
    %c0 = arith.constant 0 : index
    %c0_0 = arith.constant 0 : index
    %0 = vector.load %arg1[%c0, %c0_0] : memref<16x216xbf16, #tpu.memory_space<vmem>>, vector<16x216xbf16>
    %c0_1 = arith.constant 0 : index
    %c0_2 = arith.constant 0 : index
    %1 = vector.load %arg2[%c0_1, %c0_2] : memref<216x24xbf16, #tpu.memory_space<vmem>>, vector<216x24xbf16>
    %cst = arith.constant dense<0.000000e+00> : vector<16x24xf32>
    %2 = tpu.matmul %0, %1, %cst {dimension_numbers = #tpu.dot_dimension_numbers<[1], [0], [0], [1], [0, 0, 1, 1], [], []>} : vector<16x216xbf16>, vector<216x24xbf16>, vector<16x24xf32> -> vector<16x24xf32>
    %c0_3 = arith.constant 0 : index
    %c0_4 = arith.constant 0 : index
    %3 = vector.load %arg3[%c0_3, %c0_4] : memref<1x24xf32, #tpu.memory_space<vmem>>, vector<1x24xf32>
    %4 = vector.broadcast %3 : vector<1x24xf32> to vector<16x24xf32>
    %5 = arith.mulf %2, %4 : vector<16x24xf32>
    %c0_5 = arith.constant 0 : index
    %c0_6 = arith.constant 0 : index
    %6 = vector.load %arg4[%c0_5, %c0_6] : memref<1x24xf32, #tpu.memory_space<vmem>>, vector<1x24xf32>
    %7 = vector.broadcast %6 : vector<1x24xf32> to vector<16x24xf32>
    %8 = arith.addf %5, %7 : vector<16x24xf32>
    %c0_7 = arith.constant 0 : index
    %c0_8 = arith.constant 0 : index
    %9 = vector.load %arg5[%c0_7, %c0_8] : memref<16x24xbf16, #tpu.memory_space<vmem>>, vector<16x24xbf16>
    %10 = arith.extf %9 : vector<16x24xbf16> to vector<16x24xf32>
    %11 = arith.addf %8, %10 : vector<16x24xf32>
    %12 = arith.truncf %11 : vector<16x24xf32> to vector<16x24xbf16>
    %c0_9 = arith.constant 0 : index
    %c0_10 = arith.constant 0 : index
    %13 = vector.load %arg6[%c0_9, %c0_10] : memref<16x24xbf16, #tpu.memory_space<vmem>>, vector<16x24xbf16>
    tpu.vector_store %arg6[%c0_9, %c0_10], %12 {strides = array<i32>} : memref<16x24xbf16, #tpu.memory_space<vmem>>, vector<16x24xbf16>,
    return
  }
  func.func @transform_0(%arg0: i32) -> (i32, i32) {
    %c0_i32 = arith.constant 0 : i32
    %c0_i32_0 = arith.constant 0 : i32
    return %arg0, %c0_i32 : i32, i32
  }
  func.func @transform_1(%arg0: i32) -> (i32, i32) {
    %c0_i32 = arith.constant 0 : i32
    %c0_i32_0 = arith.constant 0 : i32
    %c0_i32_1 = arith.constant 0 : i32
    return %c0_i32, %c0_i32_0 : i32, i32
  }
  func.func @transform_2(%arg0: i32) -> (i32, i32) {
    %c0_i32 = arith.constant 0 : i32
    %c0_i32_0 = arith.constant 0 : i32
    %c0_i32_1 = arith.constant 0 : i32
    return %c0_i32, %c0_i32_0 : i32, i32
  }
  func.func @transform_3(%arg0: i32) -> (i32, i32) {
    %c0_i32 = arith.constant 0 : i32
    %c0_i32_0 = arith.constant 0 : i32
    %c0_i32_1 = arith.constant 0 : i32
    return %c0_i32, %c0_i32_0 : i32, i32
  }
  func.func @transform_4(%arg0: i32) -> (i32, i32) {
    %c0_i32 = arith.constant 0 : i32
    %c0_i32_0 = arith.constant 0 : i32
    return %arg0, %c0_i32 : i32, i32
  }
  func.func @transform_5(%arg0: i32) -> (i32, i32) {
    %c0_i32 = arith.constant 0 : i32
    %c0_i32_0 = arith.constant 0 : i32
    return %arg0, %c0_i32 : i32, i32
  }
}

module attributes {stable_mosaic.version = 11 : i64} {
  func.func @kernel(%arg0: i32, %arg1: memref<16x24xbf16, #tpu.memory_space<vmem>>, %arg2: memref<1x24xf32, #tpu.memory_space<vmem>>, %arg3: memref<1x24xf32, #tpu.memory_space<vmem>>, %arg4: memref<24x64xbf16, #tpu.memory_space<vmem>>, %arg5: memref<1x64xf32, #tpu.memory_space<vmem>>, %arg6: memref<1x64xf32, #tpu.memory_space<vmem>>, %arg7: memref<16x64xbf16, #tpu.memory_space<vmem>>) attributes {dimension_semantics = [#tpu.dimension_semantics<parallel>], iteration_bounds = array<i64: 2>, scalar_prefetch = 0 : i64, scratch_operands = 0 : i64, tpu.core_type = #tpu.core_type<tc>, window_params = [{transform_indices = @transform_0, window_bounds = array<i64: 16, 24>}, {pipeline_mode = #tpu.pipeline_mode<synchronous>, transform_indices = @transform_1, window_bounds = array<i64: 1, 24>}, {pipeline_mode = #tpu.pipeline_mode<synchronous>, transform_indices = @transform_2, window_bounds = array<i64: 1, 24>}, {pipeline_mode = #tpu.pipeline_mode<synchronous>, transform_indices = @transform_3, window_bounds = array<i64: 24, 64>}, {pipeline_mode = #tpu.pipeline_mode<synchronous>, transform_indices = @transform_4, window_bounds = array<i64: 1, 64>}, {pipeline_mode = #tpu.pipeline_mode<synchronous>, transform_indices = @transform_5, window_bounds = array<i64: 1, 64>}, {transform_indices = @transform_6, window_bounds = array<i64: 16, 64>}]} {
    %c0 = arith.constant 0 : index
    %c0_0 = arith.constant 0 : index
    %0 = vector.load %arg1[%c0, %c0_0] : memref<16x24xbf16, #tpu.memory_space<vmem>>, vector<16x24xbf16>
    %1 = arith.extf %0 : vector<16x24xbf16> to vector<16x24xf32>
    %c0_1 = arith.constant 0 : index
    %c0_2 = arith.constant 0 : index
    %2 = vector.load %arg2[%c0_1, %c0_2] : memref<1x24xf32, #tpu.memory_space<vmem>>, vector<1x24xf32>
    %3 = vector.broadcast %2 : vector<1x24xf32> to vector<16x24xf32>
    %4 = arith.mulf %1, %3 : vector<16x24xf32>
    %c0_3 = arith.constant 0 : index
    %c0_4 = arith.constant 0 : index
    %5 = vector.load %arg3[%c0_3, %c0_4] : memref<1x24xf32, #tpu.memory_space<vmem>>, vector<1x24xf32>
    %6 = vector.broadcast %5 : vector<1x24xf32> to vector<16x24xf32>
    %7 = arith.addf %4, %6 : vector<16x24xf32>
    %cst = arith.constant 0.000000e+00 : f32
    %8 = vector.broadcast %cst : f32 to vector<16x24xf32>
    %9 = arith.maximumf %7, %8 : vector<16x24xf32>
    %10 = arith.truncf %9 : vector<16x24xf32> to vector<16x24xbf16>
    %c0_5 = arith.constant 0 : index
    %c0_6 = arith.constant 0 : index
    %11 = vector.load %arg4[%c0_5, %c0_6] : memref<24x64xbf16, #tpu.memory_space<vmem>>, vector<24x64xbf16>
    %cst_7 = arith.constant dense<0.000000e+00> : vector<16x64xf32>
    %12 = tpu.matmul %10, %11, %cst_7 {dimension_numbers = #tpu.dot_dimension_numbers<[1], [0], [0], [1], [0, 0, 1, 1], [], []>} : vector<16x24xbf16>, vector<24x64xbf16>, vector<16x64xf32> -> vector<16x64xf32>
    %c0_8 = arith.constant 0 : index
    %c0_9 = arith.constant 0 : index
    %13 = vector.load %arg5[%c0_8, %c0_9] : memref<1x64xf32, #tpu.memory_space<vmem>>, vector<1x64xf32>
    %14 = vector.broadcast %13 : vector<1x64xf32> to vector<16x64xf32>
    %15 = arith.mulf %12, %14 : vector<16x64xf32>
    %c0_10 = arith.constant 0 : index
    %c0_11 = arith.constant 0 : index
    %16 = vector.load %arg6[%c0_10, %c0_11] : memref<1x64xf32, #tpu.memory_space<vmem>>, vector<1x64xf32>
    %17 = vector.broadcast %16 : vector<1x64xf32> to vector<16x64xf32>
    %18 = arith.addf %15, %17 : vector<16x64xf32>
    %19 = arith.truncf %18 : vector<16x64xf32> to vector<16x64xbf16>
    %c0_12 = arith.constant 0 : index
    %c0_13 = arith.constant 0 : index
    %20 = vector.load %arg7[%c0_12, %c0_13] : memref<16x64xbf16, #tpu.memory_space<vmem>>, vector<16x64xbf16>
    tpu.vector_store %arg7[%c0_12, %c0_13], %19 {strides = array<i32>} : memref<16x64xbf16, #tpu.memory_space<vmem>>, vector<16x64xbf16>,
    return
  }
  func.func @transform_0(%arg0: i32) -> (i32, i32) {
    %c0_i32 = arith.constant 0 : i32
    %c0_i32_0 = arith.constant 0 : i32
    return %arg0, %c0_i32 : i32, i32
  }
  func.func @transform_1(%arg0: i32) -> (i32, i32) {
    %c0_i32 = arith.constant 0 : i32
    %c0_i32_0 = arith.constant 0 : i32
    %c0_i32_1 = arith.constant 0 : i32
    return %c0_i32, %c0_i32_0 : i32, i32
  }
  func.func @transform_2(%arg0: i32) -> (i32, i32) {
    %c0_i32 = arith.constant 0 : i32
    %c0_i32_0 = arith.constant 0 : i32
    %c0_i32_1 = arith.constant 0 : i32
    return %c0_i32, %c0_i32_0 : i32, i32
  }
  func.func @transform_3(%arg0: i32) -> (i32, i32) {
    %c0_i32 = arith.constant 0 : i32
    %c0_i32_0 = arith.constant 0 : i32
    %c0_i32_1 = arith.constant 0 : i32
    return %c0_i32, %c0_i32_0 : i32, i32
  }
  func.func @transform_4(%arg0: i32) -> (i32, i32) {
    %c0_i32 = arith.constant 0 : i32
    %c0_i32_0 = arith.constant 0 : i32
    %c0_i32_1 = arith.constant 0 : i32
    return %c0_i32, %c0_i32_0 : i32, i32
  }
  func.func @transform_5(%arg0: i32) -> (i32, i32) {
    %c0_i32 = arith.constant 0 : i32
    %c0_i32_0 = arith.constant 0 : i32
    %c0_i32_1 = arith.constant 0 : i32
    return %c0_i32, %c0_i32_0 : i32, i32
  }
  func.func @transform_6(%arg0: i32) -> (i32, i32) {
    %c0_i32 = arith.constant 0 : i32
    %c0_i32_0 = arith.constant 0 : i32
    return %arg0, %c0_i32 : i32, i32
  }
}

module attributes {stable_mosaic.version = 11 : i64} {
  func.func @kernel(%arg0: i32, %arg1: memref<64x32xbf16, #tpu.memory_space<vmem>>, %arg2: memref<1x32xf32, #tpu.memory_space<vmem>>, %arg3: memref<1x32xf32, #tpu.memory_space<vmem>>, %arg4: memref<32x16xbf16, #tpu.memory_space<vmem>>, %arg5: memref<1x16xf32, #tpu.memory_space<vmem>>, %arg6: memref<1x16xf32, #tpu.memory_space<vmem>>, %arg7: memref<64x16xbf16, #tpu.memory_space<vmem>>) attributes {dimension_semantics = [#tpu.dimension_semantics<parallel>], iteration_bounds = array<i64: 2>, scalar_prefetch = 0 : i64, scratch_operands = 0 : i64, tpu.core_type = #tpu.core_type<tc>, window_params = [{transform_indices = @transform_0, window_bounds = array<i64: 64, 32>}, {pipeline_mode = #tpu.pipeline_mode<synchronous>, transform_indices = @transform_1, window_bounds = array<i64: 1, 32>}, {pipeline_mode = #tpu.pipeline_mode<synchronous>, transform_indices = @transform_2, window_bounds = array<i64: 1, 32>}, {pipeline_mode = #tpu.pipeline_mode<synchronous>, transform_indices = @transform_3, window_bounds = array<i64: 32, 16>}, {pipeline_mode = #tpu.pipeline_mode<synchronous>, transform_indices = @transform_4, window_bounds = array<i64: 1, 16>}, {pipeline_mode = #tpu.pipeline_mode<synchronous>, transform_indices = @transform_5, window_bounds = array<i64: 1, 16>}, {transform_indices = @transform_6, window_bounds = array<i64: 64, 16>}]} {
    %c0 = arith.constant 0 : index
    %c0_0 = arith.constant 0 : index
    %0 = vector.load %arg1[%c0, %c0_0] : memref<64x32xbf16, #tpu.memory_space<vmem>>, vector<64x32xbf16>
    %1 = arith.extf %0 : vector<64x32xbf16> to vector<64x32xf32>
    %c0_1 = arith.constant 0 : index
    %c0_2 = arith.constant 0 : index
    %2 = vector.load %arg2[%c0_1, %c0_2] : memref<1x32xf32, #tpu.memory_space<vmem>>, vector<1x32xf32>
    %3 = vector.broadcast %2 : vector<1x32xf32> to vector<64x32xf32>
    %4 = arith.mulf %1, %3 : vector<64x32xf32>
    %c0_3 = arith.constant 0 : index
    %c0_4 = arith.constant 0 : index
    %5 = vector.load %arg3[%c0_3, %c0_4] : memref<1x32xf32, #tpu.memory_space<vmem>>, vector<1x32xf32>
    %6 = vector.broadcast %5 : vector<1x32xf32> to vector<64x32xf32>
    %7 = arith.addf %4, %6 : vector<64x32xf32>
    %cst = arith.constant 0.000000e+00 : f32
    %8 = vector.broadcast %cst : f32 to vector<64x32xf32>
    %9 = arith.maximumf %7, %8 : vector<64x32xf32>
    %10 = arith.truncf %9 : vector<64x32xf32> to vector<64x32xbf16>
    %c0_5 = arith.constant 0 : index
    %c0_6 = arith.constant 0 : index
    %11 = vector.load %arg4[%c0_5, %c0_6] : memref<32x16xbf16, #tpu.memory_space<vmem>>, vector<32x16xbf16>
    %cst_7 = arith.constant dense<0.000000e+00> : vector<64x16xf32>
    %12 = tpu.matmul %10, %11, %cst_7 {dimension_numbers = #tpu.dot_dimension_numbers<[1], [0], [0], [1], [0, 0, 1, 1], [], []>} : vector<64x32xbf16>, vector<32x16xbf16>, vector<64x16xf32> -> vector<64x16xf32>
    %c0_8 = arith.constant 0 : index
    %c0_9 = arith.constant 0 : index
    %13 = vector.load %arg5[%c0_8, %c0_9] : memref<1x16xf32, #tpu.memory_space<vmem>>, vector<1x16xf32>
    %14 = vector.broadcast %13 : vector<1x16xf32> to vector<64x16xf32>
    %15 = arith.mulf %12, %14 : vector<64x16xf32>
    %c0_10 = arith.constant 0 : index
    %c0_11 = arith.constant 0 : index
    %16 = vector.load %arg6[%c0_10, %c0_11] : memref<1x16xf32, #tpu.memory_space<vmem>>, vector<1x16xf32>
    %17 = vector.broadcast %16 : vector<1x16xf32> to vector<64x16xf32>
    %18 = arith.addf %15, %17 : vector<64x16xf32>
    %cst_12 = arith.constant 0.000000e+00 : f32
    %19 = vector.broadcast %cst_12 : f32 to vector<64x16xf32>
    %20 = arith.maximumf %18, %19 : vector<64x16xf32>
    %21 = arith.truncf %20 : vector<64x16xf32> to vector<64x16xbf16>
    %c0_13 = arith.constant 0 : index
    %c0_14 = arith.constant 0 : index
    %22 = vector.load %arg7[%c0_13, %c0_14] : memref<64x16xbf16, #tpu.memory_space<vmem>>, vector<64x16xbf16>
    tpu.vector_store %arg7[%c0_13, %c0_14], %21 {strides = array<i32>} : memref<64x16xbf16, #tpu.memory_space<vmem>>, vector<64x16xbf16>,
    return
  }
  func.func @transform_0(%arg0: i32) -> (i32, i32) {
    %c0_i32 = arith.constant 0 : i32
    %c0_i32_0 = arith.constant 0 : i32
    return %arg0, %c0_i32 : i32, i32
  }
  func.func @transform_1(%arg0: i32) -> (i32, i32) {
    %c0_i32 = arith.constant 0 : i32
    %c0_i32_0 = arith.constant 0 : i32
    %c0_i32_1 = arith.constant 0 : i32
    return %c0_i32, %c0_i32_0 : i32, i32
  }
  func.func @transform_2(%arg0: i32) -> (i32, i32) {
    %c0_i32 = arith.constant 0 : i32
    %c0_i32_0 = arith.constant 0 : i32
    %c0_i32_1 = arith.constant 0 : i32
    return %c0_i32, %c0_i32_0 : i32, i32
  }
  func.func @transform_3(%arg0: i32) -> (i32, i32) {
    %c0_i32 = arith.constant 0 : i32
    %c0_i32_0 = arith.constant 0 : i32
    %c0_i32_1 = arith.constant 0 : i32
    return %c0_i32, %c0_i32_0 : i32, i32
  }
  func.func @transform_4(%arg0: i32) -> (i32, i32) {
    %c0_i32 = arith.constant 0 : i32
    %c0_i32_0 = arith.constant 0 : i32
    %c0_i32_1 = arith.constant 0 : i32
    return %c0_i32, %c0_i32_0 : i32, i32
  }
  func.func @transform_5(%arg0: i32) -> (i32, i32) {
    %c0_i32 = arith.constant 0 : i32
    %c0_i32_0 = arith.constant 0 : i32
    %c0_i32_1 = arith.constant 0 : i32
    return %c0_i32, %c0_i32_0 : i32, i32
  }
  func.func @transform_6(%arg0: i32) -> (i32, i32) {
    %c0_i32 = arith.constant 0 : i32
    %c0_i32_0 = arith.constant 0 : i32
    return %arg0, %c0_i32 : i32, i32
  }
}

module attributes {stable_mosaic.version = 11 : i64} {
  func.func @kernel(%arg0: i32, %arg1: memref<64x176xbf16, #tpu.memory_space<vmem>>, %arg2: memref<176x16xbf16, #tpu.memory_space<vmem>>, %arg3: memref<1x16xf32, #tpu.memory_space<vmem>>, %arg4: memref<1x16xf32, #tpu.memory_space<vmem>>, %arg5: memref<64x16xbf16, #tpu.memory_space<vmem>>) attributes {dimension_semantics = [#tpu.dimension_semantics<parallel>], iteration_bounds = array<i64: 2>, scalar_prefetch = 0 : i64, scratch_operands = 0 : i64, tpu.core_type = #tpu.core_type<tc>, window_params = [{transform_indices = @transform_0, window_bounds = array<i64: 64, 176>}, {pipeline_mode = #tpu.pipeline_mode<synchronous>, transform_indices = @transform_1, window_bounds = array<i64: 176, 16>}, {pipeline_mode = #tpu.pipeline_mode<synchronous>, transform_indices = @transform_2, window_bounds = array<i64: 1, 16>}, {pipeline_mode = #tpu.pipeline_mode<synchronous>, transform_indices = @transform_3, window_bounds = array<i64: 1, 16>}, {transform_indices = @transform_4, window_bounds = array<i64: 64, 16>}]} {
    %c0 = arith.constant 0 : index
    %c0_0 = arith.constant 0 : index
    %0 = vector.load %arg1[%c0, %c0_0] : memref<64x176xbf16, #tpu.memory_space<vmem>>, vector<64x176xbf16>
    %c0_1 = arith.constant 0 : index
    %c0_2 = arith.constant 0 : index
    %1 = vector.load %arg2[%c0_1, %c0_2] : memref<176x16xbf16, #tpu.memory_space<vmem>>, vector<176x16xbf16>
    %cst = arith.constant dense<0.000000e+00> : vector<64x16xf32>
    %2 = tpu.matmul %0, %1, %cst {dimension_numbers = #tpu.dot_dimension_numbers<[1], [0], [0], [1], [0, 0, 1, 1], [], []>} : vector<64x176xbf16>, vector<176x16xbf16>, vector<64x16xf32> -> vector<64x16xf32>
    %c0_3 = arith.constant 0 : index
    %c0_4 = arith.constant 0 : index
    %3 = vector.load %arg3[%c0_3, %c0_4] : memref<1x16xf32, #tpu.memory_space<vmem>>, vector<1x16xf32>
    %4 = vector.broadcast %3 : vector<1x16xf32> to vector<64x16xf32>
    %5 = arith.mulf %2, %4 : vector<64x16xf32>
    %c0_5 = arith.constant 0 : index
    %c0_6 = arith.constant 0 : index
    %6 = vector.load %arg4[%c0_5, %c0_6] : memref<1x16xf32, #tpu.memory_space<vmem>>, vector<1x16xf32>
    %7 = vector.broadcast %6 : vector<1x16xf32> to vector<64x16xf32>
    %8 = arith.addf %5, %7 : vector<64x16xf32>
    %9 = arith.truncf %8 : vector<64x16xf32> to vector<64x16xbf16>
    %c0_7 = arith.constant 0 : index
    %c0_8 = arith.constant 0 : index
    %10 = vector.load %arg5[%c0_7, %c0_8] : memref<64x16xbf16, #tpu.memory_space<vmem>>, vector<64x16xbf16>
    tpu.vector_store %arg5[%c0_7, %c0_8], %9 {strides = array<i32>} : memref<64x16xbf16, #tpu.memory_space<vmem>>, vector<64x16xbf16>,
    return
  }
  func.func @transform_0(%arg0: i32) -> (i32, i32) {
    %c0_i32 = arith.constant 0 : i32
    %c0_i32_0 = arith.constant 0 : i32
    return %arg0, %c0_i32 : i32, i32
  }
  func.func @transform_1(%arg0: i32) -> (i32, i32) {
    %c0_i32 = arith.constant 0 : i32
    %c0_i32_0 = arith.constant 0 : i32
    %c0_i32_1 = arith.constant 0 : i32
    return %c0_i32, %c0_i32_0 : i32, i32
  }
  func.func @transform_2(%arg0: i32) -> (i32, i32) {
    %c0_i32 = arith.constant 0 : i32
    %c0_i32_0 = arith.constant 0 : i32
    %c0_i32_1 = arith.constant 0 : i32
    return %c0_i32, %c0_i32_0 : i32, i32
  }
  func.func @transform_3(%arg0: i32) -> (i32, i32) {
    %c0_i32 = arith.constant 0 : i32
    %c0_i32_0 = arith.constant 0 : i32
    %c0_i32_1 = arith.constant 0 : i32
    return %c0_i32, %c0_i32_0 : i32, i32
  }
  func.func @transform_4(%arg0: i32) -> (i32, i32) {
    %c0_i32 = arith.constant 0 : i32
    %c0_i32_0 = arith.constant 0 : i32
    return %arg0, %c0_i32 : i32, i32
  }
}

module attributes {stable_mosaic.version = 11 : i64} {
  func.func @kernel(%arg0: i32, %arg1: memref<64x16xbf16, #tpu.memory_space<vmem>>, %arg2: memref<1x16xf32, #tpu.memory_space<vmem>>, %arg3: memref<1x16xf32, #tpu.memory_space<vmem>>, %arg4: memref<16x32xbf16, #tpu.memory_space<vmem>>, %arg5: memref<1x32xf32, #tpu.memory_space<vmem>>, %arg6: memref<1x32xf32, #tpu.memory_space<vmem>>, %arg7: memref<64x32xbf16, #tpu.memory_space<vmem>>) attributes {dimension_semantics = [#tpu.dimension_semantics<parallel>], iteration_bounds = array<i64: 2>, scalar_prefetch = 0 : i64, scratch_operands = 0 : i64, tpu.core_type = #tpu.core_type<tc>, window_params = [{transform_indices = @transform_0, window_bounds = array<i64: 64, 16>}, {pipeline_mode = #tpu.pipeline_mode<synchronous>, transform_indices = @transform_1, window_bounds = array<i64: 1, 16>}, {pipeline_mode = #tpu.pipeline_mode<synchronous>, transform_indices = @transform_2, window_bounds = array<i64: 1, 16>}, {pipeline_mode = #tpu.pipeline_mode<synchronous>, transform_indices = @transform_3, window_bounds = array<i64: 16, 32>}, {pipeline_mode = #tpu.pipeline_mode<synchronous>, transform_indices = @transform_4, window_bounds = array<i64: 1, 32>}, {pipeline_mode = #tpu.pipeline_mode<synchronous>, transform_indices = @transform_5, window_bounds = array<i64: 1, 32>}, {transform_indices = @transform_6, window_bounds = array<i64: 64, 32>}]} {
    %c0 = arith.constant 0 : index
    %c0_0 = arith.constant 0 : index
    %0 = vector.load %arg1[%c0, %c0_0] : memref<64x16xbf16, #tpu.memory_space<vmem>>, vector<64x16xbf16>
    %1 = arith.extf %0 : vector<64x16xbf16> to vector<64x16xf32>
    %c0_1 = arith.constant 0 : index
    %c0_2 = arith.constant 0 : index
    %2 = vector.load %arg2[%c0_1, %c0_2] : memref<1x16xf32, #tpu.memory_space<vmem>>, vector<1x16xf32>
    %3 = vector.broadcast %2 : vector<1x16xf32> to vector<64x16xf32>
    %4 = arith.mulf %1, %3 : vector<64x16xf32>
    %c0_3 = arith.constant 0 : index
    %c0_4 = arith.constant 0 : index
    %5 = vector.load %arg3[%c0_3, %c0_4] : memref<1x16xf32, #tpu.memory_space<vmem>>, vector<1x16xf32>
    %6 = vector.broadcast %5 : vector<1x16xf32> to vector<64x16xf32>
    %7 = arith.addf %4, %6 : vector<64x16xf32>
    %cst = arith.constant 0.000000e+00 : f32
    %8 = vector.broadcast %cst : f32 to vector<64x16xf32>
    %9 = arith.maximumf %7, %8 : vector<64x16xf32>
    %10 = arith.truncf %9 : vector<64x16xf32> to vector<64x16xbf16>
    %c0_5 = arith.constant 0 : index
    %c0_6 = arith.constant 0 : index
    %11 = vector.load %arg4[%c0_5, %c0_6] : memref<16x32xbf16, #tpu.memory_space<vmem>>, vector<16x32xbf16>
    %cst_7 = arith.constant dense<0.000000e+00> : vector<64x32xf32>
    %12 = tpu.matmul %10, %11, %cst_7 {dimension_numbers = #tpu.dot_dimension_numbers<[1], [0], [0], [1], [0, 0, 1, 1], [], []>} : vector<64x16xbf16>, vector<16x32xbf16>, vector<64x32xf32> -> vector<64x32xf32>
    %c0_8 = arith.constant 0 : index
    %c0_9 = arith.constant 0 : index
    %13 = vector.load %arg5[%c0_8, %c0_9] : memref<1x32xf32, #tpu.memory_space<vmem>>, vector<1x32xf32>
    %14 = vector.broadcast %13 : vector<1x32xf32> to vector<64x32xf32>
    %15 = arith.mulf %12, %14 : vector<64x32xf32>
    %c0_10 = arith.constant 0 : index
    %c0_11 = arith.constant 0 : index
    %16 = vector.load %arg6[%c0_10, %c0_11] : memref<1x32xf32, #tpu.memory_space<vmem>>, vector<1x32xf32>
    %17 = vector.broadcast %16 : vector<1x32xf32> to vector<64x32xf32>
    %18 = arith.addf %15, %17 : vector<64x32xf32>
    %19 = arith.truncf %18 : vector<64x32xf32> to vector<64x32xbf16>
    %c0_12 = arith.constant 0 : index
    %c0_13 = arith.constant 0 : index
    %20 = vector.load %arg7[%c0_12, %c0_13] : memref<64x32xbf16, #tpu.memory_space<vmem>>, vector<64x32xbf16>
    tpu.vector_store %arg7[%c0_12, %c0_13], %19 {strides = array<i32>} : memref<64x32xbf16, #tpu.memory_space<vmem>>, vector<64x32xbf16>,
    return
  }
  func.func @transform_0(%arg0: i32) -> (i32, i32) {
    %c0_i32 = arith.constant 0 : i32
    %c0_i32_0 = arith.constant 0 : i32
    return %arg0, %c0_i32 : i32, i32
  }
  func.func @transform_1(%arg0: i32) -> (i32, i32) {
    %c0_i32 = arith.constant 0 : i32
    %c0_i32_0 = arith.constant 0 : i32
    %c0_i32_1 = arith.constant 0 : i32
    return %c0_i32, %c0_i32_0 : i32, i32
  }
  func.func @transform_2(%arg0: i32) -> (i32, i32) {
    %c0_i32 = arith.constant 0 : i32
    %c0_i32_0 = arith.constant 0 : i32
    %c0_i32_1 = arith.constant 0 : i32
    return %c0_i32, %c0_i32_0 : i32, i32
  }
  func.func @transform_3(%arg0: i32) -> (i32, i32) {
    %c0_i32 = arith.constant 0 : i32
    %c0_i32_0 = arith.constant 0 : i32
    %c0_i32_1 = arith.constant 0 : i32
    return %c0_i32, %c0_i32_0 : i32, i32
  }
  func.func @transform_4(%arg0: i32) -> (i32, i32) {
    %c0_i32 = arith.constant 0 : i32
    %c0_i32_0 = arith.constant 0 : i32
    %c0_i32_1 = arith.constant 0 : i32
    return %c0_i32, %c0_i32_0 : i32, i32
  }
  func.func @transform_5(%arg0: i32) -> (i32, i32) {
    %c0_i32 = arith.constant 0 : i32
    %c0_i32_0 = arith.constant 0 : i32
    %c0_i32_1 = arith.constant 0 : i32
    return %c0_i32, %c0_i32_0 : i32, i32
  }
  func.func @transform_6(%arg0: i32) -> (i32, i32) {
    %c0_i32 = arith.constant 0 : i32
    %c0_i32_0 = arith.constant 0 : i32
    return %arg0, %c0_i32 : i32, i32
  }
}

module attributes {stable_mosaic.version = 11 : i64} {
  func.func @kernel(%arg0: i32, %arg1: memref<256x16xbf16, #tpu.memory_space<vmem>>, %arg2: memref<1x16xf32, #tpu.memory_space<vmem>>, %arg3: memref<1x16xf32, #tpu.memory_space<vmem>>, %arg4: memref<16x8xbf16, #tpu.memory_space<vmem>>, %arg5: memref<1x8xf32, #tpu.memory_space<vmem>>, %arg6: memref<1x8xf32, #tpu.memory_space<vmem>>, %arg7: memref<256x8xbf16, #tpu.memory_space<vmem>>) attributes {dimension_semantics = [#tpu.dimension_semantics<parallel>], iteration_bounds = array<i64: 2>, scalar_prefetch = 0 : i64, scratch_operands = 0 : i64, tpu.core_type = #tpu.core_type<tc>, window_params = [{transform_indices = @transform_0, window_bounds = array<i64: 256, 16>}, {pipeline_mode = #tpu.pipeline_mode<synchronous>, transform_indices = @transform_1, window_bounds = array<i64: 1, 16>}, {pipeline_mode = #tpu.pipeline_mode<synchronous>, transform_indices = @transform_2, window_bounds = array<i64: 1, 16>}, {pipeline_mode = #tpu.pipeline_mode<synchronous>, transform_indices = @transform_3, window_bounds = array<i64: 16, 8>}, {pipeline_mode = #tpu.pipeline_mode<synchronous>, transform_indices = @transform_4, window_bounds = array<i64: 1, 8>}, {pipeline_mode = #tpu.pipeline_mode<synchronous>, transform_indices = @transform_5, window_bounds = array<i64: 1, 8>}, {transform_indices = @transform_6, window_bounds = array<i64: 256, 8>}]} {
    %c0 = arith.constant 0 : index
    %c0_0 = arith.constant 0 : index
    %0 = vector.load %arg1[%c0, %c0_0] : memref<256x16xbf16, #tpu.memory_space<vmem>>, vector<256x16xbf16>
    %1 = arith.extf %0 : vector<256x16xbf16> to vector<256x16xf32>
    %c0_1 = arith.constant 0 : index
    %c0_2 = arith.constant 0 : index
    %2 = vector.load %arg2[%c0_1, %c0_2] : memref<1x16xf32, #tpu.memory_space<vmem>>, vector<1x16xf32>
    %3 = vector.broadcast %2 : vector<1x16xf32> to vector<256x16xf32>
    %4 = arith.mulf %1, %3 : vector<256x16xf32>
    %c0_3 = arith.constant 0 : index
    %c0_4 = arith.constant 0 : index
    %5 = vector.load %arg3[%c0_3, %c0_4] : memref<1x16xf32, #tpu.memory_space<vmem>>, vector<1x16xf32>
    %6 = vector.broadcast %5 : vector<1x16xf32> to vector<256x16xf32>
    %7 = arith.addf %4, %6 : vector<256x16xf32>
    %cst = arith.constant 0.000000e+00 : f32
    %8 = vector.broadcast %cst : f32 to vector<256x16xf32>
    %9 = arith.maximumf %7, %8 : vector<256x16xf32>
    %10 = arith.truncf %9 : vector<256x16xf32> to vector<256x16xbf16>
    %c0_5 = arith.constant 0 : index
    %c0_6 = arith.constant 0 : index
    %11 = vector.load %arg4[%c0_5, %c0_6] : memref<16x8xbf16, #tpu.memory_space<vmem>>, vector<16x8xbf16>
    %cst_7 = arith.constant dense<0.000000e+00> : vector<256x8xf32>
    %12 = tpu.matmul %10, %11, %cst_7 {dimension_numbers = #tpu.dot_dimension_numbers<[1], [0], [0], [1], [0, 0, 1, 1], [], []>} : vector<256x16xbf16>, vector<16x8xbf16>, vector<256x8xf32> -> vector<256x8xf32>
    %c0_8 = arith.constant 0 : index
    %c0_9 = arith.constant 0 : index
    %13 = vector.load %arg5[%c0_8, %c0_9] : memref<1x8xf32, #tpu.memory_space<vmem>>, vector<1x8xf32>
    %14 = vector.broadcast %13 : vector<1x8xf32> to vector<256x8xf32>
    %15 = arith.mulf %12, %14 : vector<256x8xf32>
    %c0_10 = arith.constant 0 : index
    %c0_11 = arith.constant 0 : index
    %16 = vector.load %arg6[%c0_10, %c0_11] : memref<1x8xf32, #tpu.memory_space<vmem>>, vector<1x8xf32>
    %17 = vector.broadcast %16 : vector<1x8xf32> to vector<256x8xf32>
    %18 = arith.addf %15, %17 : vector<256x8xf32>
    %cst_12 = arith.constant 0.000000e+00 : f32
    %19 = vector.broadcast %cst_12 : f32 to vector<256x8xf32>
    %20 = arith.maximumf %18, %19 : vector<256x8xf32>
    %21 = arith.truncf %20 : vector<256x8xf32> to vector<256x8xbf16>
    %c0_13 = arith.constant 0 : index
    %c0_14 = arith.constant 0 : index
    %22 = vector.load %arg7[%c0_13, %c0_14] : memref<256x8xbf16, #tpu.memory_space<vmem>>, vector<256x8xbf16>
    tpu.vector_store %arg7[%c0_13, %c0_14], %21 {strides = array<i32>} : memref<256x8xbf16, #tpu.memory_space<vmem>>, vector<256x8xbf16>,
    return
  }
  func.func @transform_0(%arg0: i32) -> (i32, i32) {
    %c0_i32 = arith.constant 0 : i32
    %c0_i32_0 = arith.constant 0 : i32
    return %arg0, %c0_i32 : i32, i32
  }
  func.func @transform_1(%arg0: i32) -> (i32, i32) {
    %c0_i32 = arith.constant 0 : i32
    %c0_i32_0 = arith.constant 0 : i32
    %c0_i32_1 = arith.constant 0 : i32
    return %c0_i32, %c0_i32_0 : i32, i32
  }
  func.func @transform_2(%arg0: i32) -> (i32, i32) {
    %c0_i32 = arith.constant 0 : i32
    %c0_i32_0 = arith.constant 0 : i32
    %c0_i32_1 = arith.constant 0 : i32
    return %c0_i32, %c0_i32_0 : i32, i32
  }
  func.func @transform_3(%arg0: i32) -> (i32, i32) {
    %c0_i32 = arith.constant 0 : i32
    %c0_i32_0 = arith.constant 0 : i32
    %c0_i32_1 = arith.constant 0 : i32
    return %c0_i32, %c0_i32_0 : i32, i32
  }
  func.func @transform_4(%arg0: i32) -> (i32, i32) {
    %c0_i32 = arith.constant 0 : i32
    %c0_i32_0 = arith.constant 0 : i32
    %c0_i32_1 = arith.constant 0 : i32
    return %c0_i32, %c0_i32_0 : i32, i32
  }
  func.func @transform_5(%arg0: i32) -> (i32, i32) {
    %c0_i32 = arith.constant 0 : i32
    %c0_i32_0 = arith.constant 0 : i32
    %c0_i32_1 = arith.constant 0 : i32
    return %c0_i32, %c0_i32_0 : i32, i32
  }
  func.func @transform_6(%arg0: i32) -> (i32, i32) {
    %c0_i32 = arith.constant 0 : i32
    %c0_i32_0 = arith.constant 0 : i32
    return %arg0, %c0_i32 : i32, i32
  }
}

module attributes {stable_mosaic.version = 11 : i64} {
  func.func @kernel(%arg0: i32, %arg1: memref<256x88xbf16, #tpu.memory_space<vmem>>, %arg2: memref<88x8xbf16, #tpu.memory_space<vmem>>, %arg3: memref<1x8xf32, #tpu.memory_space<vmem>>, %arg4: memref<1x8xf32, #tpu.memory_space<vmem>>, %arg5: memref<256x8xbf16, #tpu.memory_space<vmem>>) attributes {dimension_semantics = [#tpu.dimension_semantics<parallel>], iteration_bounds = array<i64: 2>, scalar_prefetch = 0 : i64, scratch_operands = 0 : i64, tpu.core_type = #tpu.core_type<tc>, window_params = [{transform_indices = @transform_0, window_bounds = array<i64: 256, 88>}, {pipeline_mode = #tpu.pipeline_mode<synchronous>, transform_indices = @transform_1, window_bounds = array<i64: 88, 8>}, {pipeline_mode = #tpu.pipeline_mode<synchronous>, transform_indices = @transform_2, window_bounds = array<i64: 1, 8>}, {pipeline_mode = #tpu.pipeline_mode<synchronous>, transform_indices = @transform_3, window_bounds = array<i64: 1, 8>}, {transform_indices = @transform_4, window_bounds = array<i64: 256, 8>}]} {
    %c0 = arith.constant 0 : index
    %c0_0 = arith.constant 0 : index
    %0 = vector.load %arg1[%c0, %c0_0] : memref<256x88xbf16, #tpu.memory_space<vmem>>, vector<256x88xbf16>
    %c0_1 = arith.constant 0 : index
    %c0_2 = arith.constant 0 : index
    %1 = vector.load %arg2[%c0_1, %c0_2] : memref<88x8xbf16, #tpu.memory_space<vmem>>, vector<88x8xbf16>
    %cst = arith.constant dense<0.000000e+00> : vector<256x8xf32>
    %2 = tpu.matmul %0, %1, %cst {dimension_numbers = #tpu.dot_dimension_numbers<[1], [0], [0], [1], [0, 0, 1, 1], [], []>} : vector<256x88xbf16>, vector<88x8xbf16>, vector<256x8xf32> -> vector<256x8xf32>
    %c0_3 = arith.constant 0 : index
    %c0_4 = arith.constant 0 : index
    %3 = vector.load %arg3[%c0_3, %c0_4] : memref<1x8xf32, #tpu.memory_space<vmem>>, vector<1x8xf32>
    %4 = vector.broadcast %3 : vector<1x8xf32> to vector<256x8xf32>
    %5 = arith.mulf %2, %4 : vector<256x8xf32>
    %c0_5 = arith.constant 0 : index
    %c0_6 = arith.constant 0 : index
    %6 = vector.load %arg4[%c0_5, %c0_6] : memref<1x8xf32, #tpu.memory_space<vmem>>, vector<1x8xf32>
    %7 = vector.broadcast %6 : vector<1x8xf32> to vector<256x8xf32>
    %8 = arith.addf %5, %7 : vector<256x8xf32>
    %9 = arith.truncf %8 : vector<256x8xf32> to vector<256x8xbf16>
    %c0_7 = arith.constant 0 : index
    %c0_8 = arith.constant 0 : index
    %10 = vector.load %arg5[%c0_7, %c0_8] : memref<256x8xbf16, #tpu.memory_space<vmem>>, vector<256x8xbf16>
    tpu.vector_store %arg5[%c0_7, %c0_8], %9 {strides = array<i32>} : memref<256x8xbf16, #tpu.memory_space<vmem>>, vector<256x8xbf16>,
    return
  }
  func.func @transform_0(%arg0: i32) -> (i32, i32) {
    %c0_i32 = arith.constant 0 : i32
    %c0_i32_0 = arith.constant 0 : i32
    return %arg0, %c0_i32 : i32, i32
  }
  func.func @transform_1(%arg0: i32) -> (i32, i32) {
    %c0_i32 = arith.constant 0 : i32
    %c0_i32_0 = arith.constant 0 : i32
    %c0_i32_1 = arith.constant 0 : i32
    return %c0_i32, %c0_i32_0 : i32, i32
  }
  func.func @transform_2(%arg0: i32) -> (i32, i32) {
    %c0_i32 = arith.constant 0 : i32
    %c0_i32_0 = arith.constant 0 : i32
    %c0_i32_1 = arith.constant 0 : i32
    return %c0_i32, %c0_i32_0 : i32, i32
  }
  func.func @transform_3(%arg0: i32) -> (i32, i32) {
    %c0_i32 = arith.constant 0 : i32
    %c0_i32_0 = arith.constant 0 : i32
    %c0_i32_1 = arith.constant 0 : i32
    return %c0_i32, %c0_i32_0 : i32, i32
  }
  func.func @transform_4(%arg0: i32) -> (i32, i32) {
    %c0_i32 = arith.constant 0 : i32
    %c0_i32_0 = arith.constant 0 : i32
    return %arg0, %c0_i32 : i32, i32
  }
}

</mosaic_0001>

<bundles_post_ra>
// kernel: _lambda_.15
= control target key start
LH: loop header
LB: loop body
LE: loop exit
PB: predicated region body
PF: predicated region fallthrough
CT: control target
= control target key end

     0   :  { %s822_s15 = smov 0   ;;  %s1026_s0 = inlined_call_operand.vmem [shape: bf16[512,18], index: 0, kind: input, shape index: {}]   ;;  %s1027_s1 = inlined_call_operand.vmem [shape: bf16[18,8], index: 1, kind: input, shape index: {}]   ;;  %s1028_s2 = inlined_call_operand.vmem [shape: f32[1,8], index: 2, kind: input, shape index: {}]   ;;  %s1029_s3 = inlined_call_operand.vmem [shape: f32[1,8], index: 3, kind: input, shape index: {}]   ;;  %s1030_s4 = inlined_call_operand.vmem [shape: bf16[512,8], index: 4, kind: output, shape index: {}]  }
   0x1 LB: > { %s661_s16 = sadd.s32 4294967295, %s795_s15   ;;  %p665_p0 = scmp.ge.s32.totalorder %s795_s15, 1  ;;  %s795_s15 = sphi %s822_s15, %s14_s15  }
   0x2   : > { %p163_p1 = scmp.lt.s32.totalorder %s795_s15, 3 }
   0x4   : > { %p164_p2 = pnand %p665_p0, %p163_p1 }
   0x5   : > { %s666_s19 = sshll.u32 (!%p164_p2), %s661_s16, 5 }
   0x6   : > { %167 = sbr.rel (%p164_p2) target bundleno = 221 (0xdd), region = 36  ;;  %p190_p3 = scmp.lt.s32.totalorder (!%p164_p2), %s666_s19, 63 }
   0xb   : > { %v236_v0 = vld [vmem:[%s1027_s1 + $0x8] sm:$0x1]  ;;  %vm375_vm0 = vcmask 1040384   ;;  %s1032_s19 = smov (!%p190_p3, %s666_s19), 63  ;;  %v772_v4 = vld [vmem:[%s1027_s1] sm:$0xff]  ;;  %vm326_vm1 = vcmask 146432  }
   0xc   : > { %v322_v1 = vunpack.c.l.b16 %v236_v0  ;;  %s667_s20 = sshll.u32 %s1032_s19, 2  ;;  %v881_v21 = vld [vmem:[%s1028_s2] ss:$0 sm:$0xff]  ;;  %vm572_vm2 = vcmask 60416  }
   0xd   : > { %s844_s25 = scalar_lea.vmem %s1026_s0, %s667_s20  ;;  %v886_v22 = vld [vmem:[%s1029_s3] ss:$0 sm:$0xff]  ;;  %s897_s6 = scalar_lea.vmem %s1030_s4, %s667_s20 }
   0xe   : > { %v324_v2 = vpack.c.b16 %v322_v1, %v322_v1  ;;  %v756_v5 = vld [vmem:[%s844_s25] sm:$0xff]  ;;  %v757_v9 = vld [vmem:[%s844_s25 + $0x8] sm:$0xff]  ;;  %v758_v13 = vld [vmem:[%s844_s25 + $0x10] sm:$0xff] }
   0xf   : > { %v760_v6 = vld [vmem:[%s844_s25 + $0x20] sm:$0xff]  ;;  %v761_v10 = vld [vmem:[%s844_s25 + $0x28] sm:$0xff]  ;;  %v762_v14 = vld [vmem:[%s844_s25 + $0x30] sm:$0xff] }
  0x10   : > { %v377_v3 = vsel %vm375_vm0, %v324_v2, 0  ;;  %v764_v7 = vld [vmem:[%s844_s25 + $0x40] sm:$0xff]  ;;  %v765_v11 = vld [vmem:[%s844_s25 + $0x48] sm:$0xff]  ;;  %v766_v15 = vld [vmem:[%s844_s25 + $0x50] sm:$0xff] }
  0x11   : > { %385 = vmatpush.bf16.msra.mxu0 %v377_v3  ;;  %773 = vmatpush.bf16.msra.mxu1 %v377_v3  ;;  %v768_v8 = vld [vmem:[%s844_s25 + $0x60] sm:$0xff]  ;;  %v769_v12 = vld [vmem:[%s844_s25 + $0x68] sm:$0xff]  ;;  %v770_v16 = vld [vmem:[%s844_s25 + $0x70] sm:$0xff] }
  0x12   : > { %774 = vmatpush.bf16.msra.mxu2 %v377_v3  ;;  %775 = vmatpush.bf16.msra.mxu3 %v377_v3  ;;  %v759_v17 = vld [vmem:[%s844_s25 + $0x18] sm:$0xff] }
  0x13   : > { %v763_v18 = vld [vmem:[%s844_s25 + $0x38] sm:$0xff] }
  0x14   : > { %v767_v19 = vld [vmem:[%s844_s25 + $0x58] sm:$0xff] }
  0x15   : > { %386 = vmatpush.bf16.msra.mxu0 %v772_v4  ;;  %776 = vmatpush.bf16.msra.mxu1 %v772_v4  ;;  %v771_v20 = vld [vmem:[%s844_s25 + $0x78] sm:$0xff] }
  0x16   : > { %777 = vmatpush.bf16.msra.mxu2 %v772_v4  ;;  %778 = vmatpush.bf16.msra.mxu3 %v772_v4 }
  0x18   : > { %738 = vmatmul.msk.bf16.vlgmr.msra.gmra.mxu0 %vm326_vm1, %v756_v5  ;;  %742 = vmatmul.msk.bf16.vlgmr.msra.gmra.mxu1 %vm326_vm1, %v760_v6 }
  0x19   : > { %746 = vmatmul.msk.bf16.vlgmr.msra.gmra.mxu2 %vm326_vm1, %v764_v7  ;;  %750 = vmatmul.msk.bf16.vlgmr.msra.gmra.mxu3 %vm326_vm1, %v768_v8 }
  0x28   : > { %739 = vmatmul.msk.bf16.gmra.mxu0 %vm326_vm1, %v757_v9  ;;  %743 = vmatmul.msk.bf16.gmra.mxu1 %vm326_vm1, %v761_v10 }
  0x29   : > { %747 = vmatmul.msk.bf16.gmra.mxu2 %vm326_vm1, %v765_v11  ;;  %751 = vmatmul.msk.bf16.gmra.mxu3 %vm326_vm1, %v769_v12 }
  0x38   : > { %740 = vmatmul.msk.bf16.gmra.mxu0 %vm326_vm1, %v758_v13  ;;  %744 = vmatmul.msk.bf16.gmra.mxu1 %vm326_vm1, %v762_v14 }
  0x39   : > { %748 = vmatmul.msk.bf16.gmra.mxu2 %vm326_vm1, %v766_v15  ;;  %752 = vmatmul.msk.bf16.gmra.mxu3 %vm326_vm1, %v770_v16 }
  0x48   : > { %741 = vmatmul.msk.bf16.gmra.mxu0 %vm326_vm1, %v759_v17  ;;  %745 = vmatmul.msk.bf16.gmra.mxu1 %vm326_vm1, %v763_v18 }
  0x49   : > { %749 = vmatmul.msk.bf16.gmra.mxu2 %vm326_vm1, %v767_v19  ;;  %753 = vmatmul.msk.bf16.gmra.mxu3 %vm326_vm1, %v771_v20 }
  0x95   : > { %v388_v23 = vpop.f32.mrf.mxu0  ;;  %v408_v24 = vpop.f32.mrf.mxu1 }
  0x96   : > { %v472_v25 = vmul.f32 %v881_v21, %v388_v23  ;;  %v480_v26 = vmul.f32 %v881_v21, %v408_v24 }
  0x98   : > { %v508_v27 = vadd.f32 %v886_v22, %v472_v25  ;;  %v516_v28 = vadd.f32 %v886_v22, %v480_v26 }
  0x9a   : > { %v540_v29 = vpack.c.bf16 %v508_v27, %v508_v27  ;;  %v548_v30 = vpack.c.bf16 %v516_v28, %v516_v28 }
  0x9c   : > { %573 = vst.msk [vmem:[%s897_s6] sm:$0xf] %vm572_vm2, %v540_v29  ;;  %v428_v31 = vpop.f32.mrf.mxu2  ;;  %v448_v32 = vpop.f32.mrf.mxu3 }
  0x9d   : > { %581 = vst.msk [vmem:[%s897_s6 + $0x20] sm:$0xf] %vm572_vm2, %v548_v30  ;;  %v488_v33 = vmul.f32 %v881_v21, %v428_v31  ;;  %v496_v34 = vmul.f32 %v881_v21, %v448_v32  ;;  %v390_v35 = vpop.f32.mrf.mxu0  ;;  %v410_v36 = vpop.f32.mrf.mxu1 }
  0x9e   : > { %v473_v37 = vmul.f32 %v881_v21, %v390_v35  ;;  %v481_v38 = vmul.f32 %v881_v21, %v410_v36 }
  0x9f   : > { %v524_v39 = vadd.f32 %v886_v22, %v488_v33  ;;  %v532_v40 = vadd.f32 %v886_v22, %v496_v34 }
  0xa0   : > { %v509_v41 = vadd.f32 %v886_v22, %v473_v37  ;;  %v517_v42 = vadd.f32 %v886_v22, %v481_v38 }
  0xa1   : > { %v556_v43 = vpack.c.bf16 %v524_v39, %v524_v39  ;;  %v564_v44 = vpack.c.bf16 %v532_v40, %v532_v40 }
  0xa2   : > { %v541_v45 = vpack.c.bf16 %v509_v41, %v509_v41  ;;  %v549_v46 = vpack.c.bf16 %v517_v42, %v517_v42 }
  0xa3   : > { %589 = vst.msk [vmem:[%s897_s6 + $0x40] sm:$0xf] %vm572_vm2, %v556_v43 }
  0xa4   : > { %597 = vst.msk [vmem:[%s897_s6 + $0x60] sm:$0xf] %vm572_vm2, %v564_v44  ;;  %v430_v47 = vpop.f32.mrf.mxu2  ;;  %v450_v48 = vpop.f32.mrf.mxu3 }
  0xa5   : > { %574 = vst.msk [vmem:[%s897_s6 + $0x4] sm:$0xf] %vm572_vm2, %v541_v45  ;;  %v489_v49 = vmul.f32 %v881_v21, %v430_v47  ;;  %v497_v50 = vmul.f32 %v881_v21, %v450_v48  ;;  %v393_v51 = vpop.f32.mrf.mxu0  ;;  %v413_v52 = vpop.f32.mrf.mxu1 }
  0xa6   : > { %582 = vst.msk [vmem:[%s897_s6 + $0x24] sm:$0xf] %vm572_vm2, %v549_v46  ;;  %v474_v53 = vmul.f32 %v881_v21, %v393_v51  ;;  %v482_v54 = vmul.f32 %v881_v21, %v413_v52 }
  0xa7   : > { %v525_v55 = vadd.f32 %v886_v22, %v489_v49  ;;  %v533_v56 = vadd.f32 %v886_v22, %v497_v50 }
  0xa8   : > { %v510_v57 = vadd.f32 %v886_v22, %v474_v53  ;;  %v518_v58 = vadd.f32 %v886_v22, %v482_v54 }
  0xa9   : > { %v557_v59 = vpack.c.bf16 %v525_v55, %v525_v55  ;;  %v565_v60 = vpack.c.bf16 %v533_v56, %v533_v56 }
  0xaa   : > { %v542_v61 = vpack.c.bf16 %v510_v57, %v510_v57  ;;  %v550_v62 = vpack.c.bf16 %v518_v58, %v518_v58 }
  0xab   : > { %590 = vst.msk [vmem:[%s897_s6 + $0x44] sm:$0xf] %vm572_vm2, %v557_v59 }
  0xac   : > { %598 = vst.msk [vmem:[%s897_s6 + $0x64] sm:$0xf] %vm572_vm2, %v565_v60  ;;  %v433_v63 = vpop.f32.mrf.mxu2  ;;  %v453_v0 = vpop.f32.mrf.mxu3 }
  0xad   : > { %575 = vst.msk [vmem:[%s897_s6 + $0x8] sm:$0xf] %vm572_vm2, %v542_v61  ;;  %v490_v1 = vmul.f32 %v881_v21, %v433_v63  ;;  %v498_v2 = vmul.f32 %v881_v21, %v453_v0  ;;  %v395_v3 = vpop.f32.mrf.mxu0  ;;  %v415_v4 = vpop.f32.mrf.mxu1 }
  0xae   : > { %583 = vst.msk [vmem:[%s897_s6 + $0x28] sm:$0xf] %vm572_vm2, %v550_v62  ;;  %v475_v5 = vmul.f32 %v881_v21, %v395_v3  ;;  %v483_v6 = vmul.f32 %v881_v21, %v415_v4 }
  0xaf   : > { %v526_v7 = vadd.f32 %v886_v22, %v490_v1  ;;  %v534_v8 = vadd.f32 %v886_v22, %v498_v2 }
  0xb0   : > { %v511_v9 = vadd.f32 %v886_v22, %v475_v5  ;;  %v519_v10 = vadd.f32 %v886_v22, %v483_v6 }
  0xb1   : > { %v558_v11 = vpack.c.bf16 %v526_v7, %v526_v7  ;;  %v566_v12 = vpack.c.bf16 %v534_v8, %v534_v8 }
  0xb2   : > { %v543_v13 = vpack.c.bf16 %v511_v9, %v511_v9  ;;  %v551_v14 = vpack.c.bf16 %v519_v10, %v519_v10 }
  0xb3   : > { %591 = vst.msk [vmem:[%s897_s6 + $0x48] sm:$0xf] %vm572_vm2, %v558_v11 }
  0xb4   : > { %599 = vst.msk [vmem:[%s897_s6 + $0x68] sm:$0xf] %vm572_vm2, %v566_v12  ;;  %v435_v15 = vpop.f32.mrf.mxu2  ;;  %v455_v16 = vpop.f32.mrf.mxu3 }
  0xb5   : > { %576 = vst.msk [vmem:[%s897_s6 + $0xc] sm:$0xf] %vm572_vm2, %v543_v13  ;;  %v491_v17 = vmul.f32 %v881_v21, %v435_v15  ;;  %v499_v18 = vmul.f32 %v881_v21, %v455_v16  ;;  %v398_v19 = vpop.f32.mrf.mxu0  ;;  %v418_v20 = vpop.f32.mrf.mxu1 }
  0xb6   : > { %584 = vst.msk [vmem:[%s897_s6 + $0x2c] sm:$0xf] %vm572_vm2, %v551_v14  ;;  %v476_v23 = vmul.f32 %v881_v21, %v398_v19  ;;  %v484_v24 = vmul.f32 %v881_v21, %v418_v20 }
  0xb7   : > { %v527_v25 = vadd.f32 %v886_v22, %v491_v17  ;;  %v535_v26 = vadd.f32 %v886_v22, %v499_v18 }
  0xb8   : > { %v512_v27 = vadd.f32 %v886_v22, %v476_v23  ;;  %v520_v28 = vadd.f32 %v886_v22, %v484_v24 }
  0xb9   : > { %v559_v29 = vpack.c.bf16 %v527_v25, %v527_v25  ;;  %v567_v30 = vpack.c.bf16 %v535_v26, %v535_v26 }
  0xba   : > { %v544_v31 = vpack.c.bf16 %v512_v27, %v512_v27  ;;  %v552_v32 = vpack.c.bf16 %v520_v28, %v520_v28 }
  0xbb   : > { %592 = vst.msk [vmem:[%s897_s6 + $0x4c] sm:$0xf] %vm572_vm2, %v559_v29 }
  0xbc   : > { %600 = vst.msk [vmem:[%s897_s6 + $0x6c] sm:$0xf] %vm572_vm2, %v567_v30  ;;  %v438_v33 = vpop.f32.mrf.mxu2  ;;  %v458_v34 = vpop.f32.mrf.mxu3 }
  0xbd   : > { %577 = vst.msk [vmem:[%s897_s6 + $0x10] sm:$0xf] %vm572_vm2, %v544_v31  ;;  %v492_v35 = vmul.f32 %v881_v21, %v438_v33  ;;  %v500_v36 = vmul.f32 %v881_v21, %v458_v34  ;;  %v400_v37 = vpop.f32.mrf.mxu0  ;;  %v420_v38 = vpop.f32.mrf.mxu1 }
  0xbe   : > { %585 = vst.msk [vmem:[%s897_s6 + $0x30] sm:$0xf] %vm572_vm2, %v552_v32  ;;  %v477_v39 = vmul.f32 %v881_v21, %v400_v37  ;;  %v485_v40 = vmul.f32 %v881_v21, %v420_v38 }
  0xbf   : > { %v528_v41 = vadd.f32 %v886_v22, %v492_v35  ;;  %v536_v42 = vadd.f32 %v886_v22, %v500_v36 }
  0xc0   : > { %v513_v43 = vadd.f32 %v886_v22, %v477_v39  ;;  %v521_v44 = vadd.f32 %v886_v22, %v485_v40 }
  0xc1   : > { %v560_v45 = vpack.c.bf16 %v528_v41, %v528_v41  ;;  %v568_v46 = vpack.c.bf16 %v536_v42, %v536_v42 }
  0xc2   : > { %v545_v47 = vpack.c.bf16 %v513_v43, %v513_v43  ;;  %v553_v48 = vpack.c.bf16 %v521_v44, %v521_v44 }
  0xc3   : > { %593 = vst.msk [vmem:[%s897_s6 + $0x50] sm:$0xf] %vm572_vm2, %v560_v45 }
  0xc4   : > { %601 = vst.msk [vmem:[%s897_s6 + $0x70] sm:$0xf] %vm572_vm2, %v568_v46  ;;  %v440_v49 = vpop.f32.mrf.mxu2  ;;  %v460_v50 = vpop.f32.mrf.mxu3 }
  0xc5   : > { %578 = vst.msk [vmem:[%s897_s6 + $0x14] sm:$0xf] %vm572_vm2, %v545_v47  ;;  %v493_v51 = vmul.f32 %v881_v21, %v440_v49  ;;  %v501_v52 = vmul.f32 %v881_v21, %v460_v50  ;;  %v403_v53 = vpop.f32.mrf.mxu0  ;;  %v423_v54 = vpop.f32.mrf.mxu1 }
  0xc6   : > { %586 = vst.msk [vmem:[%s897_s6 + $0x34] sm:$0xf] %vm572_vm2, %v553_v48  ;;  %v478_v55 = vmul.f32 %v881_v21, %v403_v53  ;;  %v486_v56 = vmul.f32 %v881_v21, %v423_v54 }
  0xc7   : > { %v529_v57 = vadd.f32 %v886_v22, %v493_v51  ;;  %v537_v58 = vadd.f32 %v886_v22, %v501_v52 }
  0xc8   : > { %v514_v59 = vadd.f32 %v886_v22, %v478_v55  ;;  %v522_v60 = vadd.f32 %v886_v22, %v486_v56 }
  0xc9   : > { %v561_v61 = vpack.c.bf16 %v529_v57, %v529_v57  ;;  %v569_v62 = vpack.c.bf16 %v537_v58, %v537_v58 }
  0xca   : > { %v546_v63 = vpack.c.bf16 %v514_v59, %v514_v59  ;;  %v554_v0 = vpack.c.bf16 %v522_v60, %v522_v60 }
  0xcb   : > { %594 = vst.msk [vmem:[%s897_s6 + $0x54] sm:$0xf] %vm572_vm2, %v561_v61 }
  0xcc   : > { %602 = vst.msk [vmem:[%s897_s6 + $0x74] sm:$0xf] %vm572_vm2, %v569_v62  ;;  %v443_v1 = vpop.f32.mrf.mxu2  ;;  %v463_v2 = vpop.f32.mrf.mxu3 }
  0xcd   : > { %579 = vst.msk [vmem:[%s897_s6 + $0x18] sm:$0xf] %vm572_vm2, %v546_v63  ;;  %v494_v3 = vmul.f32 %v881_v21, %v443_v1  ;;  %v502_v4 = vmul.f32 %v881_v21, %v463_v2  ;;  %v405_v5 = vpop.f32.mrf.mxu0  ;;  %v425_v6 = vpop.f32.mrf.mxu1 }
  0xce   : > { %587 = vst.msk [vmem:[%s897_s6 + $0x38] sm:$0xf] %vm572_vm2, %v554_v0  ;;  %v479_v7 = vmul.f32 %v881_v21, %v405_v5  ;;  %v487_v8 = vmul.f32 %v881_v21, %v425_v6 }
  0xcf   : > { %v530_v9 = vadd.f32 %v886_v22, %v494_v3  ;;  %v538_v10 = vadd.f32 %v886_v22, %v502_v4 }
  0xd0   : > { %v515_v11 = vadd.f32 %v886_v22, %v479_v7  ;;  %v523_v12 = vadd.f32 %v886_v22, %v487_v8 }
  0xd1   : > { %v562_v13 = vpack.c.bf16 %v530_v9, %v530_v9  ;;  %v570_v14 = vpack.c.bf16 %v538_v10, %v538_v10 }
  0xd2   : > { %v547_v15 = vpack.c.bf16 %v515_v11, %v515_v11  ;;  %v555_v16 = vpack.c.bf16 %v523_v12, %v523_v12 }
  0xd3   : > { %595 = vst.msk [vmem:[%s897_s6 + $0x58] sm:$0xf] %vm572_vm2, %v562_v13 }
  0xd4   : > { %603 = vst.msk [vmem:[%s897_s6 + $0x78] sm:$0xf] %vm572_vm2, %v570_v14  ;;  %v445_v17 = vpop.f32.mrf.mxu2  ;;  %v465_v18 = vpop.f32.mrf.mxu3 }
  0xd5   : > { %580 = vst.msk [vmem:[%s897_s6 + $0x1c] sm:$0xf] %vm572_vm2, %v547_v15  ;;  %v495_v19 = vmul.f32 %v881_v21, %v445_v17  ;;  %v503_v20 = vmul.f32 %v881_v21, %v465_v18 }
  0xd6   : > { %588 = vst.msk [vmem:[%s897_s6 + $0x3c] sm:$0xf] %vm572_vm2, %v555_v16 }
  0xd7   : > { %v531_v23 = vadd.f32 %v886_v22, %v495_v19  ;;  %v539_v24 = vadd.f32 %v886_v22, %v503_v20 }
  0xd9   : > { %v563_v25 = vpack.c.bf16 %v531_v23, %v531_v23  ;;  %v571_v26 = vpack.c.bf16 %v539_v24, %v539_v24 }
  0xdb   : > { %596 = vst.msk [vmem:[%s897_s6 + $0x5c] sm:$0xf] %vm572_vm2, %v563_v25 }
  0xdc   : > { %604 = vst.msk [vmem:[%s897_s6 + $0x7c] sm:$0xf] %vm572_vm2, %v571_v26 }
  0xdd PF: > { %s14_s15 = sadd.s32 1, %s795_s15  }
  0xde   : > { %p11_p4 = scmp.ge.s32.totalorder %s14_s15, 4  }
  0xe0   :  { %13 = sbr.rel (!%p11_p4) target bundleno = 1 (0x1), region = 66 }

// kernel: _lambda_.16
= control target key start
LH: loop header
LB: loop body
LE: loop exit
PB: predicated region body
PF: predicated region fallthrough
CT: control target
= control target key end

     0   :  { %s972_s21 = smov 0   ;;  %s1247_s0 = inlined_call_operand.vmem [shape: bf16[512,8], index: 0, kind: input, shape index: {}]   ;;  %s1248_s1 = inlined_call_operand.vmem [shape: f32[1,8], index: 1, kind: input, shape index: {}, may-alias: {1,4}]   ;;  %s1249_s2 = inlined_call_operand.vmem [shape: f32[1,8], index: 2, kind: input, shape index: {}, may-alias: {2,5}]   ;;  %s1250_s3 = inlined_call_operand.vmem [shape: bf16[8,8], index: 3, kind: input, shape index: {}]   ;;  %s1251_s4 = inlined_call_operand.vmem [shape: f32[1,8], index: 4, kind: input, shape index: {}, may-alias: {1,4}]   ;;  %s1252_s5 = inlined_call_operand.vmem [shape: f32[1,8], index: 5, kind: input, shape index: {}, may-alias: {2,5}]   ;;  %s1253_s6 = inlined_call_operand.vmem [shape: bf16[512,8], index: 6, kind: output, shape index: {}]  }
   0x1 LB: > { %s808_s22 = sadd.s32 4294967295, %s935_s21   ;;  %p812_p0 = scmp.ge.s32.totalorder %s935_s21, 1  ;;  %s935_s21 = sphi %s972_s21, %s16_s21  }
   0x2   : > { %p213_p1 = scmp.lt.s32.totalorder %s935_s21, 3 }
   0x4   : > { %p214_p2 = pnand %p812_p0, %p213_p1 }
   0x5   : > { %s813_s25 = sshll.u32 (!%p214_p2), %s808_s22, 5 }
   0x6   : > { %217 = sbr.rel (%p214_p2) target bundleno = 225 (0xe1), region = 44  ;;  %p244_p3 = scmp.lt.s32.totalorder (!%p214_p2), %s813_s25, 63 }
   0xb   : > { %v440_v0 = vld [vmem:[%s1250_s3] sm:$0xf]  ;;  %vm490_vm0 = vcmask 1043456   ;;  %s1255_s25 = smov (!%p244_p3, %s813_s25), 63  ;;  %vm441_vm1 = vcmask 64512   ;;  %vm719_vm2 = vcmask 60416  }
   0xc   : > { %v492_v1 = vsel %vm490_vm0, %v440_v0, 0  ;;  %s814_s26 = sshll.u32 %s1255_s25, 2  ;;  %v996_v2 = vld [vmem:[%s1248_s1] ss:$0 sm:$0xff] }
   0xd   : > { %501 = vmatpush.bf16.msra.mxu0 %v492_v1  ;;  %914 = vmatpush.bf16.msra.mxu1 %v492_v1  ;;  %s991_s29 = scalar_lea.vmem %s1247_s0, %s814_s26  ;;  %v1004_v8 = vld [vmem:[%s1249_s2] ss:$0 sm:$0xff]  ;;  %s1118_s16 = scalar_lea.vmem %s1253_s6, %s814_s26 }
   0xe   : > { %915 = vmatpush.bf16.msra.mxu2 %v492_v1  ;;  %916 = vmatpush.bf16.msra.mxu3 %v492_v1  ;;  %v836_v3 = vld [vmem:[%s991_s29] sm:$0xff]   ;;  %v899_v32 = vld [vmem:[%s991_s29 + $0x8] sm:$0xff]  }
   0xf   : > { %v902_v4 = vld [vmem:[%s991_s29 + $0x20] sm:$0xff]   ;;  %v837_v6 = vunpack.c.l.bf16 %v836_v3  ;;  %v838_v7 = vunpack.c.h.bf16 %v836_v3  ;;  %v903_v37 = vld [vmem:[%s991_s29 + $0x28] sm:$0xff]   ;;  %v841_v45 = vunpack.c.l.bf16 %v899_v32  ;;  %v842_v46 = vunpack.c.h.bf16 %v899_v32 }
  0x10   : > { %v906_v5 = vld [vmem:[%s991_s29 + $0x40] sm:$0xff]   ;;  %v853_v9 = vunpack.c.l.bf16 %v902_v4  ;;  %v854_v10 = vunpack.c.h.bf16 %v902_v4  ;;  %v907_v42 = vld [vmem:[%s991_s29 + $0x48] sm:$0xff]   ;;  %v857_v50 = vunpack.c.l.bf16 %v903_v37  ;;  %v858_v51 = vunpack.c.h.bf16 %v903_v37 }
  0x11   : > { %v910_v11 = vld [vmem:[%s991_s29 + $0x60] sm:$0xff]   ;;  %v869_v12 = vunpack.c.l.bf16 %v906_v5  ;;  %v870_v13 = vunpack.c.h.bf16 %v906_v5  ;;  %v324_v16 = vmul.f32 %v996_v2, %v837_v6  ;;  %v325_v17 = vmul.f32 %v996_v2, %v838_v7  ;;  %v911_v47 = vld [vmem:[%s991_s29 + $0x68] sm:$0xff]  }
  0x12   : > { %v885_v14 = vunpack.c.l.bf16 %v910_v11  ;;  %v886_v15 = vunpack.c.h.bf16 %v910_v11  ;;  %v332_v18 = vmul.f32 %v996_v2, %v853_v9  ;;  %v333_v19 = vmul.f32 %v996_v2, %v854_v10 }
  0x13   : > { %v340_v20 = vmul.f32 %v996_v2, %v869_v12  ;;  %v341_v21 = vmul.f32 %v996_v2, %v870_v13  ;;  %v360_v24 = vadd.f32 %v1004_v8, %v324_v16  ;;  %v361_v25 = vadd.f32 %v1004_v8, %v325_v17 }
  0x14   : > { %v348_v22 = vmul.f32 %v996_v2, %v885_v14  ;;  %v349_v23 = vmul.f32 %v996_v2, %v886_v15  ;;  %v368_v26 = vadd.f32 %v1004_v8, %v332_v18  ;;  %v369_v27 = vadd.f32 %v1004_v8, %v333_v19  ;;  %v900_v14 = vld [vmem:[%s991_s29 + $0x10] sm:$0xff]  }
  0x15   : > { %v376_v28 = vadd.f32 %v1004_v8, %v340_v20  ;;  %v377_v29 = vadd.f32 %v1004_v8, %v341_v21  ;;  %v392_v33 = vmax.f32 %v360_v24, 0.0  ;;  %v393_v34 = vmax.f32 %v361_v25, 0.0  ;;  %v904_v15 = vld [vmem:[%s991_s29 + $0x30] sm:$0xff]  }
  0x16   : > { %v384_v30 = vadd.f32 %v1004_v8, %v348_v22  ;;  %v385_v31 = vadd.f32 %v1004_v8, %v349_v23  ;;  %v400_v35 = vmax.f32 %v368_v26, 0.0  ;;  %v401_v36 = vmax.f32 %v369_v27, 0.0  ;;  %v908_v20 = vld [vmem:[%s991_s29 + $0x50] sm:$0xff]  }
  0x17   : > { %v408_v38 = vmax.f32 %v376_v28, 0.0  ;;  %v409_v39 = vmax.f32 %v377_v29, 0.0  ;;  %v424_v43 = vpack.c.bf16 %v393_v34, %v392_v33  ;;  %v326_v52 = vmul.f32 %v996_v2, %v841_v45  ;;  %v912_v21 = vld [vmem:[%s991_s29 + $0x70] sm:$0xff]  }
  0x18   : > { %v416_v40 = vmax.f32 %v384_v30, 0.0  ;;  %v417_v41 = vmax.f32 %v385_v31, 0.0  ;;  %v428_v44 = vpack.c.bf16 %v401_v36, %v400_v35  ;;  %v327_v53 = vmul.f32 %v996_v2, %v842_v46 }
  0x19   : > { %v432_v48 = vpack.c.bf16 %v409_v39, %v408_v38  ;;  %817 = vmatmul.msk.bf16.vlgmr.msra.gmra.mxu0 %vm441_vm1, %v424_v43  ;;  %v873_v54 = vunpack.c.l.bf16 %v907_v42  ;;  %v874_v55 = vunpack.c.h.bf16 %v907_v42  ;;  %v334_v56 = vmul.f32 %v996_v2, %v857_v50 }
  0x1a   : > { %v436_v49 = vpack.c.bf16 %v417_v41, %v416_v40  ;;  %821 = vmatmul.msk.bf16.vlgmr.msra.gmra.mxu1 %vm441_vm1, %v428_v44  ;;  %v335_v57 = vmul.f32 %v996_v2, %v858_v51  ;;  %v889_v58 = vunpack.c.l.bf16 %v911_v47  ;;  %v890_v59 = vunpack.c.h.bf16 %v911_v47 }
  0x1b   : > { %825 = vmatmul.msk.bf16.vlgmr.msra.gmra.mxu2 %vm441_vm1, %v432_v48  ;;  %v342_v60 = vmul.f32 %v996_v2, %v873_v54  ;;  %v343_v61 = vmul.f32 %v996_v2, %v874_v55  ;;  %v362_v0 = vadd.f32 %v1004_v8, %v326_v52  ;;  %v363_v1 = vadd.f32 %v1004_v8, %v327_v53 }
  0x1c   : > { %829 = vmatmul.msk.bf16.vlgmr.msra.gmra.mxu3 %vm441_vm1, %v436_v49  ;;  %v350_v62 = vmul.f32 %v996_v2, %v889_v58  ;;  %v351_v63 = vmul.f32 %v996_v2, %v890_v59  ;;  %v370_v3 = vadd.f32 %v1004_v8, %v334_v56  ;;  %v371_v4 = vadd.f32 %v1004_v8, %v335_v57  ;;  %v901_v56 = vld [vmem:[%s991_s29 + $0x18] sm:$0xff]  }
  0x1d   : > { %v378_v5 = vadd.f32 %v1004_v8, %v342_v60  ;;  %v379_v6 = vadd.f32 %v1004_v8, %v343_v61  ;;  %v394_v10 = vmax.f32 %v362_v0, 0.0  ;;  %v395_v11 = vmax.f32 %v363_v1, 0.0  ;;  %v905_v59 = vld [vmem:[%s991_s29 + $0x38] sm:$0xff]  }
  0x1e   : > { %v386_v7 = vadd.f32 %v1004_v8, %v350_v62  ;;  %v387_v9 = vadd.f32 %v1004_v8, %v351_v63  ;;  %v402_v12 = vmax.f32 %v370_v3, 0.0  ;;  %v403_v13 = vmax.f32 %v371_v4, 0.0  ;;  %v909_v60 = vld [vmem:[%s991_s29 + $0x58] sm:$0xff]  }
  0x1f   : > { %v410_v16 = vmax.f32 %v378_v5, 0.0  ;;  %v411_v17 = vmax.f32 %v379_v6, 0.0  ;;  %v845_v22 = vunpack.c.l.bf16 %v900_v14  ;;  %v846_v23 = vunpack.c.h.bf16 %v900_v14  ;;  %v913_v61 = vld [vmem:[%s991_s29 + $0x78] sm:$0xff]  }
  0x20   : > { %v418_v18 = vmax.f32 %v386_v7, 0.0  ;;  %v419_v19 = vmax.f32 %v387_v9, 0.0  ;;  %v861_v24 = vunpack.c.l.bf16 %v904_v15  ;;  %v862_v25 = vunpack.c.h.bf16 %v904_v15 }
  0x21   : > { %v425_v26 = vpack.c.bf16 %v395_v11, %v394_v10  ;;  %v429_v27 = vpack.c.bf16 %v403_v13, %v402_v12  ;;  %v877_v28 = vunpack.c.l.bf16 %v908_v20  ;;  %v878_v29 = vunpack.c.h.bf16 %v908_v20 }
  0x22   : > { %v433_v30 = vpack.c.bf16 %v411_v17, %v410_v16  ;;  %v437_v31 = vpack.c.bf16 %v419_v19, %v418_v18  ;;  %v893_v32 = vunpack.c.l.bf16 %v912_v21  ;;  %v894_v33 = vunpack.c.h.bf16 %v912_v21 }
  0x23   : > { %v328_v34 = vmul.f32 %v996_v2, %v845_v22  ;;  %v329_v35 = vmul.f32 %v996_v2, %v846_v23  ;;  %v336_v36 = vmul.f32 %v996_v2, %v861_v24  ;;  %v337_v37 = vmul.f32 %v996_v2, %v862_v25 }
  0x24   : > { %v344_v38 = vmul.f32 %v996_v2, %v877_v28  ;;  %v345_v39 = vmul.f32 %v996_v2, %v878_v29  ;;  %v352_v40 = vmul.f32 %v996_v2, %v893_v32  ;;  %v353_v41 = vmul.f32 %v996_v2, %v894_v33 }
  0x25   : > { %v364_v42 = vadd.f32 %v1004_v8, %v328_v34  ;;  %v365_v43 = vadd.f32 %v1004_v8, %v329_v35  ;;  %v372_v44 = vadd.f32 %v1004_v8, %v336_v36  ;;  %v373_v45 = vadd.f32 %v1004_v8, %v337_v37 }
  0x26   : > { %v380_v46 = vadd.f32 %v1004_v8, %v344_v38  ;;  %v381_v47 = vadd.f32 %v1004_v8, %v345_v39  ;;  %v388_v48 = vadd.f32 %v1004_v8, %v352_v40  ;;  %v389_v49 = vadd.f32 %v1004_v8, %v353_v41  ;;  %v1107_v39 = vld [vmem:[%s1252_s5] ss:$0 sm:$0xff] }
  0x27   : > { %v396_v50 = vmax.f32 %v364_v42, 0.0  ;;  %v397_v51 = vmax.f32 %v365_v43, 0.0  ;;  %v404_v52 = vmax.f32 %v372_v44, 0.0  ;;  %v405_v53 = vmax.f32 %v373_v45, 0.0 }
  0x28   : > { %v412_v54 = vmax.f32 %v380_v46, 0.0  ;;  %v413_v55 = vmax.f32 %v381_v47, 0.0  ;;  %v420_v57 = vmax.f32 %v388_v48, 0.0  ;;  %v421_v58 = vmax.f32 %v389_v49, 0.0 }
  0x29   : > { %818 = vmatmul.msk.bf16.gmra.mxu0 %vm441_vm1, %v425_v26  ;;  %v426_v62 = vpack.c.bf16 %v397_v51, %v396_v50  ;;  %v430_v63 = vpack.c.bf16 %v405_v53, %v404_v52  ;;  %v849_v0 = vunpack.c.l.bf16 %v901_v56  ;;  %v850_v1 = vunpack.c.h.bf16 %v901_v56 }
  0x2a   : > { %822 = vmatmul.msk.bf16.gmra.mxu1 %vm441_vm1, %v429_v27  ;;  %v434_v3 = vpack.c.bf16 %v413_v55, %v412_v54  ;;  %v865_v4 = vunpack.c.l.bf16 %v905_v59  ;;  %v866_v5 = vunpack.c.h.bf16 %v905_v59  ;;  %v881_v6 = vunpack.c.l.bf16 %v909_v60 }
  0x2b   : > { %826 = vmatmul.msk.bf16.gmra.mxu2 %vm441_vm1, %v433_v30  ;;  %v438_v7 = vpack.c.bf16 %v421_v58, %v420_v57  ;;  %v882_v9 = vunpack.c.h.bf16 %v909_v60  ;;  %v897_v10 = vunpack.c.l.bf16 %v913_v61  ;;  %v898_v11 = vunpack.c.h.bf16 %v913_v61 }
  0x2c   : > { %830 = vmatmul.msk.bf16.gmra.mxu3 %vm441_vm1, %v437_v31  ;;  %v330_v12 = vmul.f32 %v996_v2, %v849_v0  ;;  %v331_v13 = vmul.f32 %v996_v2, %v850_v1  ;;  %v338_v14 = vmul.f32 %v996_v2, %v865_v4  ;;  %v339_v15 = vmul.f32 %v996_v2, %v866_v5 }
  0x2d   : > { %v346_v16 = vmul.f32 %v996_v2, %v881_v6  ;;  %v347_v17 = vmul.f32 %v996_v2, %v882_v9  ;;  %v354_v18 = vmul.f32 %v996_v2, %v897_v10  ;;  %v355_v19 = vmul.f32 %v996_v2, %v898_v11 }
  0x2e   : > { %v366_v20 = vadd.f32 %v1004_v8, %v330_v12  ;;  %v367_v21 = vadd.f32 %v1004_v8, %v331_v13  ;;  %v374_v22 = vadd.f32 %v1004_v8, %v338_v14  ;;  %v375_v23 = vadd.f32 %v1004_v8, %v339_v15 }
  0x2f   : > { %v382_v24 = vadd.f32 %v1004_v8, %v346_v16  ;;  %v383_v25 = vadd.f32 %v1004_v8, %v347_v17  ;;  %v390_v26 = vadd.f32 %v1004_v8, %v354_v18  ;;  %v391_v27 = vadd.f32 %v1004_v8, %v355_v19  ;;  %v1102_v8 = vld [vmem:[%s1251_s4] ss:$0 sm:$0xff] }
  0x30   : > { %v398_v28 = vmax.f32 %v366_v20, 0.0  ;;  %v399_v29 = vmax.f32 %v367_v21, 0.0  ;;  %v406_v30 = vmax.f32 %v374_v22, 0.0  ;;  %v407_v2 = vmax.f32 %v375_v23, 0.0 }
  0x31   : > { %v414_v31 = vmax.f32 %v382_v24, 0.0  ;;  %v415_v32 = vmax.f32 %v383_v25, 0.0  ;;  %v422_v33 = vmax.f32 %v390_v26, 0.0  ;;  %v423_v34 = vmax.f32 %v391_v27, 0.0 }
  0x32   : > { %v427_v35 = vpack.c.bf16 %v399_v29, %v398_v28  ;;  %v431_v36 = vpack.c.bf16 %v407_v2, %v406_v30 }
  0x33   : > { %v435_v37 = vpack.c.bf16 %v415_v32, %v414_v31  ;;  %v439_v38 = vpack.c.bf16 %v423_v34, %v422_v33 }
  0x39   : > { %819 = vmatmul.msk.bf16.gmra.mxu0 %vm441_vm1, %v426_v62 }
  0x3a   : > { %823 = vmatmul.msk.bf16.gmra.mxu1 %vm441_vm1, %v430_v63 }
  0x3b   : > { %827 = vmatmul.msk.bf16.gmra.mxu2 %vm441_vm1, %v434_v3 }
  0x3c   : > { %831 = vmatmul.msk.bf16.gmra.mxu3 %vm441_vm1, %v438_v7 }
  0x49   : > { %820 = vmatmul.msk.bf16.gmra.mxu0 %vm441_vm1, %v427_v35 }
  0x4a   : > { %824 = vmatmul.msk.bf16.gmra.mxu1 %vm441_vm1, %v431_v36 }
  0x4b   : > { %828 = vmatmul.msk.bf16.gmra.mxu2 %vm441_vm1, %v435_v37 }
  0x4c   : > { %832 = vmatmul.msk.bf16.gmra.mxu3 %vm441_vm1, %v439_v38 }
  0x96   : > { %v503_v40 = vpop.f32.mrf.mxu0 }
  0x97   : > { %v523_v41 = vpop.f32.mrf.mxu1  ;;  %v587_v42 = vmul.f32 %v1102_v8, %v503_v40 }
  0x98   : > { %v595_v43 = vmul.f32 %v1102_v8, %v523_v41 }
  0x99   : > { %v623_v44 = vadd.f32 %v1107_v39, %v587_v42 }
  0x9a   : > { %v631_v45 = vadd.f32 %v1107_v39, %v595_v43 }
  0x9b   : > { %v655_v46 = vmax.f32 %v623_v44, 0.0 }
  0x9c   : > { %v663_v47 = vmax.f32 %v631_v45, 0.0 }
  0x9d   : > { %v687_v48 = vpack.c.bf16 %v655_v46, %v655_v46 }
  0x9e   : > { %v695_v49 = vpack.c.bf16 %v663_v47, %v663_v47  ;;  %v543_v50 = vpop.f32.mrf.mxu2  ;;  %v505_v54 = vpop.f32.mrf.mxu0 }
  0x9f   : > { %v563_v51 = vpop.f32.mrf.mxu3  ;;  %v603_v52 = vmul.f32 %v1102_v8, %v543_v50  ;;  %v525_v55 = vpop.f32.mrf.mxu1  ;;  %720 = vst.msk [vmem:[%s1118_s16] sm:$0xf] %vm719_vm2, %v687_v48  ;;  %v588_v56 = vmul.f32 %v1102_v8, %v505_v54 }
  0xa0   : > { %v611_v53 = vmul.f32 %v1102_v8, %v563_v51  ;;  %v596_v57 = vmul.f32 %v1102_v8, %v525_v55  ;;  %728 = vst.msk [vmem:[%s1118_s16 + $0x20] sm:$0xf] %vm719_vm2, %v695_v49 }
  0xa1   : > { %v639_v58 = vadd.f32 %v1107_v39, %v603_v52  ;;  %v624_v60 = vadd.f32 %v1107_v39, %v588_v56 }
  0xa2   : > { %v647_v59 = vadd.f32 %v1107_v39, %v611_v53  ;;  %v632_v61 = vadd.f32 %v1107_v39, %v596_v57 }
  0xa3   : > { %v671_v62 = vmax.f32 %v639_v58, 0.0  ;;  %v656_v0 = vmax.f32 %v624_v60, 0.0 }
  0xa4   : > { %v679_v63 = vmax.f32 %v647_v59, 0.0  ;;  %v664_v1 = vmax.f32 %v632_v61, 0.0 }
  0xa5   : > { %v703_v3 = vpack.c.bf16 %v671_v62, %v671_v62  ;;  %v688_v5 = vpack.c.bf16 %v656_v0, %v656_v0 }
  0xa6   : > { %v711_v4 = vpack.c.bf16 %v679_v63, %v679_v63  ;;  %v696_v6 = vpack.c.bf16 %v664_v1, %v664_v1  ;;  %v545_v7 = vpop.f32.mrf.mxu2  ;;  %v508_v12 = vpop.f32.mrf.mxu0 }
  0xa7   : > { %v565_v9 = vpop.f32.mrf.mxu3  ;;  %736 = vst.msk [vmem:[%s1118_s16 + $0x40] sm:$0xf] %vm719_vm2, %v703_v3  ;;  %v604_v10 = vmul.f32 %v1102_v8, %v545_v7  ;;  %v528_v13 = vpop.f32.mrf.mxu1  ;;  %v589_v14 = vmul.f32 %v1102_v8, %v508_v12 }
  0xa8   : > { %v612_v11 = vmul.f32 %v1102_v8, %v565_v9  ;;  %744 = vst.msk [vmem:[%s1118_s16 + $0x60] sm:$0xf] %vm719_vm2, %v711_v4  ;;  %v597_v15 = vmul.f32 %v1102_v8, %v528_v13 }
  0xa9   : > { %721 = vst.msk [vmem:[%s1118_s16 + $0x4] sm:$0xf] %vm719_vm2, %v688_v5  ;;  %v640_v16 = vadd.f32 %v1107_v39, %v604_v10  ;;  %v625_v18 = vadd.f32 %v1107_v39, %v589_v14 }
  0xaa   : > { %v648_v17 = vadd.f32 %v1107_v39, %v612_v11  ;;  %729 = vst.msk [vmem:[%s1118_s16 + $0x24] sm:$0xf] %vm719_vm2, %v696_v6  ;;  %v633_v19 = vadd.f32 %v1107_v39, %v597_v15 }
  0xab   : > { %v672_v20 = vmax.f32 %v640_v16, 0.0  ;;  %v657_v22 = vmax.f32 %v625_v18, 0.0 }
  0xac   : > { %v680_v21 = vmax.f32 %v648_v17, 0.0  ;;  %v665_v23 = vmax.f32 %v633_v19, 0.0 }
  0xad   : > { %v704_v24 = vpack.c.bf16 %v672_v20, %v672_v20  ;;  %v689_v26 = vpack.c.bf16 %v657_v22, %v657_v22 }
  0xae   : > { %v712_v25 = vpack.c.bf16 %v680_v21, %v680_v21  ;;  %v697_v27 = vpack.c.bf16 %v665_v23, %v665_v23  ;;  %v548_v28 = vpop.f32.mrf.mxu2  ;;  %v510_v31 = vpop.f32.mrf.mxu0 }
  0xaf   : > { %v568_v29 = vpop.f32.mrf.mxu3  ;;  %737 = vst.msk [vmem:[%s1118_s16 + $0x44] sm:$0xf] %vm719_vm2, %v704_v24  ;;  %v605_v30 = vmul.f32 %v1102_v8, %v548_v28  ;;  %v530_v32 = vpop.f32.mrf.mxu1  ;;  %v590_v33 = vmul.f32 %v1102_v8, %v510_v31 }
  0xb0   : > { %v613_v2 = vmul.f32 %v1102_v8, %v568_v29  ;;  %745 = vst.msk [vmem:[%s1118_s16 + $0x64] sm:$0xf] %vm719_vm2, %v712_v25  ;;  %v598_v34 = vmul.f32 %v1102_v8, %v530_v32 }
  0xb1   : > { %722 = vst.msk [vmem:[%s1118_s16 + $0x8] sm:$0xf] %vm719_vm2, %v689_v26  ;;  %v641_v35 = vadd.f32 %v1107_v39, %v605_v30  ;;  %v626_v37 = vadd.f32 %v1107_v39, %v590_v33 }
  0xb2   : > { %v649_v36 = vadd.f32 %v1107_v39, %v613_v2  ;;  %730 = vst.msk [vmem:[%s1118_s16 + $0x28] sm:$0xf] %vm719_vm2, %v697_v27  ;;  %v634_v38 = vadd.f32 %v1107_v39, %v598_v34 }
  0xb3   : > { %v673_v40 = vmax.f32 %v641_v35, 0.0  ;;  %v658_v42 = vmax.f32 %v626_v37, 0.0 }
  0xb4   : > { %v681_v41 = vmax.f32 %v649_v36, 0.0  ;;  %v666_v43 = vmax.f32 %v634_v38, 0.0 }
  0xb5   : > { %v705_v44 = vpack.c.bf16 %v673_v40, %v673_v40  ;;  %v690_v46 = vpack.c.bf16 %v658_v42, %v658_v42 }
  0xb6   : > { %v713_v45 = vpack.c.bf16 %v681_v41, %v681_v41  ;;  %v698_v47 = vpack.c.bf16 %v666_v43, %v666_v43  ;;  %v550_v48 = vpop.f32.mrf.mxu2  ;;  %v513_v52 = vpop.f32.mrf.mxu0 }
  0xb7   : > { %v570_v49 = vpop.f32.mrf.mxu3  ;;  %738 = vst.msk [vmem:[%s1118_s16 + $0x48] sm:$0xf] %vm719_vm2, %v705_v44  ;;  %v606_v50 = vmul.f32 %v1102_v8, %v550_v48  ;;  %v533_v53 = vpop.f32.mrf.mxu1  ;;  %v591_v54 = vmul.f32 %v1102_v8, %v513_v52 }
  0xb8   : > { %v614_v51 = vmul.f32 %v1102_v8, %v570_v49  ;;  %746 = vst.msk [vmem:[%s1118_s16 + $0x68] sm:$0xf] %vm719_vm2, %v713_v45  ;;  %v599_v55 = vmul.f32 %v1102_v8, %v533_v53 }
  0xb9   : > { %723 = vst.msk [vmem:[%s1118_s16 + $0xc] sm:$0xf] %vm719_vm2, %v690_v46  ;;  %v642_v56 = vadd.f32 %v1107_v39, %v606_v50  ;;  %v627_v58 = vadd.f32 %v1107_v39, %v591_v54 }
  0xba   : > { %v650_v57 = vadd.f32 %v1107_v39, %v614_v51  ;;  %731 = vst.msk [vmem:[%s1118_s16 + $0x2c] sm:$0xf] %vm719_vm2, %v698_v47  ;;  %v635_v59 = vadd.f32 %v1107_v39, %v599_v55 }
  0xbb   : > { %v674_v60 = vmax.f32 %v642_v56, 0.0  ;;  %v659_v62 = vmax.f32 %v627_v58, 0.0 }
  0xbc   : > { %v682_v61 = vmax.f32 %v650_v57, 0.0  ;;  %v667_v63 = vmax.f32 %v635_v59, 0.0 }
  0xbd   : > { %v706_v0 = vpack.c.bf16 %v674_v60, %v674_v60  ;;  %v691_v3 = vpack.c.bf16 %v659_v62, %v659_v62 }
  0xbe   : > { %v714_v1 = vpack.c.bf16 %v682_v61, %v682_v61  ;;  %v699_v4 = vpack.c.bf16 %v667_v63, %v667_v63  ;;  %v553_v5 = vpop.f32.mrf.mxu2  ;;  %v515_v10 = vpop.f32.mrf.mxu0 }
  0xbf   : > { %v573_v6 = vpop.f32.mrf.mxu3  ;;  %739 = vst.msk [vmem:[%s1118_s16 + $0x4c] sm:$0xf] %vm719_vm2, %v706_v0  ;;  %v607_v7 = vmul.f32 %v1102_v8, %v553_v5  ;;  %v535_v11 = vpop.f32.mrf.mxu1  ;;  %v592_v12 = vmul.f32 %v1102_v8, %v515_v10 }
  0xc0   : > { %v615_v9 = vmul.f32 %v1102_v8, %v573_v6  ;;  %747 = vst.msk [vmem:[%s1118_s16 + $0x6c] sm:$0xf] %vm719_vm2, %v714_v1  ;;  %v600_v13 = vmul.f32 %v1102_v8, %v535_v11 }
  0xc1   : > { %724 = vst.msk [vmem:[%s1118_s16 + $0x10] sm:$0xf] %vm719_vm2, %v691_v3  ;;  %v643_v14 = vadd.f32 %v1107_v39, %v607_v7  ;;  %v628_v16 = vadd.f32 %v1107_v39, %v592_v12 }
  0xc2   : > { %v651_v15 = vadd.f32 %v1107_v39, %v615_v9  ;;  %732 = vst.msk [vmem:[%s1118_s16 + $0x30] sm:$0xf] %vm719_vm2, %v699_v4  ;;  %v636_v17 = vadd.f32 %v1107_v39, %v600_v13 }
  0xc3   : > { %v675_v18 = vmax.f32 %v643_v14, 0.0  ;;  %v660_v20 = vmax.f32 %v628_v16, 0.0 }
  0xc4   : > { %v683_v19 = vmax.f32 %v651_v15, 0.0  ;;  %v668_v21 = vmax.f32 %v636_v17, 0.0 }
  0xc5   : > { %v707_v22 = vpack.c.bf16 %v675_v18, %v675_v18  ;;  %v692_v24 = vpack.c.bf16 %v660_v20, %v660_v20 }
  0xc6   : > { %v715_v23 = vpack.c.bf16 %v683_v19, %v683_v19  ;;  %v700_v25 = vpack.c.bf16 %v668_v21, %v668_v21  ;;  %v555_v26 = vpop.f32.mrf.mxu2  ;;  %v518_v30 = vpop.f32.mrf.mxu0 }
  0xc7   : > { %v575_v27 = vpop.f32.mrf.mxu3  ;;  %740 = vst.msk [vmem:[%s1118_s16 + $0x50] sm:$0xf] %vm719_vm2, %v707_v22  ;;  %v608_v28 = vmul.f32 %v1102_v8, %v555_v26  ;;  %v538_v2 = vpop.f32.mrf.mxu1  ;;  %v593_v31 = vmul.f32 %v1102_v8, %v518_v30 }
  0xc8   : > { %v616_v29 = vmul.f32 %v1102_v8, %v575_v27  ;;  %748 = vst.msk [vmem:[%s1118_s16 + $0x70] sm:$0xf] %vm719_vm2, %v715_v23  ;;  %v601_v32 = vmul.f32 %v1102_v8, %v538_v2 }
  0xc9   : > { %725 = vst.msk [vmem:[%s1118_s16 + $0x14] sm:$0xf] %vm719_vm2, %v692_v24  ;;  %v644_v33 = vadd.f32 %v1107_v39, %v608_v28  ;;  %v629_v35 = vadd.f32 %v1107_v39, %v593_v31 }
  0xca   : > { %v652_v34 = vadd.f32 %v1107_v39, %v616_v29  ;;  %733 = vst.msk [vmem:[%s1118_s16 + $0x34] sm:$0xf] %vm719_vm2, %v700_v25  ;;  %v637_v36 = vadd.f32 %v1107_v39, %v601_v32 }
  0xcb   : > { %v676_v37 = vmax.f32 %v644_v33, 0.0  ;;  %v661_v40 = vmax.f32 %v629_v35, 0.0 }
  0xcc   : > { %v684_v38 = vmax.f32 %v652_v34, 0.0  ;;  %v669_v41 = vmax.f32 %v637_v36, 0.0 }
  0xcd   : > { %v708_v42 = vpack.c.bf16 %v676_v37, %v676_v37  ;;  %v693_v44 = vpack.c.bf16 %v661_v40, %v661_v40 }
  0xce   : > { %v716_v43 = vpack.c.bf16 %v684_v38, %v684_v38  ;;  %v701_v45 = vpack.c.bf16 %v669_v41, %v669_v41  ;;  %v558_v46 = vpop.f32.mrf.mxu2  ;;  %v520_v50 = vpop.f32.mrf.mxu0 }
  0xcf   : > { %v578_v47 = vpop.f32.mrf.mxu3  ;;  %741 = vst.msk [vmem:[%s1118_s16 + $0x54] sm:$0xf] %vm719_vm2, %v708_v42  ;;  %v609_v48 = vmul.f32 %v1102_v8, %v558_v46  ;;  %v540_v51 = vpop.f32.mrf.mxu1  ;;  %v594_v52 = vmul.f32 %v1102_v8, %v520_v50 }
  0xd0   : > { %v617_v49 = vmul.f32 %v1102_v8, %v578_v47  ;;  %749 = vst.msk [vmem:[%s1118_s16 + $0x74] sm:$0xf] %vm719_vm2, %v716_v43  ;;  %v602_v53 = vmul.f32 %v1102_v8, %v540_v51 }
  0xd1   : > { %726 = vst.msk [vmem:[%s1118_s16 + $0x18] sm:$0xf] %vm719_vm2, %v693_v44  ;;  %v645_v54 = vadd.f32 %v1107_v39, %v609_v48  ;;  %v630_v56 = vadd.f32 %v1107_v39, %v594_v52 }
  0xd2   : > { %v653_v55 = vadd.f32 %v1107_v39, %v617_v49  ;;  %734 = vst.msk [vmem:[%s1118_s16 + $0x38] sm:$0xf] %vm719_vm2, %v701_v45  ;;  %v638_v57 = vadd.f32 %v1107_v39, %v602_v53 }
  0xd3   : > { %v677_v58 = vmax.f32 %v645_v54, 0.0  ;;  %v662_v60 = vmax.f32 %v630_v56, 0.0 }
  0xd4   : > { %v685_v59 = vmax.f32 %v653_v55, 0.0  ;;  %v670_v61 = vmax.f32 %v638_v57, 0.0 }
  0xd5   : > { %v709_v62 = vpack.c.bf16 %v677_v58, %v677_v58  ;;  %v694_v0 = vpack.c.bf16 %v662_v60, %v662_v60 }
  0xd6   : > { %v717_v63 = vpack.c.bf16 %v685_v59, %v685_v59  ;;  %v702_v1 = vpack.c.bf16 %v670_v61, %v670_v61  ;;  %v560_v3 = vpop.f32.mrf.mxu2 }
  0xd7   : > { %v580_v4 = vpop.f32.mrf.mxu3  ;;  %742 = vst.msk [vmem:[%s1118_s16 + $0x58] sm:$0xf] %vm719_vm2, %v709_v62  ;;  %v610_v5 = vmul.f32 %v1102_v8, %v560_v3 }
  0xd8   : > { %v618_v6 = vmul.f32 %v1102_v8, %v580_v4  ;;  %750 = vst.msk [vmem:[%s1118_s16 + $0x78] sm:$0xf] %vm719_vm2, %v717_v63 }
  0xd9   : > { %727 = vst.msk [vmem:[%s1118_s16 + $0x1c] sm:$0xf] %vm719_vm2, %v694_v0  ;;  %v646_v7 = vadd.f32 %v1107_v39, %v610_v5 }
  0xda   : > { %v654_v9 = vadd.f32 %v1107_v39, %v618_v6  ;;  %735 = vst.msk [vmem:[%s1118_s16 + $0x3c] sm:$0xf] %vm719_vm2, %v702_v1 }
  0xdb   : > { %v678_v10 = vmax.f32 %v646_v7, 0.0 }
  0xdc   : > { %v686_v11 = vmax.f32 %v654_v9, 0.0 }
  0xdd   : > { %v710_v12 = vpack.c.bf16 %v678_v10, %v678_v10 }
  0xde   : > { %v718_v13 = vpack.c.bf16 %v686_v11, %v686_v11 }
  0xdf   : > { %743 = vst.msk [vmem:[%s1118_s16 + $0x5c] sm:$0xf] %vm719_vm2, %v710_v12 }
  0xe0   : > { %751 = vst.msk [vmem:[%s1118_s16 + $0x7c] sm:$0xf] %vm719_vm2, %v718_v13 }
  0xe1 PF: > { %s16_s21 = sadd.s32 1, %s935_s21  }
  0xe2   : > { %p13_p4 = scmp.ge.s32.totalorder %s16_s21, 4  }
  0xe4   :  { %15 = sbr.rel (!%p13_p4) target bundleno = 1 (0x1), region = 74 }

// kernel: _lambda_.17
= control target key start
LH: loop header
LB: loop body
LE: loop exit
PB: predicated region body
PF: predicated region fallthrough
CT: control target
= control target key end

     0   :  { %s1113_s18 = smov 0   ;;  %s1345_s0 = inlined_call_operand.vmem [shape: bf16[512,72], index: 0, kind: input, shape index: {}]   ;;  %s1346_s1 = inlined_call_operand.vmem [shape: bf16[72,8], index: 1, kind: input, shape index: {}]   ;;  %s1347_s2 = inlined_call_operand.vmem [shape: f32[1,8], index: 2, kind: input, shape index: {}]   ;;  %s1348_s3 = inlined_call_operand.vmem [shape: f32[1,8], index: 3, kind: input, shape index: {}]   ;;  %s1349_s4 = inlined_call_operand.vmem [shape: bf16[512,8], index: 4, kind: input, shape index: {}]   ;;  %s1350_s5 = inlined_call_operand.vmem [shape: bf16[512,8], index: 5, kind: output, shape index: {}]  }
   0x1 LB: > { %s842_s19 = sadd.s32 4294967295, %s1081_s18   ;;  %p846_p0 = scmp.ge.s32.totalorder %s1081_s18, 1  ;;  %s1081_s18 = sphi %s1113_s18, %s15_s18  }
   0x2   : > { %p199_p1 = scmp.lt.s32.totalorder %s1081_s18, 3 }
   0x4   : > { %p200_p2 = pnand %p846_p0, %p199_p1 }
   0x5   : > { %s847_s22 = sshll.u32 (!%p200_p2), %s842_s19, 5 }
   0x6   : > { %203 = sbr.rel (%p200_p2) target bundleno = 235 (0xeb), region = 40  ;;  %p233_p3 = scmp.lt.s32.totalorder (!%p200_p2), %s847_s22, 63 }
   0xb   : > { %v291_v0 = vld [vmem:[%s1346_s1 + $0x20] sm:$0xf]  ;;  %vm448_vm0 = vcmask 1043456   ;;  %v970_v4 = vld [vmem:[%s1346_s1 + $0x18] sm:$0xff]  ;;  %v969_v5 = vld [vmem:[%s1346_s1 + $0x10] sm:$0xff]  ;;  %s1352_s22 = smov (!%p233_p3, %s847_s22), 63 }
   0xc   : > { %v389_v1 = vunpack.c.l.b16 %v291_v0  ;;  %v968_v6 = vld [vmem:[%s1346_s1 + $0x8] sm:$0xff]  ;;  %s1133_s29 = sshll.u32 %s1352_s22, 2  ;;  %v967_v7 = vld [vmem:[%s1346_s1] sm:$0xff]  ;;  %vm399_vm1 = vcmask 588800   ;;  %vm741_vm2 = vcmask 60416  }
   0xd   : > { %s1142_s9 = scalar_lea.vmem %s1345_s0, %s1133_s29  ;;  %s1180_s12 = scalar_lea.vmem %s1349_s4, %s1133_s29  ;;  %v1185_v24 = vld [vmem:[%s1347_s2] ss:$0 sm:$0xff] }
   0xe   : > { %v394_v2 = vpack.c.b16 %v389_v1, %v389_v1  ;;  %v951_v8 = vld [vmem:[%s1142_s9] sm:$0xff]  ;;  %v952_v12 = vld [vmem:[%s1142_s9 + $0x8] sm:$0xff]  ;;  %v953_v16 = vld [vmem:[%s1142_s9 + $0x10] sm:$0xff]  ;;  %s1204_s20 = scalar_lea.vmem %s1350_s5, %s1133_s29 }
   0xf   : > { %v955_v9 = vld [vmem:[%s1142_s9 + $0x20] sm:$0xff]  ;;  %v956_v13 = vld [vmem:[%s1142_s9 + $0x28] sm:$0xff]  ;;  %v957_v17 = vld [vmem:[%s1142_s9 + $0x30] sm:$0xff] }
  0x10   : > { %v450_v3 = vsel %vm448_vm0, %v394_v2, 0  ;;  %v959_v10 = vld [vmem:[%s1142_s9 + $0x40] sm:$0xff]  ;;  %v960_v14 = vld [vmem:[%s1142_s9 + $0x48] sm:$0xff]  ;;  %v961_v18 = vld [vmem:[%s1142_s9 + $0x50] sm:$0xff] }
  0x11   : > { %455 = vmatpush.bf16.msra.mxu0 %v450_v3  ;;  %1050 = vmatpush.bf16.msra.mxu1 %v450_v3  ;;  %v963_v11 = vld [vmem:[%s1142_s9 + $0x60] sm:$0xff]  ;;  %v964_v15 = vld [vmem:[%s1142_s9 + $0x68] sm:$0xff]  ;;  %v965_v19 = vld [vmem:[%s1142_s9 + $0x70] sm:$0xff] }
  0x12   : > { %1051 = vmatpush.bf16.msra.mxu2 %v450_v3  ;;  %1052 = vmatpush.bf16.msra.mxu3 %v450_v3  ;;  %v954_v20 = vld [vmem:[%s1142_s9 + $0x18] sm:$0xff]  ;;  %v972_v25 = vld [vmem:[%s1180_s12] sm:$0xff]   ;;  %v1035_v0 = vld [vmem:[%s1180_s12 + $0x8] sm:$0xff]  }
  0x13   : > { %v958_v21 = vld [vmem:[%s1142_s9 + $0x38] sm:$0xff]  ;;  %v1038_v26 = vld [vmem:[%s1180_s12 + $0x20] sm:$0xff]   ;;  %v973_v31 = vunpack.c.l.bf16 %v972_v25  ;;  %v974_v51 = vunpack.c.h.bf16 %v972_v25  ;;  %v1039_v1 = vld [vmem:[%s1180_s12 + $0x28] sm:$0xff]  }
  0x14   : > { %v962_v22 = vld [vmem:[%s1142_s9 + $0x58] sm:$0xff]  ;;  %v1192_v27 = vld [vmem:[%s1348_s3] ss:$0 sm:$0xff]  ;;  %v989_v33 = vunpack.c.l.bf16 %v1038_v26  ;;  %v990_v53 = vunpack.c.h.bf16 %v1038_v26  ;;  %v1043_v25 = vld [vmem:[%s1180_s12 + $0x48] sm:$0xff]  }
  0x15   : > { %456 = vmatpush.bf16.msra.mxu0 %v970_v4  ;;  %1053 = vmatpush.bf16.msra.mxu1 %v970_v4  ;;  %v966_v23 = vld [vmem:[%s1142_s9 + $0x78] sm:$0xff]  ;;  %v1042_v38 = vld [vmem:[%s1180_s12 + $0x40] sm:$0xff]   ;;  %v1047_v26 = vld [vmem:[%s1180_s12 + $0x68] sm:$0xff]  }
  0x16   : > { %1054 = vmatpush.bf16.msra.mxu2 %v970_v4  ;;  %1055 = vmatpush.bf16.msra.mxu3 %v970_v4  ;;  %v1046_v39 = vld [vmem:[%s1180_s12 + $0x60] sm:$0xff]   ;;  %v1005_v45 = vunpack.c.l.bf16 %v1042_v38 }
  0x17   : > { %v1021_v47 = vunpack.c.l.bf16 %v1046_v39 }
  0x19   : > { %457 = vmatpush.bf16.msra.mxu0 %v969_v5  ;;  %1056 = vmatpush.bf16.msra.mxu1 %v969_v5 }
  0x1a   : > { %1057 = vmatpush.bf16.msra.mxu2 %v969_v5  ;;  %1058 = vmatpush.bf16.msra.mxu3 %v969_v5 }
  0x1d   : > { %458 = vmatpush.bf16.msra.mxu0 %v968_v6  ;;  %1059 = vmatpush.bf16.msra.mxu1 %v968_v6 }
  0x1e   : > { %1060 = vmatpush.bf16.msra.mxu2 %v968_v6  ;;  %1061 = vmatpush.bf16.msra.mxu3 %v968_v6 }
  0x21   : > { %459 = vmatpush.bf16.msra.mxu0 %v967_v7  ;;  %1062 = vmatpush.bf16.msra.mxu1 %v967_v7 }
  0x22   : > { %1063 = vmatpush.bf16.msra.mxu2 %v967_v7  ;;  %1064 = vmatpush.bf16.msra.mxu3 %v967_v7  ;;  %v1006_v7 = vunpack.c.h.bf16 %v1042_v38 }
  0x24   : > { %933 = vmatmul.msk.bf16.vlgmr.msra.gmra.mxu0 %vm399_vm1, %v951_v8  ;;  %937 = vmatmul.msk.bf16.vlgmr.msra.gmra.mxu1 %vm399_vm1, %v955_v9  ;;  %v1022_v9 = vunpack.c.h.bf16 %v1046_v39 }
  0x25   : > { %941 = vmatmul.msk.bf16.vlgmr.msra.gmra.mxu2 %vm399_vm1, %v959_v10  ;;  %945 = vmatmul.msk.bf16.vlgmr.msra.gmra.mxu3 %vm399_vm1, %v963_v11 }
  0x34   : > { %934 = vmatmul.msk.bf16.gmra.mxu0 %vm399_vm1, %v952_v12  ;;  %938 = vmatmul.msk.bf16.gmra.mxu1 %vm399_vm1, %v956_v13  ;;  %v977_v13 = vunpack.c.l.bf16 %v1035_v0 }
  0x35   : > { %942 = vmatmul.msk.bf16.gmra.mxu2 %vm399_vm1, %v960_v14  ;;  %946 = vmatmul.msk.bf16.gmra.mxu3 %vm399_vm1, %v964_v15  ;;  %v993_v15 = vunpack.c.l.bf16 %v1039_v1 }
  0x44   : > { %935 = vmatmul.msk.bf16.gmra.mxu0 %vm399_vm1, %v953_v16  ;;  %939 = vmatmul.msk.bf16.gmra.mxu1 %vm399_vm1, %v957_v17 }
  0x45   : > { %943 = vmatmul.msk.bf16.gmra.mxu2 %vm399_vm1, %v961_v18  ;;  %947 = vmatmul.msk.bf16.gmra.mxu3 %vm399_vm1, %v965_v19 }
  0x54   : > { %936 = vmatmul.msk.bf16.gmra.mxu0 %vm399_vm1, %v954_v20  ;;  %940 = vmatmul.msk.bf16.gmra.mxu1 %vm399_vm1, %v958_v21 }
  0x55   : > { %944 = vmatmul.msk.bf16.gmra.mxu2 %vm399_vm1, %v962_v22  ;;  %948 = vmatmul.msk.bf16.gmra.mxu3 %vm399_vm1, %v966_v23 }
  0xa1   : > { %v461_v28 = vpop.f32.mrf.mxu0  ;;  %v481_v29 = vpop.f32.mrf.mxu1 }
  0xa2   : > { %v545_v30 = vmul.f32 %v1185_v24, %v461_v28  ;;  %v553_v32 = vmul.f32 %v1185_v24, %v481_v29 }
  0xa4   : > { %v581_v34 = vadd.f32 %v1192_v27, %v545_v30  ;;  %v589_v35 = vadd.f32 %v1192_v27, %v553_v32 }
  0xa6   : > { %v677_v36 = vadd.f32 %v973_v31, %v581_v34  ;;  %v685_v37 = vadd.f32 %v989_v33, %v589_v35  ;;  %v1009_v35 = vunpack.c.l.bf16 %v1043_v25 }
  0xa8   : > { %v709_v40 = vpack.c.bf16 %v677_v36, %v677_v36  ;;  %v717_v41 = vpack.c.bf16 %v685_v37, %v685_v37  ;;  %v501_v42 = vpop.f32.mrf.mxu2  ;;  %v521_v43 = vpop.f32.mrf.mxu3  ;;  %v1025_v37 = vunpack.c.l.bf16 %v1047_v26 }
  0xa9   : > { %v561_v44 = vmul.f32 %v1185_v24, %v501_v42  ;;  %v569_v46 = vmul.f32 %v1185_v24, %v521_v43  ;;  %v463_v48 = vpop.f32.mrf.mxu0  ;;  %v483_v49 = vpop.f32.mrf.mxu1  ;;  %v994_v43 = vunpack.c.h.bf16 %v1039_v1 }
  0xaa   : > { %742 = vst.msk [vmem:[%s1204_s20] sm:$0xf] %vm741_vm2, %v709_v40  ;;  %v546_v50 = vmul.f32 %v1185_v24, %v463_v48  ;;  %v554_v52 = vmul.f32 %v1185_v24, %v483_v49 }
  0xab   : > { %750 = vst.msk [vmem:[%s1204_s20 + $0x20] sm:$0xf] %vm741_vm2, %v717_v41  ;;  %v597_v54 = vadd.f32 %v1192_v27, %v561_v44  ;;  %v605_v55 = vadd.f32 %v1192_v27, %v569_v46  ;;  %v978_v41 = vunpack.c.h.bf16 %v1035_v0 }
  0xac   : > { %v582_v56 = vadd.f32 %v1192_v27, %v546_v50  ;;  %v590_v57 = vadd.f32 %v1192_v27, %v554_v52 }
  0xad   : > { %v693_v58 = vadd.f32 %v1005_v45, %v597_v54  ;;  %v701_v59 = vadd.f32 %v1021_v47, %v605_v55  ;;  %v1036_v54 = vld [vmem:[%s1180_s12 + $0x10] sm:$0xff]  }
  0xae   : > { %v678_v60 = vadd.f32 %v974_v51, %v582_v56  ;;  %v686_v61 = vadd.f32 %v990_v53, %v590_v57  ;;  %v1040_v55 = vld [vmem:[%s1180_s12 + $0x30] sm:$0xff]  }
  0xaf   : > { %v725_v62 = vpack.c.bf16 %v693_v58, %v693_v58  ;;  %v733_v63 = vpack.c.bf16 %v701_v59, %v701_v59 }
  0xb0   : > { %v710_v2 = vpack.c.bf16 %v678_v60, %v678_v60  ;;  %v718_v3 = vpack.c.bf16 %v686_v61, %v686_v61  ;;  %v503_v4 = vpop.f32.mrf.mxu2  ;;  %v523_v5 = vpop.f32.mrf.mxu3  ;;  %v1010_v61 = vunpack.c.h.bf16 %v1043_v25 }
  0xb1   : > { %758 = vst.msk [vmem:[%s1204_s20 + $0x40] sm:$0xf] %vm741_vm2, %v725_v62  ;;  %v562_v6 = vmul.f32 %v1185_v24, %v503_v4  ;;  %v570_v8 = vmul.f32 %v1185_v24, %v523_v5  ;;  %v466_v10 = vpop.f32.mrf.mxu0  ;;  %v486_v11 = vpop.f32.mrf.mxu1  ;;  %v997_v5 = vunpack.c.l.bf16 %v1040_v55 }
  0xb2   : > { %766 = vst.msk [vmem:[%s1204_s20 + $0x60] sm:$0xf] %vm741_vm2, %v733_v63  ;;  %v547_v12 = vmul.f32 %v1185_v24, %v466_v10  ;;  %v555_v14 = vmul.f32 %v1185_v24, %v486_v11  ;;  %v1026_v63 = vunpack.c.h.bf16 %v1047_v26 }
  0xb3   : > { %743 = vst.msk [vmem:[%s1204_s20 + $0x4] sm:$0xf] %vm741_vm2, %v710_v2  ;;  %v598_v16 = vadd.f32 %v1192_v27, %v562_v6  ;;  %v606_v17 = vadd.f32 %v1192_v27, %v570_v8 }
  0xb4   : > { %751 = vst.msk [vmem:[%s1204_s20 + $0x24] sm:$0xf] %vm741_vm2, %v718_v3  ;;  %v583_v18 = vadd.f32 %v1192_v27, %v547_v12  ;;  %v591_v19 = vadd.f32 %v1192_v27, %v555_v14  ;;  %v981_v3 = vunpack.c.l.bf16 %v1036_v54  ;;  %v1044_v14 = vld [vmem:[%s1180_s12 + $0x50] sm:$0xff]  }
  0xb5   : > { %v694_v20 = vadd.f32 %v1006_v7, %v598_v16  ;;  %v702_v21 = vadd.f32 %v1022_v9, %v606_v17 }
  0xb6   : > { %v679_v22 = vadd.f32 %v977_v13, %v583_v18  ;;  %v687_v23 = vadd.f32 %v993_v15, %v591_v19  ;;  %v1048_v15 = vld [vmem:[%s1180_s12 + $0x70] sm:$0xff]  }
  0xb7   : > { %v726_v28 = vpack.c.bf16 %v694_v20, %v694_v20  ;;  %v734_v29 = vpack.c.bf16 %v702_v21, %v702_v21  ;;  %v1029_v26 = vunpack.c.l.bf16 %v1048_v15 }
  0xb8   : > { %v711_v30 = vpack.c.bf16 %v679_v22, %v679_v22  ;;  %v719_v31 = vpack.c.bf16 %v687_v23, %v687_v23  ;;  %v506_v32 = vpop.f32.mrf.mxu2  ;;  %v526_v33 = vpop.f32.mrf.mxu3  ;;  %v1013_v23 = vunpack.c.l.bf16 %v1044_v14 }
  0xb9   : > { %759 = vst.msk [vmem:[%s1204_s20 + $0x44] sm:$0xf] %vm741_vm2, %v726_v28  ;;  %v563_v34 = vmul.f32 %v1185_v24, %v506_v32  ;;  %v571_v36 = vmul.f32 %v1185_v24, %v526_v33  ;;  %v468_v38 = vpop.f32.mrf.mxu0  ;;  %v488_v39 = vpop.f32.mrf.mxu1  ;;  %v998_v33 = vunpack.c.h.bf16 %v1040_v55 }
  0xba   : > { %767 = vst.msk [vmem:[%s1204_s20 + $0x64] sm:$0xf] %vm741_vm2, %v734_v29  ;;  %v548_v40 = vmul.f32 %v1185_v24, %v468_v38  ;;  %v556_v42 = vmul.f32 %v1185_v24, %v488_v39 }
  0xbb   : > { %744 = vst.msk [vmem:[%s1204_s20 + $0x8] sm:$0xf] %vm741_vm2, %v711_v30  ;;  %v599_v44 = vadd.f32 %v1192_v27, %v563_v34  ;;  %v607_v45 = vadd.f32 %v1192_v27, %v571_v36 }
  0xbc   : > { %752 = vst.msk [vmem:[%s1204_s20 + $0x28] sm:$0xf] %vm741_vm2, %v719_v31  ;;  %v584_v46 = vadd.f32 %v1192_v27, %v548_v40  ;;  %v592_v47 = vadd.f32 %v1192_v27, %v556_v42  ;;  %v982_v31 = vunpack.c.h.bf16 %v1036_v54 }
  0xbd   : > { %v695_v48 = vadd.f32 %v1009_v35, %v599_v44  ;;  %v703_v49 = vadd.f32 %v1025_v37, %v607_v45  ;;  %v1037_v44 = vld [vmem:[%s1180_s12 + $0x18] sm:$0xff]  }
  0xbe   : > { %v680_v50 = vadd.f32 %v978_v41, %v584_v46  ;;  %v688_v51 = vadd.f32 %v994_v43, %v592_v47  ;;  %v1041_v45 = vld [vmem:[%s1180_s12 + $0x38] sm:$0xff]  }
  0xbf   : > { %v727_v52 = vpack.c.bf16 %v695_v48, %v695_v48  ;;  %v735_v53 = vpack.c.bf16 %v703_v49, %v703_v49 }
  0xc0   : > { %v712_v56 = vpack.c.bf16 %v680_v50, %v680_v50  ;;  %v720_v57 = vpack.c.bf16 %v688_v51, %v688_v51  ;;  %v508_v58 = vpop.f32.mrf.mxu2  ;;  %v528_v59 = vpop.f32.mrf.mxu3  ;;  %v1014_v51 = vunpack.c.h.bf16 %v1044_v14 }
  0xc1   : > { %760 = vst.msk [vmem:[%s1204_s20 + $0x48] sm:$0xf] %vm741_vm2, %v727_v52  ;;  %v564_v60 = vmul.f32 %v1185_v24, %v508_v58  ;;  %v572_v62 = vmul.f32 %v1185_v24, %v528_v59  ;;  %v471_v0 = vpop.f32.mrf.mxu0  ;;  %v491_v1 = vpop.f32.mrf.mxu1  ;;  %v1001_v59 = vunpack.c.l.bf16 %v1041_v45 }
  0xc2   : > { %768 = vst.msk [vmem:[%s1204_s20 + $0x68] sm:$0xf] %vm741_vm2, %v735_v53  ;;  %v549_v2 = vmul.f32 %v1185_v24, %v471_v0  ;;  %v557_v4 = vmul.f32 %v1185_v24, %v491_v1  ;;  %v1030_v53 = vunpack.c.h.bf16 %v1048_v15 }
  0xc3   : > { %745 = vst.msk [vmem:[%s1204_s20 + $0xc] sm:$0xf] %vm741_vm2, %v712_v56  ;;  %v600_v6 = vadd.f32 %v1192_v27, %v564_v60  ;;  %v608_v7 = vadd.f32 %v1192_v27, %v572_v62 }
  0xc4   : > { %753 = vst.msk [vmem:[%s1204_s20 + $0x2c] sm:$0xf] %vm741_vm2, %v720_v57  ;;  %v585_v8 = vadd.f32 %v1192_v27, %v549_v2  ;;  %v593_v9 = vadd.f32 %v1192_v27, %v557_v4  ;;  %v985_v57 = vunpack.c.l.bf16 %v1037_v44  ;;  %v1045_v4 = vld [vmem:[%s1180_s12 + $0x58] sm:$0xff]  }
  0xc5   : > { %v696_v10 = vadd.f32 %v1010_v61, %v600_v6  ;;  %v704_v11 = vadd.f32 %v1026_v63, %v608_v7 }
  0xc6   : > { %v681_v12 = vadd.f32 %v981_v3, %v585_v8  ;;  %v689_v13 = vadd.f32 %v997_v5, %v593_v9  ;;  %v1049_v5 = vld [vmem:[%s1180_s12 + $0x78] sm:$0xff]  }
  0xc7   : > { %v728_v16 = vpack.c.bf16 %v696_v10, %v696_v10  ;;  %v736_v17 = vpack.c.bf16 %v704_v11, %v704_v11  ;;  %v1033_v15 = vunpack.c.l.bf16 %v1049_v5 }
  0xc8   : > { %v713_v18 = vpack.c.bf16 %v681_v12, %v681_v12  ;;  %v721_v19 = vpack.c.bf16 %v689_v13, %v689_v13  ;;  %v511_v20 = vpop.f32.mrf.mxu2  ;;  %v531_v21 = vpop.f32.mrf.mxu3  ;;  %v1017_v13 = vunpack.c.l.bf16 %v1045_v4 }
  0xc9   : > { %761 = vst.msk [vmem:[%s1204_s20 + $0x4c] sm:$0xf] %vm741_vm2, %v728_v16  ;;  %v565_v22 = vmul.f32 %v1185_v24, %v511_v20  ;;  %v573_v25 = vmul.f32 %v1185_v24, %v531_v21  ;;  %v473_v28 = vpop.f32.mrf.mxu0  ;;  %v493_v29 = vpop.f32.mrf.mxu1  ;;  %v1002_v21 = vunpack.c.h.bf16 %v1041_v45 }
  0xca   : > { %769 = vst.msk [vmem:[%s1204_s20 + $0x6c] sm:$0xf] %vm741_vm2, %v736_v17  ;;  %v550_v30 = vmul.f32 %v1185_v24, %v473_v28  ;;  %v558_v32 = vmul.f32 %v1185_v24, %v493_v29 }
  0xcb   : > { %746 = vst.msk [vmem:[%s1204_s20 + $0x10] sm:$0xf] %vm741_vm2, %v713_v18  ;;  %v601_v34 = vadd.f32 %v1192_v27, %v565_v22  ;;  %v609_v35 = vadd.f32 %v1192_v27, %v573_v25 }
  0xcc   : > { %754 = vst.msk [vmem:[%s1204_s20 + $0x30] sm:$0xf] %vm741_vm2, %v721_v19  ;;  %v586_v36 = vadd.f32 %v1192_v27, %v550_v30  ;;  %v594_v37 = vadd.f32 %v1192_v27, %v558_v32  ;;  %v986_v19 = vunpack.c.h.bf16 %v1037_v44 }
  0xcd   : > { %v697_v38 = vadd.f32 %v1013_v23, %v601_v34  ;;  %v705_v39 = vadd.f32 %v1029_v26, %v609_v35 }
  0xce   : > { %v682_v40 = vadd.f32 %v982_v31, %v586_v36  ;;  %v690_v41 = vadd.f32 %v998_v33, %v594_v37 }
  0xcf   : > { %v729_v42 = vpack.c.bf16 %v697_v38, %v697_v38  ;;  %v737_v43 = vpack.c.bf16 %v705_v39, %v705_v39  ;;  %v1018_v39 = vunpack.c.h.bf16 %v1045_v4 }
  0xd0   : > { %v714_v46 = vpack.c.bf16 %v682_v40, %v682_v40  ;;  %v722_v47 = vpack.c.bf16 %v690_v41, %v690_v41  ;;  %v513_v48 = vpop.f32.mrf.mxu2  ;;  %v533_v49 = vpop.f32.mrf.mxu3  ;;  %v1034_v41 = vunpack.c.h.bf16 %v1049_v5 }
  0xd1   : > { %762 = vst.msk [vmem:[%s1204_s20 + $0x50] sm:$0xf] %vm741_vm2, %v729_v42  ;;  %v566_v50 = vmul.f32 %v1185_v24, %v513_v48  ;;  %v574_v52 = vmul.f32 %v1185_v24, %v533_v49  ;;  %v476_v54 = vpop.f32.mrf.mxu0  ;;  %v496_v55 = vpop.f32.mrf.mxu1 }
  0xd2   : > { %770 = vst.msk [vmem:[%s1204_s20 + $0x70] sm:$0xf] %vm741_vm2, %v737_v43  ;;  %v551_v56 = vmul.f32 %v1185_v24, %v476_v54  ;;  %v559_v58 = vmul.f32 %v1185_v24, %v496_v55 }
  0xd3   : > { %747 = vst.msk [vmem:[%s1204_s20 + $0x14] sm:$0xf] %vm741_vm2, %v714_v46  ;;  %v602_v60 = vadd.f32 %v1192_v27, %v566_v50  ;;  %v610_v61 = vadd.f32 %v1192_v27, %v574_v52 }
  0xd4   : > { %755 = vst.msk [vmem:[%s1204_s20 + $0x34] sm:$0xf] %vm741_vm2, %v722_v47  ;;  %v587_v62 = vadd.f32 %v1192_v27, %v551_v56  ;;  %v595_v63 = vadd.f32 %v1192_v27, %v559_v58 }
  0xd5   : > { %v698_v0 = vadd.f32 %v1014_v51, %v602_v60  ;;  %v706_v1 = vadd.f32 %v1030_v53, %v610_v61 }
  0xd6   : > { %v683_v2 = vadd.f32 %v985_v57, %v587_v62  ;;  %v691_v3 = vadd.f32 %v1001_v59, %v595_v63 }
  0xd7   : > { %v730_v6 = vpack.c.bf16 %v698_v0, %v698_v0  ;;  %v738_v7 = vpack.c.bf16 %v706_v1, %v706_v1 }
  0xd8   : > { %v715_v8 = vpack.c.bf16 %v683_v2, %v683_v2  ;;  %v723_v9 = vpack.c.bf16 %v691_v3, %v691_v3  ;;  %v516_v10 = vpop.f32.mrf.mxu2  ;;  %v536_v11 = vpop.f32.mrf.mxu3 }
  0xd9   : > { %763 = vst.msk [vmem:[%s1204_s20 + $0x54] sm:$0xf] %vm741_vm2, %v730_v6  ;;  %v567_v12 = vmul.f32 %v1185_v24, %v516_v10  ;;  %v575_v14 = vmul.f32 %v1185_v24, %v536_v11  ;;  %v478_v16 = vpop.f32.mrf.mxu0  ;;  %v498_v17 = vpop.f32.mrf.mxu1 }
  0xda   : > { %771 = vst.msk [vmem:[%s1204_s20 + $0x74] sm:$0xf] %vm741_vm2, %v738_v7  ;;  %v552_v18 = vmul.f32 %v1185_v24, %v478_v16  ;;  %v560_v20 = vmul.f32 %v1185_v24, %v498_v17 }
  0xdb   : > { %748 = vst.msk [vmem:[%s1204_s20 + $0x18] sm:$0xf] %vm741_vm2, %v715_v8  ;;  %v603_v22 = vadd.f32 %v1192_v27, %v567_v12  ;;  %v611_v23 = vadd.f32 %v1192_v27, %v575_v14 }
  0xdc   : > { %756 = vst.msk [vmem:[%s1204_s20 + $0x38] sm:$0xf] %vm741_vm2, %v723_v9  ;;  %v588_v25 = vadd.f32 %v1192_v27, %v552_v18  ;;  %v596_v26 = vadd.f32 %v1192_v27, %v560_v20 }
  0xdd   : > { %v699_v28 = vadd.f32 %v1017_v13, %v603_v22  ;;  %v707_v29 = vadd.f32 %v1033_v15, %v611_v23 }
  0xde   : > { %v684_v30 = vadd.f32 %v986_v19, %v588_v25  ;;  %v692_v31 = vadd.f32 %v1002_v21, %v596_v26 }
  0xdf   : > { %v731_v32 = vpack.c.bf16 %v699_v28, %v699_v28  ;;  %v739_v33 = vpack.c.bf16 %v707_v29, %v707_v29 }
  0xe0   : > { %v716_v34 = vpack.c.bf16 %v684_v30, %v684_v30  ;;  %v724_v35 = vpack.c.bf16 %v692_v31, %v692_v31  ;;  %v518_v36 = vpop.f32.mrf.mxu2  ;;  %v538_v37 = vpop.f32.mrf.mxu3 }
  0xe1   : > { %764 = vst.msk [vmem:[%s1204_s20 + $0x58] sm:$0xf] %vm741_vm2, %v731_v32  ;;  %v568_v38 = vmul.f32 %v1185_v24, %v518_v36  ;;  %v576_v40 = vmul.f32 %v1185_v24, %v538_v37 }
  0xe2   : > { %772 = vst.msk [vmem:[%s1204_s20 + $0x78] sm:$0xf] %vm741_vm2, %v739_v33 }
  0xe3   : > { %749 = vst.msk [vmem:[%s1204_s20 + $0x1c] sm:$0xf] %vm741_vm2, %v716_v34  ;;  %v604_v42 = vadd.f32 %v1192_v27, %v568_v38  ;;  %v612_v43 = vadd.f32 %v1192_v27, %v576_v40 }
  0xe4   : > { %757 = vst.msk [vmem:[%s1204_s20 + $0x3c] sm:$0xf] %vm741_vm2, %v724_v35 }
  0xe5   : > { %v700_v44 = vadd.f32 %v1018_v39, %v604_v42  ;;  %v708_v45 = vadd.f32 %v1034_v41, %v612_v43 }
  0xe7   : > { %v732_v46 = vpack.c.bf16 %v700_v44, %v700_v44  ;;  %v740_v47 = vpack.c.bf16 %v708_v45, %v708_v45 }
  0xe9   : > { %765 = vst.msk [vmem:[%s1204_s20 + $0x5c] sm:$0xf] %vm741_vm2, %v732_v46 }
  0xea   : > { %773 = vst.msk [vmem:[%s1204_s20 + $0x7c] sm:$0xf] %vm741_vm2, %v740_v47 }
  0xeb PF: > { %s15_s18 = sadd.s32 1, %s1081_s18  }
  0xec   : > { %p12_p4 = scmp.ge.s32.totalorder %s15_s18, 4  }
  0xee   :  { %14 = sbr.rel (!%p12_p4) target bundleno = 1 (0x1), region = 73 }

// kernel: _lambda_.18
= control target key start
LH: loop header
LB: loop body
LE: loop exit
PB: predicated region body
PF: predicated region fallthrough
CT: control target
= control target key end

     0   :  { %s568_s21 = smov 0   ;;  %s632_s0 = inlined_call_operand.vmem [shape: bf16[128,32], index: 0, kind: input, shape index: {}]   ;;  %s633_s1 = inlined_call_operand.vmem [shape: f32[1,32], index: 1, kind: input, shape index: {}]   ;;  %s634_s2 = inlined_call_operand.vmem [shape: f32[1,32], index: 2, kind: input, shape index: {}]   ;;  %s635_s3 = inlined_call_operand.vmem [shape: bf16[32,16], index: 3, kind: input, shape index: {}]   ;;  %s636_s4 = inlined_call_operand.vmem [shape: f32[1,16], index: 4, kind: input, shape index: {}]   ;;  %s637_s5 = inlined_call_operand.vmem [shape: f32[1,16], index: 5, kind: input, shape index: {}]   ;;  %s638_s6 = inlined_call_operand.vmem [shape: bf16[128,16], index: 6, kind: output, shape index: {}]  }
   0x1 LB: > { %s463_s22 = sadd.s32 4294967295, %s531_s21   ;;  %p467_p0 = scmp.ge.s32.totalorder %s531_s21, 1  ;;  %s531_s21 = sphi %s568_s21, %s16_s21  }
   0x2   : > { %p213_p1 = scmp.lt.s32.totalorder %s531_s21, 3 }
   0x4   : > { %p214_p2 = pnand %p467_p0, %p213_p1 }
   0x5   : > { %s468_s25 = sshll.u32 (!%p214_p2), %s463_s22, 3 }
   0x6   : > { %217 = sbr.rel (%p214_p2) target bundleno = 174 (0xae), region = 44  ;;  %p244_p3 = scmp.lt.s32.totalorder (!%p214_p2), %s468_s25, 15 }
   0xb   : > { %v487_v0 = vld [vmem:[%s635_s3 + $0x8] sm:$0xff]  ;;  %v486_v1 = vld [vmem:[%s635_s3] sm:$0xff]  ;;  %s640_s25 = smov (!%p244_p3, %s468_s25), 15  ;;  %vm324_vm0 = vcmask 261120   ;;  %vm398_vm1 = vcmask 125952  }
   0xc   : > { %343 = vmatpush.bf16.msra.mxu0 %v487_v0  ;;  %507 = vmatpush.bf16.msra.mxu1 %v487_v0  ;;  %s469_s28 = sshll.u32 %s640_s25, 2  ;;  %v521_v2 = vld [vmem:[%s633_s1] ss:$0 sm:$0xff] }
   0xd   : > { %508 = vmatpush.bf16.msra.mxu2 %v487_v0  ;;  %509 = vmatpush.bf16.msra.mxu3 %v487_v0  ;;  %s247_s7 = scalar_lea.vmem %s632_s0, %s469_s28  ;;  %v522_v8 = vld [vmem:[%s634_s2] ss:$0 sm:$0xff]  ;;  %s611_s18 = scalar_lea.vmem %s638_s6, %s469_s28 }
   0xe   : > { %v489_v3 = vld [vmem:[%s247_s7] sm:$0xff]   ;;  %v504_v4 = vld [vmem:[%s247_s7 + $0x8] sm:$0xff]   ;;  %v505_v5 = vld [vmem:[%s247_s7 + $0x10] sm:$0xff]  }
   0xf   : > { %v490_v6 = vunpack.c.l.bf16 %v489_v3  ;;  %v491_v7 = vunpack.c.h.bf16 %v489_v3  ;;  %v494_v9 = vunpack.c.l.bf16 %v504_v4  ;;  %v495_v10 = vunpack.c.h.bf16 %v504_v4  ;;  %v506_v11 = vld [vmem:[%s247_s7 + $0x18] sm:$0xff]   ;;  %v523_v44 = vld [vmem:[%s636_s4] ss:$0 sm:$0xff] }
  0x10   : > { %344 = vmatpush.bf16.msra.mxu0 %v486_v1  ;;  %510 = vmatpush.bf16.msra.mxu1 %v486_v1  ;;  %v498_v12 = vunpack.c.l.bf16 %v505_v5  ;;  %v499_v13 = vunpack.c.h.bf16 %v505_v5  ;;  %v502_v14 = vunpack.c.l.bf16 %v506_v11  ;;  %v503_v15 = vunpack.c.h.bf16 %v506_v11  ;;  %v524_v45 = vld [vmem:[%s637_s5] ss:$0 sm:$0xff] }
  0x11   : > { %511 = vmatpush.bf16.msra.mxu2 %v486_v1  ;;  %512 = vmatpush.bf16.msra.mxu3 %v486_v1  ;;  %v276_v16 = vmul.f32 %v521_v2, %v490_v6  ;;  %v277_v17 = vmul.f32 %v521_v2, %v491_v7  ;;  %v278_v18 = vmul.f32 %v521_v2, %v494_v9 }
  0x12   : > { %v279_v19 = vmul.f32 %v521_v2, %v495_v10  ;;  %v280_v20 = vmul.f32 %v521_v2, %v498_v12  ;;  %v281_v21 = vmul.f32 %v521_v2, %v499_v13  ;;  %v282_v22 = vmul.f32 %v521_v2, %v502_v14 }
  0x13   : > { %v283_v23 = vmul.f32 %v521_v2, %v503_v15  ;;  %v288_v24 = vadd.f32 %v522_v8, %v276_v16  ;;  %v289_v25 = vadd.f32 %v522_v8, %v277_v17  ;;  %v290_v26 = vadd.f32 %v522_v8, %v278_v18 }
  0x14   : > { %v291_v27 = vadd.f32 %v522_v8, %v279_v19  ;;  %v292_v28 = vadd.f32 %v522_v8, %v280_v20  ;;  %v293_v29 = vadd.f32 %v522_v8, %v281_v21  ;;  %v294_v30 = vadd.f32 %v522_v8, %v282_v22 }
  0x15   : > { %v295_v31 = vadd.f32 %v522_v8, %v283_v23  ;;  %v296_v32 = vmax.f32 %v288_v24, 0.0  ;;  %v297_v33 = vmax.f32 %v289_v25, 0.0  ;;  %v298_v34 = vmax.f32 %v290_v26, 0.0 }
  0x16   : > { %v299_v35 = vmax.f32 %v291_v27, 0.0  ;;  %v300_v36 = vmax.f32 %v292_v28, 0.0  ;;  %v301_v37 = vmax.f32 %v293_v29, 0.0  ;;  %v302_v38 = vmax.f32 %v294_v30, 0.0 }
  0x17   : > { %v303_v39 = vmax.f32 %v295_v31, 0.0  ;;  %v304_v40 = vpack.c.bf16 %v297_v33, %v296_v32 }
  0x18   : > { %v305_v41 = vpack.c.bf16 %v299_v35, %v298_v34  ;;  %v306_v42 = vpack.c.bf16 %v301_v37, %v300_v36 }
  0x19   : > { %v307_v43 = vpack.c.bf16 %v303_v39, %v302_v38  ;;  %480 = vmatmul.msk.bf16.vlgmr.msra.gmra.mxu0 %vm324_vm0, %v304_v40 }
  0x1a   : > { %481 = vmatmul.msk.bf16.vlgmr.msra.gmra.mxu1 %vm324_vm0, %v305_v41  ;;  %482 = vmatmul.msk.bf16.vlgmr.msra.gmra.mxu2 %vm324_vm0, %v306_v42 }
  0x1b   : > { %483 = vmatmul.msk.bf16.vlgmr.msra.gmra.mxu3 %vm324_vm0, %v307_v43 }
  0x96   : > { %v346_v46 = vpop.f32.mrf.mxu0 }
  0x97   : > { %v351_v47 = vpop.f32.mrf.mxu1  ;;  %v370_v48 = vmul.f32 %v523_v44, %v346_v46 }
  0x98   : > { %v372_v49 = vmul.f32 %v523_v44, %v351_v47 }
  0x99   : > { %v382_v50 = vadd.f32 %v524_v45, %v370_v48 }
  0x9a   : > { %v384_v51 = vadd.f32 %v524_v45, %v372_v49 }
  0x9b   : > { %v390_v52 = vpack.c.bf16 %v382_v50, %v382_v50 }
  0x9c   : > { %v392_v53 = vpack.c.bf16 %v384_v51, %v384_v51 }
  0x9d   : > { %399 = vst.msk [vmem:[%s611_s18] sm:$0xf] %vm398_vm1, %v390_v52  ;;  %v356_v54 = vpop.f32.mrf.mxu2 }
  0x9e   : > { %v361_v55 = vpop.f32.mrf.mxu3  ;;  %401 = vst.msk [vmem:[%s611_s18 + $0x8] sm:$0xf] %vm398_vm1, %v392_v53  ;;  %v374_v56 = vmul.f32 %v523_v44, %v356_v54  ;;  %v348_v58 = vpop.f32.mrf.mxu0 }
  0x9f   : > { %v376_v57 = vmul.f32 %v523_v44, %v361_v55  ;;  %v353_v59 = vpop.f32.mrf.mxu1  ;;  %v371_v60 = vmul.f32 %v523_v44, %v348_v58 }
  0xa0   : > { %v373_v61 = vmul.f32 %v523_v44, %v353_v59  ;;  %v386_v62 = vadd.f32 %v524_v45, %v374_v56 }
  0xa1   : > { %v388_v63 = vadd.f32 %v524_v45, %v376_v57  ;;  %v383_v0 = vadd.f32 %v524_v45, %v371_v60 }
  0xa2   : > { %v385_v1 = vadd.f32 %v524_v45, %v373_v61  ;;  %v394_v2 = vpack.c.bf16 %v386_v62, %v386_v62 }
  0xa3   : > { %v396_v3 = vpack.c.bf16 %v388_v63, %v388_v63  ;;  %v391_v4 = vpack.c.bf16 %v383_v0, %v383_v0 }
  0xa4   : > { %v393_v5 = vpack.c.bf16 %v385_v1, %v385_v1  ;;  %403 = vst.msk [vmem:[%s611_s18 + $0x10] sm:$0xf] %vm398_vm1, %v394_v2 }
  0xa5   : > { %405 = vst.msk [vmem:[%s611_s18 + $0x18] sm:$0xf] %vm398_vm1, %v396_v3  ;;  %v358_v6 = vpop.f32.mrf.mxu2 }
  0xa6   : > { %v363_v7 = vpop.f32.mrf.mxu3  ;;  %400 = vst.msk [vmem:[%s611_s18 + $0x4] sm:$0xf] %vm398_vm1, %v391_v4  ;;  %v375_v8 = vmul.f32 %v523_v44, %v358_v6 }
  0xa7   : > { %v377_v9 = vmul.f32 %v523_v44, %v363_v7  ;;  %402 = vst.msk [vmem:[%s611_s18 + $0xc] sm:$0xf] %vm398_vm1, %v393_v5 }
  0xa8   : > { %v387_v10 = vadd.f32 %v524_v45, %v375_v8 }
  0xa9   : > { %v389_v11 = vadd.f32 %v524_v45, %v377_v9 }
  0xaa   : > { %v395_v12 = vpack.c.bf16 %v387_v10, %v387_v10 }
  0xab   : > { %v397_v13 = vpack.c.bf16 %v389_v11, %v389_v11 }
  0xac   : > { %404 = vst.msk [vmem:[%s611_s18 + $0x14] sm:$0xf] %vm398_vm1, %v395_v12 }
  0xad   : > { %406 = vst.msk [vmem:[%s611_s18 + $0x1c] sm:$0xf] %vm398_vm1, %v397_v13 }
  0xae PF: > { %s16_s21 = sadd.s32 1, %s531_s21  }
  0xaf   : > { %p13_p4 = scmp.ge.s32.totalorder %s16_s21, 4  }
  0xb1   :  { %15 = sbr.rel (!%p13_p4) target bundleno = 1 (0x1), region = 74 }

// kernel: _lambda_.19
= control target key start
LH: loop header
LB: loop body
LE: loop exit
PB: predicated region body
PF: predicated region fallthrough
CT: control target
= control target key end

     0   :  { %s560_s21 = smov 0   ;;  %s621_s0 = inlined_call_operand.vmem [shape: bf16[128,16], index: 0, kind: input, shape index: {}]   ;;  %s622_s1 = inlined_call_operand.vmem [shape: f32[1,16], index: 1, kind: input, shape index: {}, may-alias: {1,4}]   ;;  %s623_s2 = inlined_call_operand.vmem [shape: f32[1,16], index: 2, kind: input, shape index: {}, may-alias: {2,5}]   ;;  %s624_s3 = inlined_call_operand.vmem [shape: bf16[16,16], index: 3, kind: input, shape index: {}]   ;;  %s625_s4 = inlined_call_operand.vmem [shape: f32[1,16], index: 4, kind: input, shape index: {}, may-alias: {1,4}]   ;;  %s626_s5 = inlined_call_operand.vmem [shape: f32[1,16], index: 5, kind: input, shape index: {}, may-alias: {2,5}]   ;;  %s627_s6 = inlined_call_operand.vmem [shape: bf16[128,16], index: 6, kind: output, shape index: {}]  }
   0x1 LB: > { %s463_s22 = sadd.s32 4294967295, %s523_s21   ;;  %p467_p0 = scmp.ge.s32.totalorder %s523_s21, 1  ;;  %s523_s21 = sphi %s560_s21, %s16_s21  }
   0x2   : > { %p213_p1 = scmp.lt.s32.totalorder %s523_s21, 3 }
   0x4   : > { %p214_p2 = pnand %p467_p0, %p213_p1 }
   0x5   : > { %s468_s25 = sshll.u32 (!%p214_p2), %s463_s22, 3 }
   0x6   : > { %217 = sbr.rel (%p214_p2) target bundleno = 176 (0xb0), region = 44  ;;  %p244_p3 = scmp.lt.s32.totalorder (!%p214_p2), %s468_s25, 15 }
   0xb   : > { %v482_v0 = vld [vmem:[%s624_s3] sm:$0xff]  ;;  %s629_s25 = smov (!%p244_p3, %s468_s25), 15  ;;  %vm316_vm0 = vcmask 130048   ;;  %vm398_vm1 = vcmask 125952  }
   0xc   : > { %336 = vmatpush.bf16.msra.mxu0 %v482_v0  ;;  %502 = vmatpush.bf16.msra.mxu1 %v482_v0  ;;  %s469_s26 = sshll.u32 %s629_s25, 2  ;;  %v513_v1 = vld [vmem:[%s622_s1] ss:$0 sm:$0xff] }
   0xd   : > { %503 = vmatpush.bf16.msra.mxu2 %v482_v0  ;;  %504 = vmatpush.bf16.msra.mxu3 %v482_v0  ;;  %s247_s29 = scalar_lea.vmem %s621_s0, %s469_s26  ;;  %v514_v7 = vld [vmem:[%s623_s2] ss:$0 sm:$0xff]  ;;  %s600_s16 = scalar_lea.vmem %s627_s6, %s469_s26 }
   0xe   : > { %v484_v2 = vld [vmem:[%s247_s29] sm:$0xff]   ;;  %v499_v3 = vld [vmem:[%s247_s29 + $0x8] sm:$0xff]   ;;  %v500_v4 = vld [vmem:[%s247_s29 + $0x10] sm:$0xff]  }
   0xf   : > { %v485_v5 = vunpack.c.l.bf16 %v484_v2  ;;  %v486_v6 = vunpack.c.h.bf16 %v484_v2  ;;  %v489_v8 = vunpack.c.l.bf16 %v499_v3  ;;  %v490_v9 = vunpack.c.h.bf16 %v499_v3  ;;  %v501_v10 = vld [vmem:[%s247_s29 + $0x18] sm:$0xff]   ;;  %v515_v43 = vld [vmem:[%s625_s4] ss:$0 sm:$0xff] }
  0x10   : > { %v493_v11 = vunpack.c.l.bf16 %v500_v4  ;;  %v494_v12 = vunpack.c.h.bf16 %v500_v4  ;;  %v497_v13 = vunpack.c.l.bf16 %v501_v10  ;;  %v498_v14 = vunpack.c.h.bf16 %v501_v10  ;;  %v516_v44 = vld [vmem:[%s626_s5] ss:$0 sm:$0xff] }
  0x11   : > { %v276_v15 = vmul.f32 %v513_v1, %v485_v5  ;;  %v277_v16 = vmul.f32 %v513_v1, %v486_v6  ;;  %v278_v17 = vmul.f32 %v513_v1, %v489_v8  ;;  %v279_v18 = vmul.f32 %v513_v1, %v490_v9 }
  0x12   : > { %v280_v19 = vmul.f32 %v513_v1, %v493_v11  ;;  %v281_v20 = vmul.f32 %v513_v1, %v494_v12  ;;  %v282_v21 = vmul.f32 %v513_v1, %v497_v13  ;;  %v283_v22 = vmul.f32 %v513_v1, %v498_v14 }
  0x13   : > { %v288_v23 = vadd.f32 %v514_v7, %v276_v15  ;;  %v289_v24 = vadd.f32 %v514_v7, %v277_v16  ;;  %v290_v25 = vadd.f32 %v514_v7, %v278_v17  ;;  %v291_v26 = vadd.f32 %v514_v7, %v279_v18 }
  0x14   : > { %v292_v27 = vadd.f32 %v514_v7, %v280_v19  ;;  %v293_v28 = vadd.f32 %v514_v7, %v281_v20  ;;  %v294_v29 = vadd.f32 %v514_v7, %v282_v21  ;;  %v295_v30 = vadd.f32 %v514_v7, %v283_v22 }
  0x15   : > { %v296_v31 = vmax.f32 %v288_v23, 0.0  ;;  %v297_v32 = vmax.f32 %v289_v24, 0.0  ;;  %v298_v33 = vmax.f32 %v290_v25, 0.0  ;;  %v299_v34 = vmax.f32 %v291_v26, 0.0 }
  0x16   : > { %v300_v35 = vmax.f32 %v292_v27, 0.0  ;;  %v301_v36 = vmax.f32 %v293_v28, 0.0  ;;  %v302_v37 = vmax.f32 %v294_v29, 0.0  ;;  %v303_v38 = vmax.f32 %v295_v30, 0.0 }
  0x17   : > { %v304_v39 = vpack.c.bf16 %v297_v32, %v296_v31  ;;  %v305_v40 = vpack.c.bf16 %v299_v34, %v298_v33 }
  0x18   : > { %v306_v41 = vpack.c.bf16 %v301_v36, %v300_v35  ;;  %v307_v42 = vpack.c.bf16 %v303_v38, %v302_v37 }
  0x19   : > { %476 = vmatmul.msk.bf16.vlgmr.msra.gmra.mxu0 %vm316_vm0, %v304_v39  ;;  %477 = vmatmul.msk.bf16.vlgmr.msra.gmra.mxu1 %vm316_vm0, %v305_v40 }
  0x1a   : > { %478 = vmatmul.msk.bf16.vlgmr.msra.gmra.mxu2 %vm316_vm0, %v306_v41  ;;  %479 = vmatmul.msk.bf16.vlgmr.msra.gmra.mxu3 %vm316_vm0, %v307_v42 }
  0x96   : > { %v338_v45 = vpop.f32.mrf.mxu0  ;;  %v343_v46 = vpop.f32.mrf.mxu1 }
  0x97   : > { %v362_v47 = vmul.f32 %v515_v43, %v338_v45  ;;  %v364_v48 = vmul.f32 %v515_v43, %v343_v46 }
  0x99   : > { %v374_v49 = vadd.f32 %v516_v44, %v362_v47  ;;  %v376_v50 = vadd.f32 %v516_v44, %v364_v48 }
  0x9b   : > { %v382_v51 = vmax.f32 %v374_v49, 0.0  ;;  %v384_v52 = vmax.f32 %v376_v50, 0.0 }
  0x9d   : > { %v390_v53 = vpack.c.bf16 %v382_v51, %v382_v51  ;;  %v392_v54 = vpack.c.bf16 %v384_v52, %v384_v52  ;;  %v348_v55 = vpop.f32.mrf.mxu2  ;;  %v353_v56 = vpop.f32.mrf.mxu3 }
  0x9e   : > { %v366_v57 = vmul.f32 %v515_v43, %v348_v55  ;;  %v368_v58 = vmul.f32 %v515_v43, %v353_v56  ;;  %v340_v59 = vpop.f32.mrf.mxu0  ;;  %v345_v60 = vpop.f32.mrf.mxu1 }
  0x9f   : > { %399 = vst.msk [vmem:[%s600_s16] sm:$0xf] %vm398_vm1, %v390_v53  ;;  %v363_v61 = vmul.f32 %v515_v43, %v340_v59  ;;  %v365_v62 = vmul.f32 %v515_v43, %v345_v60 }
  0xa0   : > { %401 = vst.msk [vmem:[%s600_s16 + $0x8] sm:$0xf] %vm398_vm1, %v392_v54  ;;  %v378_v63 = vadd.f32 %v516_v44, %v366_v57  ;;  %v380_v0 = vadd.f32 %v516_v44, %v368_v58 }
  0xa1   : > { %v375_v1 = vadd.f32 %v516_v44, %v363_v61  ;;  %v377_v2 = vadd.f32 %v516_v44, %v365_v62 }
  0xa2   : > { %v386_v3 = vmax.f32 %v378_v63, 0.0  ;;  %v388_v4 = vmax.f32 %v380_v0, 0.0 }
  0xa3   : > { %v383_v5 = vmax.f32 %v375_v1, 0.0  ;;  %v385_v6 = vmax.f32 %v377_v2, 0.0 }
  0xa4   : > { %v394_v7 = vpack.c.bf16 %v386_v3, %v386_v3  ;;  %v396_v8 = vpack.c.bf16 %v388_v4, %v388_v4 }
  0xa5   : > { %v391_v9 = vpack.c.bf16 %v383_v5, %v383_v5  ;;  %v393_v10 = vpack.c.bf16 %v385_v6, %v385_v6  ;;  %v350_v11 = vpop.f32.mrf.mxu2  ;;  %v355_v12 = vpop.f32.mrf.mxu3 }
  0xa6   : > { %403 = vst.msk [vmem:[%s600_s16 + $0x10] sm:$0xf] %vm398_vm1, %v394_v7  ;;  %v367_v13 = vmul.f32 %v515_v43, %v350_v11  ;;  %v369_v14 = vmul.f32 %v515_v43, %v355_v12 }
  0xa7   : > { %405 = vst.msk [vmem:[%s600_s16 + $0x18] sm:$0xf] %vm398_vm1, %v396_v8 }
  0xa8   : > { %400 = vst.msk [vmem:[%s600_s16 + $0x4] sm:$0xf] %vm398_vm1, %v391_v9  ;;  %v379_v15 = vadd.f32 %v516_v44, %v367_v13  ;;  %v381_v16 = vadd.f32 %v516_v44, %v369_v14 }
  0xa9   : > { %402 = vst.msk [vmem:[%s600_s16 + $0xc] sm:$0xf] %vm398_vm1, %v393_v10 }
  0xaa   : > { %v387_v17 = vmax.f32 %v379_v15, 0.0  ;;  %v389_v18 = vmax.f32 %v381_v16, 0.0 }
  0xac   : > { %v395_v19 = vpack.c.bf16 %v387_v17, %v387_v17  ;;  %v397_v20 = vpack.c.bf16 %v389_v18, %v389_v18 }
  0xae   : > { %404 = vst.msk [vmem:[%s600_s16 + $0x14] sm:$0xf] %vm398_vm1, %v395_v19 }
  0xaf   : > { %406 = vst.msk [vmem:[%s600_s16 + $0x1c] sm:$0xf] %vm398_vm1, %v397_v20 }
  0xb0 PF: > { %s16_s21 = sadd.s32 1, %s523_s21  }
  0xb1   : > { %p13_p4 = scmp.ge.s32.totalorder %s16_s21, 4  }
  0xb3   :  { %15 = sbr.rel (!%p13_p4) target bundleno = 1 (0x1), region = 74 }

// kernel: _lambda_.20
= control target key start
LH: loop header
LB: loop body
LE: loop exit
PB: predicated region body
PF: predicated region fallthrough
CT: control target
= control target key end

     0   :  { %s754_s18 = smov 0   ;;  %s877_s0 = inlined_call_operand.vmem [shape: bf16[128,144], index: 0, kind: input, shape index: {}]   ;;  %s878_s1 = inlined_call_operand.vmem [shape: bf16[144,16], index: 1, kind: input, shape index: {}]   ;;  %s879_s2 = inlined_call_operand.vmem [shape: f32[1,16], index: 2, kind: input, shape index: {}]   ;;  %s880_s3 = inlined_call_operand.vmem [shape: f32[1,16], index: 3, kind: input, shape index: {}]   ;;  %s881_s4 = inlined_call_operand.vmem [shape: bf16[128,16], index: 4, kind: input, shape index: {}]   ;;  %s882_s5 = inlined_call_operand.vmem [shape: bf16[128,16], index: 5, kind: output, shape index: {}]  }
   0x1 LB: > { %s574_s19 = sadd.s32 4294967295, %s722_s18   ;;  %p578_p0 = scmp.ge.s32.totalorder %s722_s18, 1  ;;  %s722_s18 = sphi %s754_s18, %s15_s18  }
   0x2   : > { %p200_p1 = scmp.lt.s32.totalorder %s722_s18, 3 }
   0x4   : > { %p201_p2 = pnand %p578_p0, %p200_p1 }
   0x5   : > { %s579_s24 = sshll.u32 (!%p201_p2), %s574_s19, 3 }
   0x6   : > { %204 = sbr.rel (%p201_p2) target bundleno = 210 (0xd2), region = 40  ;;  %p235_p3 = scmp.lt.s32.totalorder (!%p201_p2), %s579_s24, 15 }
   0xb   : > { %v676_v0 = vld [vmem:[%s878_s1 + $0x38] sm:$0xff]  ;;  %v677_v1 = vld [vmem:[%s878_s1 + $0x40] sm:$0xff]  ;;  %v675_v2 = vld [vmem:[%s878_s1 + $0x30] sm:$0xff]  ;;  %s884_s24 = smov (!%p235_p3, %s579_s24), 15  ;;  %vm370_vm0 = vcmask 130048   ;;  %vm497_vm1 = vcmask 125952  }
   0xc   : > { %383 = vmatpush.bf16.msra.mxu0 %v676_v0  ;;  %697 = vmatpush.bf16.msra.mxu2 %v676_v0  ;;  %s660_s27 = sshll.u32 %s884_s24, 3  ;;  %v674_v3 = vld [vmem:[%s878_s1 + $0x28] sm:$0xff]  ;;  %v673_v8 = vld [vmem:[%s878_s1 + $0x20] sm:$0xff]  ;;  %v672_v11 = vld [vmem:[%s878_s1 + $0x18] sm:$0xff]  ;;  %s583_s19 = sshll.u32 %s884_s24, 2 }
   0xd   : > { %705 = vmatpush.bf16.msra.mxu3 %v677_v1  ;;  %419 = vmatpush.bf16.msra.mxu1 %v677_v1  ;;  %s777_s30 = scalar_lea.vmem %s877_s0, %s660_s27  ;;  %v671_v12 = vld [vmem:[%s878_s1 + $0x10] sm:$0xff]  ;;  %v670_v16 = vld [vmem:[%s878_s1 + $0x8] sm:$0xff]  ;;  %v669_v17 = vld [vmem:[%s878_s1] sm:$0xff]  ;;  %s821_s22 = scalar_lea.vmem %s881_s4, %s583_s19 }
   0xe   : > { %v663_v4 = vld [vmem:[%s777_s30 + $0x14] sm:$0xf]  ;;  %v598_v5 = vld [vmem:[%s777_s30 + $0x18] sm:$0xf0]  ;;  %v661_v7 = vld [vmem:[%s777_s30 + $0x4] sm:$0xf]  ;;  %s840_s29 = scalar_lea.vmem %s882_s5, %s583_s19 }
   0xf   : > { %v601_v6 = vor.u32 %v663_v4, %v598_v5  ;;  %v590_v9 = vld [vmem:[%s777_s30 + $0x8] sm:$0xf0]  ;;  %v665_v13 = vld [vmem:[%s777_s30 + $0x24] sm:$0xf]  ;;  %v588_v18 = vld [vmem:[%s777_s30] sm:$0xf] }
  0x10   : > { %384 = vmatpush.bf16.msra.mxu0 %v675_v2  ;;  %698 = vmatpush.bf16.msra.mxu2 %v675_v2  ;;  %v593_v10 = vor.u32 %v661_v7, %v590_v9  ;;  %v606_v14 = vld [vmem:[%s777_s30 + $0x28] sm:$0xf0]  ;;  %v662_v19 = vld [vmem:[%s777_s30 + $0x4] sm:$0xf0]  ;;  %v604_v20 = vld [vmem:[%s777_s30 + $0x20] sm:$0xf] }
  0x11   : > { %655 = vmatmul.msk.bf16.vlgmr.msra.gmra.mxu3 %vm370_vm0, %v601_v6  ;;  %v609_v15 = vor.u32 %v665_v13, %v606_v14  ;;  %v666_v21 = vld [vmem:[%s777_s30 + $0x24] sm:$0xf0]  ;;  %v589_v22 = vor.u32 %v662_v19, %v588_v18  ;;  %v667_v24 = vld [vmem:[%s777_s30 + $0x34] sm:$0xf]  ;;  %v614_v25 = vld [vmem:[%s777_s30 + $0x38] sm:$0xf0] }
  0x12   : > { %654 = vmatmul.msk.bf16.vlgmr.msra.gmra.mxu1 %vm370_vm0, %v593_v10  ;;  %v605_v23 = vor.u32 %v666_v21, %v604_v20  ;;  %v617_v26 = vor.u32 %v667_v24, %v614_v25  ;;  %v596_v27 = vld [vmem:[%s777_s30 + $0x10] sm:$0xf]  ;;  %v664_v28 = vld [vmem:[%s777_s30 + $0x14] sm:$0xf0]  ;;  %v826_v36 = vld [vmem:[%s879_s2] ss:$0 sm:$0xff] }
  0x13   : > { %v612_v29 = vld [vmem:[%s777_s30 + $0x30] sm:$0xf]  ;;  %v668_v30 = vld [vmem:[%s777_s30 + $0x34] sm:$0xf0]  ;;  %v597_v31 = vor.u32 %v664_v28, %v596_v27  ;;  %v679_v38 = vld [vmem:[%s821_s22] sm:$0xff]  }
  0x14   : > { %385 = vmatpush.bf16.msra.mxu0 %v674_v3  ;;  %699 = vmatpush.bf16.msra.mxu2 %v674_v3  ;;  %v613_v32 = vor.u32 %v668_v30, %v612_v29  ;;  %v832_v41 = vld [vmem:[%s880_s3] ss:$0 sm:$0xff]  ;;  %v680_v43 = vunpack.c.l.bf16 %v679_v38  ;;  %v695_v48 = vld [vmem:[%s821_s22 + $0x10] sm:$0xff]   ;;  %v681_v57 = vunpack.c.h.bf16 %v679_v38  ;;  %v694_v2 = vld [vmem:[%s821_s22 + $0x8] sm:$0xff]  }
  0x15   : > { %v688_v54 = vunpack.c.l.bf16 %v695_v48  ;;  %v689_v6 = vunpack.c.h.bf16 %v695_v48  ;;  %v685_v24 = vunpack.c.h.bf16 %v694_v2 }
  0x18   : > { %386 = vmatpush.bf16.msra.mxu0 %v673_v8  ;;  %700 = vmatpush.bf16.msra.mxu2 %v673_v8  ;;  %v684_v8 = vunpack.c.l.bf16 %v694_v2 }
  0x1c   : > { %387 = vmatpush.bf16.msra.mxu0 %v672_v11  ;;  %701 = vmatpush.bf16.msra.mxu2 %v672_v11 }
  0x20   : > { %388 = vmatpush.bf16.msra.mxu0 %v671_v12  ;;  %702 = vmatpush.bf16.msra.mxu2 %v671_v12 }
  0x21   : > { %656 = vmatmul.msk.bf16.gmra.mxu3 %vm370_vm0, %v609_v15  ;;  %v696_v15 = vld [vmem:[%s821_s22 + $0x18] sm:$0xff]  }
  0x24   : > { %389 = vmatpush.bf16.msra.mxu0 %v670_v16  ;;  %703 = vmatpush.bf16.msra.mxu2 %v670_v16 }
  0x28   : > { %390 = vmatpush.bf16.msra.mxu0 %v669_v17  ;;  %704 = vmatpush.bf16.msra.mxu2 %v669_v17 }
  0x2b   : > { %391 = vmatmul.bf16.vlgmr.msra.gmra.mxu0 %v589_v22  ;;  %401 = vmatmul.bf16.vlgmr.msra.gmra.mxu2 %v605_v23  ;;  %v692_v22 = vunpack.c.l.bf16 %v696_v15 }
  0x31   : > { %657 = vmatmul.msk.bf16.gmra.mxu3 %vm370_vm0, %v617_v26 }
  0x3b   : > { %396 = vmatmul.bf16.gmra.mxu0 %v597_v31  ;;  %406 = vmatmul.bf16.gmra.mxu2 %v613_v32 }
  0x8f   : > { %v421_v35 = vpop.f32.mrf.mxu1 }
  0x94   : > { %v426_v33 = vpop.f32.mrf.mxu3 }
  0x97   : > { %v423_v45 = vpop.f32.mrf.mxu1 }
  0x9c   : > { %v428_v34 = vpop.f32.mrf.mxu3 }
  0xa4   : > { %v431_v39 = vpop.f32.mrf.mxu3 }
  0xa8   : > { %v392_v37 = vpop.f32.mrf.mxu0 }
  0xa9   : > { %v422_v40 = vadd.f32 %v421_v35, %v392_v37  ;;  %v693_v35 = vunpack.c.h.bf16 %v696_v15 }
  0xab   : > { %v445_v42 = vmul.f32 %v826_v36, %v422_v40 }
  0xac   : > { %v433_v55 = vpop.f32.mrf.mxu3 }
  0xad   : > { %v457_v44 = vadd.f32 %v832_v41, %v445_v42 }
  0xae   : > { %v402_v47 = vpop.f32.mrf.mxu2 }
  0xaf   : > { %v481_v46 = vadd.f32 %v680_v43, %v457_v44  ;;  %v432_v49 = vadd.f32 %v431_v39, %v402_v47 }
  0xb0   : > { %v394_v50 = vpop.f32.mrf.mxu0 }
  0xb1   : > { %v489_v51 = vpack.c.bf16 %v481_v46, %v481_v46  ;;  %v424_v52 = vadd.f32 %v423_v45, %v394_v50  ;;  %v449_v53 = vmul.f32 %v826_v36, %v432_v49 }
  0xb3   : > { %498 = vst.msk [vmem:[%s840_s29] sm:$0xf] %vm497_vm1, %v489_v51  ;;  %v446_v56 = vmul.f32 %v826_v36, %v424_v52  ;;  %v461_v58 = vadd.f32 %v832_v41, %v449_v53 }
  0xb4   : > { %v436_v10 = vpop.f32.mrf.mxu3 }
  0xb5   : > { %v458_v59 = vadd.f32 %v832_v41, %v446_v56  ;;  %v485_v60 = vadd.f32 %v688_v54, %v461_v58 }
  0xb6   : > { %v404_v62 = vpop.f32.mrf.mxu2 }
  0xb7   : > { %v482_v61 = vadd.f32 %v681_v57, %v458_v59  ;;  %v493_v63 = vpack.c.bf16 %v485_v60, %v485_v60  ;;  %v434_v0 = vadd.f32 %v433_v55, %v404_v62 }
  0xb8   : > { %v397_v1 = vpop.f32.mrf.mxu0 }
  0xb9   : > { %v490_v3 = vpack.c.bf16 %v482_v61, %v482_v61  ;;  %v427_v4 = vadd.f32 %v426_v33, %v397_v1  ;;  %502 = vst.msk [vmem:[%s840_s29 + $0x10] sm:$0xf] %vm497_vm1, %v493_v63  ;;  %v450_v5 = vmul.f32 %v826_v36, %v434_v0 }
  0xbb   : > { %499 = vst.msk [vmem:[%s840_s29 + $0x4] sm:$0xf] %vm497_vm1, %v490_v3  ;;  %v447_v7 = vmul.f32 %v826_v36, %v427_v4  ;;  %v462_v9 = vadd.f32 %v832_v41, %v450_v5 }
  0xbc   : > { %v438_v28 = vpop.f32.mrf.mxu3 }
  0xbd   : > { %v459_v11 = vadd.f32 %v832_v41, %v447_v7  ;;  %v486_v12 = vadd.f32 %v689_v6, %v462_v9 }
  0xbe   : > { %v407_v14 = vpop.f32.mrf.mxu2 }
  0xbf   : > { %v483_v13 = vadd.f32 %v684_v8, %v459_v11  ;;  %v494_v16 = vpack.c.bf16 %v486_v12, %v486_v12  ;;  %v437_v17 = vadd.f32 %v436_v10, %v407_v14 }
  0xc0   : > { %v399_v18 = vpop.f32.mrf.mxu0 }
  0xc1   : > { %v491_v19 = vpack.c.bf16 %v483_v13, %v483_v13  ;;  %v429_v20 = vadd.f32 %v428_v34, %v399_v18  ;;  %503 = vst.msk [vmem:[%s840_s29 + $0x14] sm:$0xf] %vm497_vm1, %v494_v16  ;;  %v451_v21 = vmul.f32 %v826_v36, %v437_v17 }
  0xc3   : > { %500 = vst.msk [vmem:[%s840_s29 + $0x8] sm:$0xf] %vm497_vm1, %v491_v19  ;;  %v448_v23 = vmul.f32 %v826_v36, %v429_v20  ;;  %v463_v25 = vadd.f32 %v832_v41, %v451_v21 }
  0xc5   : > { %v460_v26 = vadd.f32 %v832_v41, %v448_v23  ;;  %v487_v27 = vadd.f32 %v692_v22, %v463_v25 }
  0xc6   : > { %v409_v30 = vpop.f32.mrf.mxu2 }
  0xc7   : > { %v484_v29 = vadd.f32 %v685_v24, %v460_v26  ;;  %v495_v31 = vpack.c.bf16 %v487_v27, %v487_v27  ;;  %v439_v32 = vadd.f32 %v438_v28, %v409_v30 }
  0xc9   : > { %v492_v33 = vpack.c.bf16 %v484_v29, %v484_v29  ;;  %504 = vst.msk [vmem:[%s840_s29 + $0x18] sm:$0xf] %vm497_vm1, %v495_v31  ;;  %v452_v34 = vmul.f32 %v826_v36, %v439_v32 }
  0xcb   : > { %501 = vst.msk [vmem:[%s840_s29 + $0xc] sm:$0xf] %vm497_vm1, %v492_v33  ;;  %v464_v37 = vadd.f32 %v832_v41, %v452_v34 }
  0xcd   : > { %v488_v38 = vadd.f32 %v693_v35, %v464_v37 }
  0xcf   : > { %v496_v39 = vpack.c.bf16 %v488_v38, %v488_v38 }
  0xd1   : > { %505 = vst.msk [vmem:[%s840_s29 + $0x1c] sm:$0xf] %vm497_vm1, %v496_v39 }
  0xd2 PF: > { %s15_s18 = sadd.s32 1, %s722_s18  }
  0xd3   : > { %p12_p4 = scmp.ge.s32.totalorder %s15_s18, 4  }
  0xd5   :  { %14 = sbr.rel (!%p12_p4) target bundleno = 1 (0x1), region = 73 }

// kernel: _lambda_.22
= control target key start
LH: loop header
LB: loop body
LE: loop exit
PB: predicated region body
PF: predicated region fallthrough
CT: control target
= control target key end

     0   :  { %s460_s21 = smov 0   ;;  %s495_s0 = inlined_call_operand.vmem [shape: bf16[32,24], index: 0, kind: input, shape index: {}]   ;;  %s496_s1 = inlined_call_operand.vmem [shape: f32[1,24], index: 1, kind: input, shape index: {}, may-alias: {1,4}]   ;;  %s497_s2 = inlined_call_operand.vmem [shape: f32[1,24], index: 2, kind: input, shape index: {}, may-alias: {2,5}]   ;;  %s498_s3 = inlined_call_operand.vmem [shape: bf16[24,24], index: 3, kind: input, shape index: {}]   ;;  %s499_s4 = inlined_call_operand.vmem [shape: f32[1,24], index: 4, kind: input, shape index: {}, may-alias: {1,4}]   ;;  %s500_s5 = inlined_call_operand.vmem [shape: f32[1,24], index: 5, kind: input, shape index: {}, may-alias: {2,5}]   ;;  %s501_s6 = inlined_call_operand.vmem [shape: bf16[32,24], index: 6, kind: output, shape index: {}]  }
   0x1 LB: > { %s384_s22 = sadd.s32 4294967295, %s423_s21   ;;  %p388_p0 = scmp.ge.s32.totalorder %s423_s21, 1  ;;  %s423_s21 = sphi %s460_s21, %s16_s21  }
   0x2   : > { %p213_p1 = scmp.lt.s32.totalorder %s423_s21, 3 }
   0x4   : > { %p214_p2 = pnand %p388_p0, %p213_p1 }
   0x5   : > { %s389_s25 = sshll.u32 (!%p214_p2), %s384_s22, 1 }
   0x6   : > { %217 = sbr.rel (%p214_p2) target bundleno = 168 (0xa8), region = 44  ;;  %p244_p3 = scmp.lt.s32.totalorder (!%p214_p2), %s389_s25, 3 }
   0xb   : > { %v277_v0 = vld [vmem:[%s498_s3 + $0x8] sm:$0xf]  ;;  %vm291_vm0 = vcmask 1043456   ;;  %s503_s25 = smov (!%p244_p3, %s389_s25), 3  ;;  %v400_v4 = vld [vmem:[%s498_s3] sm:$0xff]  ;;  %vm287_vm1 = vcmask 195584  }
   0xc   : > { %v283_v1 = vunpack.c.l.b16 %v277_v0  ;;  %s390_s26 = sshll.u32 %s503_s25, 2  ;;  %v413_v5 = vld [vmem:[%s496_s1] ss:$0 sm:$0xff]  ;;  %vm325_vm2 = vcmask 191488  }
   0xd   : > { %s247_s7 = scalar_lea.vmem %s495_s0, %s390_s26  ;;  %v414_v9 = vld [vmem:[%s497_s2] ss:$0 sm:$0xff]  ;;  %s253_s18 = scalar_lea.vmem %s501_s6, %s390_s26 }
   0xe   : > { %v285_v2 = vpack.c.b16 %v283_v1, %v283_v1  ;;  %v402_v6 = vld [vmem:[%s247_s7] sm:$0xff]  }
   0xf   : > { %v403_v7 = vunpack.c.l.bf16 %v402_v6  ;;  %v404_v8 = vunpack.c.h.bf16 %v402_v6  ;;  %v415_v17 = vld [vmem:[%s499_s4] ss:$0 sm:$0xff] }
  0x10   : > { %v293_v3 = vsel %vm291_vm0, %v285_v2, 0  ;;  %v416_v18 = vld [vmem:[%s500_s5] ss:$0 sm:$0xff] }
  0x11   : > { %301 = vmatpush.bf16.msra.mxu0 %v293_v3  ;;  %v264_v10 = vmul.f32 %v413_v5, %v403_v7  ;;  %v265_v11 = vmul.f32 %v413_v5, %v404_v8 }
  0x13   : > { %v270_v12 = vadd.f32 %v414_v9, %v264_v10  ;;  %v271_v13 = vadd.f32 %v414_v9, %v265_v11 }
  0x15   : > { %302 = vmatpush.bf16.msra.mxu0 %v400_v4  ;;  %v272_v14 = vmax.f32 %v270_v12, 0.0  ;;  %v273_v15 = vmax.f32 %v271_v13, 0.0 }
  0x17   : > { %v274_v16 = vpack.c.bf16 %v273_v15, %v272_v14 }
  0x19   : > { %397 = vmatmul.msk.bf16.vlgmr.msra.gmra.mxu0 %vm287_vm1, %v274_v16 }
  0x96   : > { %v304_v19 = vpop.f32.mrf.mxu0 }
  0x97   : > { %v313_v20 = vmul.f32 %v415_v17, %v304_v19 }
  0x99   : > { %v319_v21 = vadd.f32 %v416_v18, %v313_v20 }
  0x9b   : > { %v321_v22 = vmax.f32 %v319_v21, 0.0 }
  0x9d   : > { %v323_v23 = vpack.c.bf16 %v321_v22, %v321_v22 }
  0x9e   : > { %v306_v24 = vpop.f32.mrf.mxu0 }
  0x9f   : > { %326 = vst.msk [vmem:[%s253_s18] sm:$0xf] %vm325_vm2, %v323_v23  ;;  %v314_v25 = vmul.f32 %v415_v17, %v306_v24 }
  0xa1   : > { %v320_v26 = vadd.f32 %v416_v18, %v314_v25 }
  0xa3   : > { %v322_v27 = vmax.f32 %v320_v26, 0.0 }
  0xa5   : > { %v324_v28 = vpack.c.bf16 %v322_v27, %v322_v27 }
  0xa7   : > { %327 = vst.msk [vmem:[%s253_s18 + $0x4] sm:$0xf] %vm325_vm2, %v324_v28 }
  0xa8 PF: > { %s16_s21 = sadd.s32 1, %s423_s21  }
  0xa9   : > { %p13_p4 = scmp.ge.s32.totalorder %s16_s21, 4  }
  0xab   :  { %15 = sbr.rel (!%p13_p4) target bundleno = 1 (0x1), region = 74 }

// kernel: _lambda_.21
= control target key start
LH: loop header
LB: loop body
LE: loop exit
PB: predicated region body
PF: predicated region fallthrough
CT: control target
= control target key end

     0   :  { %s489_s21 = smov 0   ;;  %s530_s0 = inlined_call_operand.vmem [shape: bf16[32,64], index: 0, kind: input, shape index: {}]   ;;  %s531_s1 = inlined_call_operand.vmem [shape: f32[1,64], index: 1, kind: input, shape index: {}]   ;;  %s532_s2 = inlined_call_operand.vmem [shape: f32[1,64], index: 2, kind: input, shape index: {}]   ;;  %s533_s3 = inlined_call_operand.vmem [shape: bf16[64,24], index: 3, kind: input, shape index: {}]   ;;  %s534_s4 = inlined_call_operand.vmem [shape: f32[1,24], index: 4, kind: input, shape index: {}]   ;;  %s535_s5 = inlined_call_operand.vmem [shape: f32[1,24], index: 5, kind: input, shape index: {}]   ;;  %s536_s6 = inlined_call_operand.vmem [shape: bf16[32,24], index: 6, kind: output, shape index: {}]  }
   0x1 LB: > { %s398_s22 = sadd.s32 4294967295, %s452_s21   ;;  %p402_p0 = scmp.ge.s32.totalorder %s452_s21, 1  ;;  %s452_s21 = sphi %s489_s21, %s16_s21  }
   0x2   : > { %p213_p1 = scmp.lt.s32.totalorder %s452_s21, 3 }
   0x4   : > { %p214_p2 = pnand %p402_p0, %p213_p1 }
   0x5   : > { %s403_s25 = sshll.u32 (!%p214_p2), %s398_s22, 1 }
   0x6   : > { %217 = sbr.rel (%p214_p2) target bundleno = 168 (0xa8), region = 44  ;;  %p244_p3 = scmp.lt.s32.totalorder (!%p214_p2), %s403_s25, 3 }
   0xb   : > { %v429_v0 = vld [vmem:[%s533_s3 + $0x18] sm:$0xff]  ;;  %v428_v1 = vld [vmem:[%s533_s3 + $0x10] sm:$0xff]  ;;  %s538_s25 = smov (!%p244_p3, %s403_s25), 3  ;;  %v427_v2 = vld [vmem:[%s533_s3 + $0x8] sm:$0xff]  ;;  %vm307_vm0 = vcmask 523264   ;;  %vm339_vm1 = vcmask 191488  }
   0xc   : > { %315 = vmatpush.bf16.msra.mxu0 %v429_v0  ;;  %s404_s28 = sshll.u32 %s538_s25, 2  ;;  %v442_v3 = vld [vmem:[%s531_s1] ss:$0 sm:$0xff] }
   0xd   : > { %s247_s9 = scalar_lea.vmem %s530_s0, %s404_s28  ;;  %v443_v7 = vld [vmem:[%s532_s2] ss:$0 sm:$0xff]  ;;  %s253_s23 = scalar_lea.vmem %s536_s6, %s404_s28 }
   0xe   : > { %v431_v4 = vld [vmem:[%s247_s9] sm:$0xff]  }
   0xf   : > { %v432_v5 = vunpack.c.l.bf16 %v431_v4  ;;  %v433_v6 = vunpack.c.h.bf16 %v431_v4  ;;  %v426_v8 = vld [vmem:[%s533_s3] sm:$0xff] }
  0x10   : > { %316 = vmatpush.bf16.msra.mxu0 %v428_v1  ;;  %v444_v16 = vld [vmem:[%s534_s4] ss:$0 sm:$0xff] }
  0x11   : > { %v264_v9 = vmul.f32 %v442_v3, %v432_v5  ;;  %v265_v10 = vmul.f32 %v442_v3, %v433_v6  ;;  %v445_v17 = vld [vmem:[%s535_s5] ss:$0 sm:$0xff] }
  0x13   : > { %v270_v11 = vadd.f32 %v443_v7, %v264_v9  ;;  %v271_v12 = vadd.f32 %v443_v7, %v265_v10 }
  0x14   : > { %317 = vmatpush.bf16.msra.mxu0 %v427_v2 }
  0x15   : > { %v272_v13 = vmax.f32 %v270_v11, 0.0  ;;  %v273_v14 = vmax.f32 %v271_v12, 0.0 }
  0x17   : > { %v274_v15 = vpack.c.bf16 %v273_v14, %v272_v13 }
  0x18   : > { %318 = vmatpush.bf16.msra.mxu0 %v426_v8 }
  0x1b   : > { %423 = vmatmul.msk.bf16.vlgmr.msra.gmra.mxu0 %vm307_vm0, %v274_v15 }
  0x98   : > { %v320_v18 = vpop.f32.mrf.mxu0 }
  0x99   : > { %v329_v19 = vmul.f32 %v444_v16, %v320_v18 }
  0x9b   : > { %v335_v20 = vadd.f32 %v445_v17, %v329_v19 }
  0x9d   : > { %v337_v21 = vpack.c.bf16 %v335_v20, %v335_v20 }
  0x9f   : > { %340 = vst.msk [vmem:[%s253_s23] sm:$0xf] %vm339_vm1, %v337_v21 }
  0xa0   : > { %v322_v22 = vpop.f32.mrf.mxu0 }
  0xa1   : > { %v330_v23 = vmul.f32 %v444_v16, %v322_v22 }
  0xa3   : > { %v336_v24 = vadd.f32 %v445_v17, %v330_v23 }
  0xa5   : > { %v338_v25 = vpack.c.bf16 %v336_v24, %v336_v24 }
  0xa7   : > { %341 = vst.msk [vmem:[%s253_s23 + $0x4] sm:$0xf] %vm339_vm1, %v338_v25 }
  0xa8 PF: > { %s16_s21 = sadd.s32 1, %s452_s21  }
  0xa9   : > { %p13_p4 = scmp.ge.s32.totalorder %s16_s21, 4  }
  0xab   :  { %15 = sbr.rel (!%p13_p4) target bundleno = 1 (0x1), region = 74 }

// kernel: _lambda_.23
= control target key start
LH: loop header
LB: loop body
LE: loop exit
PB: predicated region body
PF: predicated region fallthrough
CT: control target
= control target key end

     0   :  { %s643_s18 = smov 0   ;;  %s715_s0 = inlined_call_operand.vmem [shape: bf16[32,216], index: 0, kind: input, shape index: {}]   ;;  %s716_s1 = inlined_call_operand.vmem [shape: bf16[216,24], index: 1, kind: input, shape index: {}]   ;;  %s717_s2 = inlined_call_operand.vmem [shape: f32[1,24], index: 2, kind: input, shape index: {}]   ;;  %s718_s3 = inlined_call_operand.vmem [shape: f32[1,24], index: 3, kind: input, shape index: {}]   ;;  %s719_s4 = inlined_call_operand.vmem [shape: bf16[32,24], index: 4, kind: input, shape index: {}]   ;;  %s720_s5 = inlined_call_operand.vmem [shape: bf16[32,24], index: 5, kind: output, shape index: {}]  }
   0x1 LB: > { %s500_s19 = sadd.s32 4294967295, %s611_s18   ;;  %p504_p0 = scmp.ge.s32.totalorder %s611_s18, 1  ;;  %s611_s18 = sphi %s643_s18, %s15_s18  }
   0x2   : > { %p200_p1 = scmp.lt.s32.totalorder %s611_s18, 3 }
   0x4   : > { %p201_p2 = pnand %p504_p0, %p200_p1 }
   0x5   : > { %s505_s26 = sshll.u32 (!%p201_p2), %s500_s19, 1 }
   0x6   : > { %204 = sbr.rel (%p201_p2) target bundleno = 188 (0xbc), region = 40  ;;  %p235_p3 = scmp.lt.s32.totalorder (!%p201_p2), %s505_s26, 3 }
   0xb   : > { %v585_v0 = vld [vmem:[%s716_s1 + $0x38] sm:$0xff]  ;;  %v282_v1 = vld [vmem:[%s716_s1 + $0x68] sm:$0xf]  ;;  %vm377_vm0 = vcmask 1043456   ;;  %v584_v3 = vld [vmem:[%s716_s1 + $0x30] sm:$0xff]  ;;  %s722_s26 = smov (!%p235_p3, %s505_s26), 3 }
   0xc   : > { %v345_v2 = vunpack.c.l.b16 %v282_v1  ;;  %381 = vmatpush.bf16.msra.mxu0 %v585_v0  ;;  %v590_v6 = vld [vmem:[%s716_s1 + $0x60] sm:$0xff]  ;;  %v583_v7 = vld [vmem:[%s716_s1 + $0x28] sm:$0xff]  ;;  %v589_v8 = vld [vmem:[%s716_s1 + $0x58] sm:$0xff]  ;;  %s575_s14 = sshll.u32 %s722_s26, 3  ;;  %vm373_vm1 = vcmask 719872   ;;  %s509_s30 = sshll.u32 %s722_s26, 2 }
   0xd   : > { %v582_v9 = vld [vmem:[%s716_s1 + $0x20] sm:$0xff]  ;;  %v588_v10 = vld [vmem:[%s716_s1 + $0x50] sm:$0xff]  ;;  %v581_v11 = vld [vmem:[%s716_s1 + $0x18] sm:$0xff]  ;;  %s239_s22 = scalar_lea.vmem %s715_s0, %s575_s14  ;;  %s245_s8 = scalar_lea.vmem %s719_s4, %s509_s30  ;;  %vm429_vm2 = vcmask 191488  }
   0xe   : > { %v359_v4 = vpack.c.b16 %v345_v2, %v345_v2  ;;  %v587_v12 = vld [vmem:[%s716_s1 + $0x48] sm:$0xff]  ;;  %v580_v13 = vld [vmem:[%s716_s1 + $0x10] sm:$0xff]  ;;  %v586_v14 = vld [vmem:[%s716_s1 + $0x40] sm:$0xff]  ;;  %s251_s14 = scalar_lea.vmem %s720_s5, %s509_s30 }
   0xf   : > { %v579_v15 = vld [vmem:[%s716_s1 + $0x8] sm:$0xff]  ;;  %v576_v16 = vld [vmem:[%s239_s22 + $0x4] sm:$0xf]  ;;  %v514_v20 = vld [vmem:[%s239_s22] sm:$0xf] }
  0x10   : > { %v379_v5 = vsel %vm377_vm0, %v359_v4, 0  ;;  %382 = vmatpush.bf16.msra.mxu0 %v584_v3  ;;  %v516_v17 = vld [vmem:[%s239_s22 + $0x8] sm:$0xf0]  ;;  %v578_v19 = vld [vmem:[%s716_s1] sm:$0xff]  ;;  %v577_v21 = vld [vmem:[%s239_s22 + $0x4] sm:$0xf0] }
  0x11   : > { %397 = vmatpush.bf16.msra.mxu1 %v379_v5  ;;  %v519_v18 = vor.u32 %v576_v16, %v516_v17  ;;  %v515_v22 = vor.u32 %v577_v21, %v514_v20  ;;  %v603_v24 = vld [vmem:[%s717_s2] ss:$0 sm:$0xff] }
  0x12   : > { %v592_v26 = vld [vmem:[%s245_s8] sm:$0xff]  }
  0x13   : > { %v604_v28 = vld [vmem:[%s718_s3] ss:$0 sm:$0xff]  ;;  %v593_v30 = vunpack.c.l.bf16 %v592_v26  ;;  %v594_v38 = vunpack.c.h.bf16 %v592_v26 }
  0x14   : > { %383 = vmatpush.bf16.msra.mxu0 %v583_v7 }
  0x15   : > { %398 = vmatpush.bf16.msra.mxu1 %v590_v6 }
  0x18   : > { %384 = vmatpush.bf16.msra.mxu0 %v582_v9 }
  0x19   : > { %399 = vmatpush.bf16.msra.mxu1 %v589_v8 }
  0x1c   : > { %385 = vmatpush.bf16.msra.mxu0 %v581_v11 }
  0x1d   : > { %400 = vmatpush.bf16.msra.mxu1 %v588_v10 }
  0x20   : > { %386 = vmatpush.bf16.msra.mxu0 %v580_v13 }
  0x21   : > { %401 = vmatpush.bf16.msra.mxu1 %v587_v12 }
  0x24   : > { %387 = vmatpush.bf16.msra.mxu0 %v579_v15 }
  0x25   : > { %402 = vmatpush.bf16.msra.mxu1 %v586_v14 }
  0x28   : > { %572 = vmatmul.msk.bf16.vlgmr.msra.gmra.mxu1 %vm373_vm1, %v519_v18  ;;  %388 = vmatpush.bf16.msra.mxu0 %v578_v19 }
  0x2b   : > { %389 = vmatmul.bf16.vlgmr.msra.gmra.mxu0 %v515_v22 }
  0xa5   : > { %v404_v23 = vpop.f32.mrf.mxu1 }
  0xa8   : > { %v390_v25 = vpop.f32.mrf.mxu0 }
  0xa9   : > { %v405_v27 = vadd.f32 %v404_v23, %v390_v25 }
  0xab   : > { %v413_v29 = vmul.f32 %v603_v24, %v405_v27 }
  0xad   : > { %v419_v31 = vadd.f32 %v604_v28, %v413_v29  ;;  %v406_v33 = vpop.f32.mrf.mxu1 }
  0xaf   : > { %v425_v32 = vadd.f32 %v593_v30, %v419_v31 }
  0xb0   : > { %v392_v34 = vpop.f32.mrf.mxu0 }
  0xb1   : > { %v427_v35 = vpack.c.bf16 %v425_v32, %v425_v32  ;;  %v407_v36 = vadd.f32 %v406_v33, %v392_v34 }
  0xb3   : > { %430 = vst.msk [vmem:[%s251_s14] sm:$0xf] %vm429_vm2, %v427_v35  ;;  %v414_v37 = vmul.f32 %v603_v24, %v407_v36 }
  0xb5   : > { %v420_v39 = vadd.f32 %v604_v28, %v414_v37 }
  0xb7   : > { %v426_v40 = vadd.f32 %v594_v38, %v420_v39 }
  0xb9   : > { %v428_v41 = vpack.c.bf16 %v426_v40, %v426_v40 }
  0xbb   : > { %431 = vst.msk [vmem:[%s251_s14 + $0x4] sm:$0xf] %vm429_vm2, %v428_v41 }
  0xbc PF: > { %s15_s18 = sadd.s32 1, %s611_s18  }
  0xbd   : > { %p12_p4 = scmp.ge.s32.totalorder %s15_s18, 4  }
  0xbf   :  { %14 = sbr.rel (!%p12_p4) target bundleno = 1 (0x1), region = 73 }

// kernel: _lambda_.24
= control target key start
LH: loop header
LB: loop body
LE: loop exit
PB: predicated region body
PF: predicated region fallthrough
CT: control target
= control target key end

     0   :  { %s458_s21 = smov 0   ;;  %s493_s0 = inlined_call_operand.vmem [shape: bf16[32,24], index: 0, kind: input, shape index: {}]   ;;  %s494_s1 = inlined_call_operand.vmem [shape: f32[1,24], index: 1, kind: input, shape index: {}]   ;;  %s495_s2 = inlined_call_operand.vmem [shape: f32[1,24], index: 2, kind: input, shape index: {}]   ;;  %s496_s3 = inlined_call_operand.vmem [shape: bf16[24,64], index: 3, kind: input, shape index: {}]   ;;  %s497_s4 = inlined_call_operand.vmem [shape: f32[1,64], index: 4, kind: input, shape index: {}]   ;;  %s498_s5 = inlined_call_operand.vmem [shape: f32[1,64], index: 5, kind: input, shape index: {}]   ;;  %s499_s6 = inlined_call_operand.vmem [shape: bf16[32,64], index: 6, kind: output, shape index: {}]  }
   0x1 LB: > { %s382_s22 = sadd.s32 4294967295, %s421_s21   ;;  %p386_p0 = scmp.ge.s32.totalorder %s421_s21, 1  ;;  %s421_s21 = sphi %s458_s21, %s16_s21  }
   0x2   : > { %p213_p1 = scmp.lt.s32.totalorder %s421_s21, 3 }
   0x4   : > { %p214_p2 = pnand %p386_p0, %p213_p1 }
   0x5   : > { %s387_s25 = sshll.u32 (!%p214_p2), %s382_s22, 1 }
   0x6   : > { %217 = sbr.rel (%p214_p2) target bundleno = 166 (0xa6), region = 44  ;;  %p244_p3 = scmp.lt.s32.totalorder (!%p214_p2), %s387_s25, 3 }
   0xb   : > { %v277_v0 = vld [vmem:[%s496_s3 + $0x8] sm:$0xf]  ;;  %vm291_vm0 = vcmask 1043456   ;;  %s501_s25 = smov (!%p244_p3, %s387_s25), 3  ;;  %v398_v4 = vld [vmem:[%s496_s3] sm:$0xff]  ;;  %vm287_vm1 = vcmask 195584  }
   0xc   : > { %v283_v1 = vunpack.c.l.b16 %v277_v0  ;;  %s388_s26 = sshll.u32 %s501_s25, 2  ;;  %v411_v5 = vld [vmem:[%s494_s1] ss:$0 sm:$0xff]  ;;  %vm323_vm2 = vcmask 519168  }
   0xd   : > { %s247_s7 = scalar_lea.vmem %s493_s0, %s388_s26  ;;  %v412_v9 = vld [vmem:[%s495_s2] ss:$0 sm:$0xff]  ;;  %s253_s18 = scalar_lea.vmem %s499_s6, %s388_s26 }
   0xe   : > { %v285_v2 = vpack.c.b16 %v283_v1, %v283_v1  ;;  %v400_v6 = vld [vmem:[%s247_s7] sm:$0xff]  }
   0xf   : > { %v401_v7 = vunpack.c.l.bf16 %v400_v6  ;;  %v402_v8 = vunpack.c.h.bf16 %v400_v6  ;;  %v413_v17 = vld [vmem:[%s497_s4] ss:$0 sm:$0xff] }
  0x10   : > { %v293_v3 = vsel %vm291_vm0, %v285_v2, 0  ;;  %v414_v18 = vld [vmem:[%s498_s5] ss:$0 sm:$0xff] }
  0x11   : > { %301 = vmatpush.bf16.msra.mxu0 %v293_v3  ;;  %v264_v10 = vmul.f32 %v411_v5, %v401_v7  ;;  %v265_v11 = vmul.f32 %v411_v5, %v402_v8 }
  0x13   : > { %v270_v12 = vadd.f32 %v412_v9, %v264_v10  ;;  %v271_v13 = vadd.f32 %v412_v9, %v265_v11 }
  0x15   : > { %302 = vmatpush.bf16.msra.mxu0 %v398_v4  ;;  %v272_v14 = vmax.f32 %v270_v12, 0.0  ;;  %v273_v15 = vmax.f32 %v271_v13, 0.0 }
  0x17   : > { %v274_v16 = vpack.c.bf16 %v273_v15, %v272_v14 }
  0x19   : > { %395 = vmatmul.msk.bf16.vlgmr.msra.gmra.mxu0 %vm287_vm1, %v274_v16 }
  0x96   : > { %v304_v19 = vpop.f32.mrf.mxu0 }
  0x97   : > { %v313_v20 = vmul.f32 %v413_v17, %v304_v19 }
  0x99   : > { %v319_v21 = vadd.f32 %v414_v18, %v313_v20 }
  0x9b   : > { %v321_v22 = vpack.c.bf16 %v319_v21, %v319_v21 }
  0x9d   : > { %324 = vst.msk [vmem:[%s253_s18] sm:$0xf] %vm323_vm2, %v321_v22 }
  0x9e   : > { %v306_v23 = vpop.f32.mrf.mxu0 }
  0x9f   : > { %v314_v24 = vmul.f32 %v413_v17, %v306_v23 }
  0xa1   : > { %v320_v25 = vadd.f32 %v414_v18, %v314_v24 }
  0xa3   : > { %v322_v26 = vpack.c.bf16 %v320_v25, %v320_v25 }
  0xa5   : > { %325 = vst.msk [vmem:[%s253_s18 + $0x4] sm:$0xf] %vm323_vm2, %v322_v26 }
  0xa6 PF: > { %s16_s21 = sadd.s32 1, %s421_s21  }
  0xa7   : > { %p13_p4 = scmp.ge.s32.totalorder %s16_s21, 4  }
  0xa9   :  { %15 = sbr.rel (!%p13_p4) target bundleno = 1 (0x1), region = 74 }

// kernel: _lambda_.25
= control target key start
LH: loop header
LB: loop body
LE: loop exit
PB: predicated region body
PF: predicated region fallthrough
CT: control target
= control target key end

     0   :  { %s576_s21 = smov 0   ;;  %s640_s0 = inlined_call_operand.vmem [shape: bf16[128,32], index: 0, kind: input, shape index: {}]   ;;  %s641_s1 = inlined_call_operand.vmem [shape: f32[1,32], index: 1, kind: input, shape index: {}]   ;;  %s642_s2 = inlined_call_operand.vmem [shape: f32[1,32], index: 2, kind: input, shape index: {}]   ;;  %s643_s3 = inlined_call_operand.vmem [shape: bf16[32,16], index: 3, kind: input, shape index: {}]   ;;  %s644_s4 = inlined_call_operand.vmem [shape: f32[1,16], index: 4, kind: input, shape index: {}]   ;;  %s645_s5 = inlined_call_operand.vmem [shape: f32[1,16], index: 5, kind: input, shape index: {}]   ;;  %s646_s6 = inlined_call_operand.vmem [shape: bf16[128,16], index: 6, kind: output, shape index: {}]  }
   0x1 LB: > { %s471_s22 = sadd.s32 4294967295, %s539_s21   ;;  %p475_p0 = scmp.ge.s32.totalorder %s539_s21, 1  ;;  %s539_s21 = sphi %s576_s21, %s16_s21  }
   0x2   : > { %p213_p1 = scmp.lt.s32.totalorder %s539_s21, 3 }
   0x4   : > { %p214_p2 = pnand %p475_p0, %p213_p1 }
   0x5   : > { %s476_s25 = sshll.u32 (!%p214_p2), %s471_s22, 3 }
   0x6   : > { %217 = sbr.rel (%p214_p2) target bundleno = 176 (0xb0), region = 44  ;;  %p244_p3 = scmp.lt.s32.totalorder (!%p214_p2), %s476_s25, 15 }
   0xb   : > { %v495_v0 = vld [vmem:[%s643_s3 + $0x8] sm:$0xff]  ;;  %v494_v1 = vld [vmem:[%s643_s3] sm:$0xff]  ;;  %s648_s25 = smov (!%p244_p3, %s476_s25), 15  ;;  %vm324_vm0 = vcmask 261120   ;;  %vm406_vm1 = vcmask 125952  }
   0xc   : > { %343 = vmatpush.bf16.msra.mxu0 %v495_v0  ;;  %515 = vmatpush.bf16.msra.mxu1 %v495_v0  ;;  %s477_s28 = sshll.u32 %s648_s25, 2  ;;  %v529_v2 = vld [vmem:[%s641_s1] ss:$0 sm:$0xff] }
   0xd   : > { %516 = vmatpush.bf16.msra.mxu2 %v495_v0  ;;  %517 = vmatpush.bf16.msra.mxu3 %v495_v0  ;;  %s247_s7 = scalar_lea.vmem %s640_s0, %s477_s28  ;;  %v530_v8 = vld [vmem:[%s642_s2] ss:$0 sm:$0xff]  ;;  %s619_s18 = scalar_lea.vmem %s646_s6, %s477_s28 }
   0xe   : > { %v497_v3 = vld [vmem:[%s247_s7] sm:$0xff]   ;;  %v512_v4 = vld [vmem:[%s247_s7 + $0x8] sm:$0xff]   ;;  %v513_v5 = vld [vmem:[%s247_s7 + $0x10] sm:$0xff]  }
   0xf   : > { %v498_v6 = vunpack.c.l.bf16 %v497_v3  ;;  %v499_v7 = vunpack.c.h.bf16 %v497_v3  ;;  %v502_v9 = vunpack.c.l.bf16 %v512_v4  ;;  %v503_v10 = vunpack.c.h.bf16 %v512_v4  ;;  %v514_v11 = vld [vmem:[%s247_s7 + $0x18] sm:$0xff]   ;;  %v531_v44 = vld [vmem:[%s644_s4] ss:$0 sm:$0xff] }
  0x10   : > { %344 = vmatpush.bf16.msra.mxu0 %v494_v1  ;;  %518 = vmatpush.bf16.msra.mxu1 %v494_v1  ;;  %v506_v12 = vunpack.c.l.bf16 %v513_v5  ;;  %v507_v13 = vunpack.c.h.bf16 %v513_v5  ;;  %v510_v14 = vunpack.c.l.bf16 %v514_v11  ;;  %v511_v15 = vunpack.c.h.bf16 %v514_v11  ;;  %v532_v45 = vld [vmem:[%s645_s5] ss:$0 sm:$0xff] }
  0x11   : > { %519 = vmatpush.bf16.msra.mxu2 %v494_v1  ;;  %520 = vmatpush.bf16.msra.mxu3 %v494_v1  ;;  %v276_v16 = vmul.f32 %v529_v2, %v498_v6  ;;  %v277_v17 = vmul.f32 %v529_v2, %v499_v7  ;;  %v278_v18 = vmul.f32 %v529_v2, %v502_v9 }
  0x12   : > { %v279_v19 = vmul.f32 %v529_v2, %v503_v10  ;;  %v280_v20 = vmul.f32 %v529_v2, %v506_v12  ;;  %v281_v21 = vmul.f32 %v529_v2, %v507_v13  ;;  %v282_v22 = vmul.f32 %v529_v2, %v510_v14 }
  0x13   : > { %v283_v23 = vmul.f32 %v529_v2, %v511_v15  ;;  %v288_v24 = vadd.f32 %v530_v8, %v276_v16  ;;  %v289_v25 = vadd.f32 %v530_v8, %v277_v17  ;;  %v290_v26 = vadd.f32 %v530_v8, %v278_v18 }
  0x14   : > { %v291_v27 = vadd.f32 %v530_v8, %v279_v19  ;;  %v292_v28 = vadd.f32 %v530_v8, %v280_v20  ;;  %v293_v29 = vadd.f32 %v530_v8, %v281_v21  ;;  %v294_v30 = vadd.f32 %v530_v8, %v282_v22 }
  0x15   : > { %v295_v31 = vadd.f32 %v530_v8, %v283_v23  ;;  %v296_v32 = vmax.f32 %v288_v24, 0.0  ;;  %v297_v33 = vmax.f32 %v289_v25, 0.0  ;;  %v298_v34 = vmax.f32 %v290_v26, 0.0 }
  0x16   : > { %v299_v35 = vmax.f32 %v291_v27, 0.0  ;;  %v300_v36 = vmax.f32 %v292_v28, 0.0  ;;  %v301_v37 = vmax.f32 %v293_v29, 0.0  ;;  %v302_v38 = vmax.f32 %v294_v30, 0.0 }
  0x17   : > { %v303_v39 = vmax.f32 %v295_v31, 0.0  ;;  %v304_v40 = vpack.c.bf16 %v297_v33, %v296_v32 }
  0x18   : > { %v305_v41 = vpack.c.bf16 %v299_v35, %v298_v34  ;;  %v306_v42 = vpack.c.bf16 %v301_v37, %v300_v36 }
  0x19   : > { %v307_v43 = vpack.c.bf16 %v303_v39, %v302_v38  ;;  %488 = vmatmul.msk.bf16.vlgmr.msra.gmra.mxu0 %vm324_vm0, %v304_v40 }
  0x1a   : > { %489 = vmatmul.msk.bf16.vlgmr.msra.gmra.mxu1 %vm324_vm0, %v305_v41  ;;  %490 = vmatmul.msk.bf16.vlgmr.msra.gmra.mxu2 %vm324_vm0, %v306_v42 }
  0x1b   : > { %491 = vmatmul.msk.bf16.vlgmr.msra.gmra.mxu3 %vm324_vm0, %v307_v43 }
  0x96   : > { %v346_v46 = vpop.f32.mrf.mxu0 }
  0x97   : > { %v351_v47 = vpop.f32.mrf.mxu1  ;;  %v370_v48 = vmul.f32 %v531_v44, %v346_v46 }
  0x98   : > { %v372_v49 = vmul.f32 %v531_v44, %v351_v47 }
  0x99   : > { %v382_v50 = vadd.f32 %v532_v45, %v370_v48 }
  0x9a   : > { %v384_v51 = vadd.f32 %v532_v45, %v372_v49 }
  0x9b   : > { %v390_v52 = vmax.f32 %v382_v50, 0.0 }
  0x9c   : > { %v392_v53 = vmax.f32 %v384_v51, 0.0 }
  0x9d   : > { %v398_v54 = vpack.c.bf16 %v390_v52, %v390_v52  ;;  %v356_v56 = vpop.f32.mrf.mxu2 }
  0x9e   : > { %v400_v55 = vpack.c.bf16 %v392_v53, %v392_v53  ;;  %v361_v57 = vpop.f32.mrf.mxu3  ;;  %v374_v58 = vmul.f32 %v531_v44, %v356_v56  ;;  %v348_v60 = vpop.f32.mrf.mxu0 }
  0x9f   : > { %v376_v59 = vmul.f32 %v531_v44, %v361_v57  ;;  %v353_v61 = vpop.f32.mrf.mxu1  ;;  %407 = vst.msk [vmem:[%s619_s18] sm:$0xf] %vm406_vm1, %v398_v54  ;;  %v371_v62 = vmul.f32 %v531_v44, %v348_v60 }
  0xa0   : > { %v373_v63 = vmul.f32 %v531_v44, %v353_v61  ;;  %409 = vst.msk [vmem:[%s619_s18 + $0x8] sm:$0xf] %vm406_vm1, %v400_v55  ;;  %v386_v0 = vadd.f32 %v532_v45, %v374_v58 }
  0xa1   : > { %v388_v1 = vadd.f32 %v532_v45, %v376_v59  ;;  %v383_v2 = vadd.f32 %v532_v45, %v371_v62 }
  0xa2   : > { %v385_v3 = vadd.f32 %v532_v45, %v373_v63  ;;  %v394_v4 = vmax.f32 %v386_v0, 0.0 }
  0xa3   : > { %v396_v5 = vmax.f32 %v388_v1, 0.0  ;;  %v391_v6 = vmax.f32 %v383_v2, 0.0 }
  0xa4   : > { %v393_v7 = vmax.f32 %v385_v3, 0.0  ;;  %v402_v8 = vpack.c.bf16 %v394_v4, %v394_v4 }
  0xa5   : > { %v404_v9 = vpack.c.bf16 %v396_v5, %v396_v5  ;;  %v399_v10 = vpack.c.bf16 %v391_v6, %v391_v6  ;;  %v358_v12 = vpop.f32.mrf.mxu2 }
  0xa6   : > { %v401_v11 = vpack.c.bf16 %v393_v7, %v393_v7  ;;  %v363_v13 = vpop.f32.mrf.mxu3  ;;  %411 = vst.msk [vmem:[%s619_s18 + $0x10] sm:$0xf] %vm406_vm1, %v402_v8  ;;  %v375_v14 = vmul.f32 %v531_v44, %v358_v12 }
  0xa7   : > { %v377_v15 = vmul.f32 %v531_v44, %v363_v13  ;;  %413 = vst.msk [vmem:[%s619_s18 + $0x18] sm:$0xf] %vm406_vm1, %v404_v9 }
  0xa8   : > { %408 = vst.msk [vmem:[%s619_s18 + $0x4] sm:$0xf] %vm406_vm1, %v399_v10  ;;  %v387_v16 = vadd.f32 %v532_v45, %v375_v14 }
  0xa9   : > { %v389_v17 = vadd.f32 %v532_v45, %v377_v15  ;;  %410 = vst.msk [vmem:[%s619_s18 + $0xc] sm:$0xf] %vm406_vm1, %v401_v11 }
  0xaa   : > { %v395_v18 = vmax.f32 %v387_v16, 0.0 }
  0xab   : > { %v397_v19 = vmax.f32 %v389_v17, 0.0 }
  0xac   : > { %v403_v20 = vpack.c.bf16 %v395_v18, %v395_v18 }
  0xad   : > { %v405_v21 = vpack.c.bf16 %v397_v19, %v397_v19 }
  0xae   : > { %412 = vst.msk [vmem:[%s619_s18 + $0x14] sm:$0xf] %vm406_vm1, %v403_v20 }
  0xaf   : > { %414 = vst.msk [vmem:[%s619_s18 + $0x1c] sm:$0xf] %vm406_vm1, %v405_v21 }
  0xb0 PF: > { %s16_s21 = sadd.s32 1, %s539_s21  }
  0xb1   : > { %p13_p4 = scmp.ge.s32.totalorder %s16_s21, 4  }
  0xb3   :  { %15 = sbr.rel (!%p13_p4) target bundleno = 1 (0x1), region = 74 }

// kernel: _lambda_.26
= control target key start
LH: loop header
LB: loop body
LE: loop exit
PB: predicated region body
PF: predicated region fallthrough
CT: control target
= control target key end

     0   :  { %s671_s15 = smov 0   ;;  %s771_s0 = inlined_call_operand.vmem [shape: bf16[128,176], index: 0, kind: input, shape index: {}]   ;;  %s772_s1 = inlined_call_operand.vmem [shape: bf16[176,16], index: 1, kind: input, shape index: {}]   ;;  %s773_s2 = inlined_call_operand.vmem [shape: f32[1,16], index: 2, kind: input, shape index: {}]   ;;  %s774_s3 = inlined_call_operand.vmem [shape: f32[1,16], index: 3, kind: input, shape index: {}]   ;;  %s775_s4 = inlined_call_operand.vmem [shape: bf16[128,16], index: 4, kind: output, shape index: {}]  }
   0x1 LB: > { %s505_s16 = sadd.s32 4294967295, %s644_s15   ;;  %p509_p0 = scmp.ge.s32.totalorder %s644_s15, 1  ;;  %s644_s15 = sphi %s671_s15, %s14_s15  }
   0x2   : > { %p164_p1 = scmp.lt.s32.totalorder %s644_s15, 3 }
   0x4   : > { %p165_p2 = pnand %p509_p0, %p164_p1 }
   0x5   : > { %s510_s21 = sshll.u32 (!%p165_p2), %s505_s16, 3 }
   0x6   : > { %168 = sbr.rel (%p165_p2) target bundleno = 209 (0xd1), region = 36  ;;  %p192_p3 = scmp.lt.s32.totalorder (!%p165_p2), %s510_s21, 15 }
   0xb   : > { %v613_v0 = vld [vmem:[%s772_s1 + $0x38] sm:$0xff]  ;;  %v616_v1 = vld [vmem:[%s772_s1 + $0x50] sm:$0xff]  ;;  %v615_v3 = vld [vmem:[%s772_s1 + $0x48] sm:$0xff]  ;;  %s777_s21 = smov (!%p192_p3, %s510_s21), 15  ;;  %vm337_vm0 = vcmask 392192   ;;  %vm440_vm1 = vcmask 125952  }
   0xc   : > { %350 = vmatpush.bf16.msra.mxu0 %v613_v0  ;;  %617 = vmatpush.bf16.msra.mxu2 %v613_v0  ;;  %v612_v2 = vld [vmem:[%s772_s1 + $0x30] sm:$0xff]  ;;  %s597_s26 = sshll.u32 %s777_s21, 3  ;;  %v611_v4 = vld [vmem:[%s772_s1 + $0x28] sm:$0xff]  ;;  %v614_v5 = vld [vmem:[%s772_s1 + $0x40] sm:$0xff]  ;;  %s514_s24 = sshll.u32 %s777_s21, 2 }
   0xd   : > { %625 = vmatpush.bf16.msra.mxu3 %v616_v1  ;;  %384 = vmatpush.bf16.msra.mxu1 %v616_v1  ;;  %s700_s5 = scalar_lea.vmem %s771_s0, %s597_s26  ;;  %v610_v10 = vld [vmem:[%s772_s1 + $0x20] sm:$0xff]  ;;  %v609_v13 = vld [vmem:[%s772_s1 + $0x18] sm:$0xff]  ;;  %v608_v14 = vld [vmem:[%s772_s1 + $0x10] sm:$0xff]  ;;  %s750_s27 = scalar_lea.vmem %s775_s4, %s514_s24 }
   0xe   : > { %v600_v6 = vld [vmem:[%s700_s5 + $0x14] sm:$0xf]  ;;  %v527_v7 = vld [vmem:[%s700_s5 + $0x18] sm:$0xf0]  ;;  %v598_v8 = vld [vmem:[%s700_s5 + $0x4] sm:$0xf] }
   0xf   : > { %v530_v9 = vor.u32 %v600_v6, %v527_v7  ;;  %v519_v11 = vld [vmem:[%s700_s5 + $0x8] sm:$0xf0]  ;;  %v602_v16 = vld [vmem:[%s700_s5 + $0x24] sm:$0xf]  ;;  %v517_v20 = vld [vmem:[%s700_s5] sm:$0xf] }
  0x10   : > { %351 = vmatpush.bf16.msra.mxu0 %v612_v2  ;;  %618 = vmatpush.bf16.msra.mxu2 %v612_v2  ;;  %v522_v12 = vor.u32 %v598_v8, %v519_v11  ;;  %v607_v15 = vld [vmem:[%s772_s1 + $0x8] sm:$0xff]  ;;  %v606_v19 = vld [vmem:[%s772_s1] sm:$0xff]  ;;  %v604_v26 = vld [vmem:[%s700_s5 + $0x34] sm:$0xf] }
  0x11   : > { %626 = vmatpush.bf16.msra.mxu3 %v615_v3  ;;  %385 = vmatpush.bf16.msra.mxu1 %v615_v3  ;;  %v535_v17 = vld [vmem:[%s700_s5 + $0x28] sm:$0xf0]  ;;  %v599_v21 = vld [vmem:[%s700_s5 + $0x4] sm:$0xf0]  ;;  %v533_v22 = vld [vmem:[%s700_s5 + $0x20] sm:$0xf] }
  0x12   : > { %v538_v18 = vor.u32 %v602_v16, %v535_v17  ;;  %v603_v23 = vld [vmem:[%s700_s5 + $0x24] sm:$0xf0]  ;;  %v518_v24 = vor.u32 %v599_v21, %v517_v20  ;;  %v543_v27 = vld [vmem:[%s700_s5 + $0x38] sm:$0xf0]  ;;  %v525_v29 = vld [vmem:[%s700_s5 + $0x10] sm:$0xf] }
  0x13   : > { %v534_v25 = vor.u32 %v603_v23, %v533_v22  ;;  %v546_v28 = vor.u32 %v604_v26, %v543_v27  ;;  %v601_v30 = vld [vmem:[%s700_s5 + $0x14] sm:$0xf0]  ;;  %v541_v31 = vld [vmem:[%s700_s5 + $0x30] sm:$0xf]  ;;  %v636_v38 = vld [vmem:[%s773_s2] ss:$0 sm:$0xff] }
  0x14   : > { %352 = vmatpush.bf16.msra.mxu0 %v611_v4  ;;  %619 = vmatpush.bf16.msra.mxu2 %v611_v4  ;;  %v605_v32 = vld [vmem:[%s700_s5 + $0x34] sm:$0xf0]  ;;  %v526_v33 = vor.u32 %v601_v30, %v525_v29  ;;  %v637_v41 = vld [vmem:[%s774_s3] ss:$0 sm:$0xff] }
  0x15   : > { %627 = vmatpush.bf16.msra.mxu3 %v614_v5  ;;  %386 = vmatpush.bf16.msra.mxu1 %v614_v5  ;;  %v542_v34 = vor.u32 %v605_v32, %v541_v31 }
  0x18   : > { %592 = vmatmul.msk.bf16.vlgmr.msra.gmra.mxu3 %vm337_vm0, %v530_v9  ;;  %353 = vmatpush.bf16.msra.mxu0 %v610_v10 }
  0x19   : > { %620 = vmatpush.bf16.msra.mxu2 %v610_v10  ;;  %591 = vmatmul.msk.bf16.vlgmr.msra.gmra.mxu1 %vm337_vm0, %v522_v12 }
  0x1c   : > { %354 = vmatpush.bf16.msra.mxu0 %v609_v13 }
  0x1d   : > { %621 = vmatpush.bf16.msra.mxu2 %v609_v13 }
  0x20   : > { %355 = vmatpush.bf16.msra.mxu0 %v608_v14 }
  0x21   : > { %622 = vmatpush.bf16.msra.mxu2 %v608_v14 }
  0x24   : > { %356 = vmatpush.bf16.msra.mxu0 %v607_v15 }
  0x25   : > { %623 = vmatpush.bf16.msra.mxu2 %v607_v15 }
  0x28   : > { %593 = vmatmul.msk.bf16.gmra.mxu3 %vm337_vm0, %v538_v18  ;;  %357 = vmatpush.bf16.msra.mxu0 %v606_v19 }
  0x29   : > { %624 = vmatpush.bf16.msra.mxu2 %v606_v19 }
  0x2b   : > { %358 = vmatmul.bf16.vlgmr.msra.gmra.mxu0 %v518_v24 }
  0x2c   : > { %368 = vmatmul.bf16.vlgmr.msra.gmra.mxu2 %v534_v25 }
  0x38   : > { %594 = vmatmul.msk.bf16.gmra.mxu3 %vm337_vm0, %v546_v28 }
  0x3b   : > { %363 = vmatmul.bf16.gmra.mxu0 %v526_v33 }
  0x3c   : > { %373 = vmatmul.bf16.gmra.mxu2 %v542_v34 }
  0x96   : > { %v388_v37 = vpop.f32.mrf.mxu1 }
  0x9b   : > { %v393_v35 = vpop.f32.mrf.mxu3 }
  0x9e   : > { %v390_v45 = vpop.f32.mrf.mxu1 }
  0xa3   : > { %v395_v36 = vpop.f32.mrf.mxu3 }
  0xa8   : > { %v359_v39 = vpop.f32.mrf.mxu0 }
  0xa9   : > { %v389_v40 = vadd.f32 %v388_v37, %v359_v39 }
  0xab   : > { %v412_v42 = vmul.f32 %v636_v38, %v389_v40  ;;  %v398_v43 = vpop.f32.mrf.mxu3 }
  0xad   : > { %v424_v44 = vadd.f32 %v637_v41, %v412_v42 }
  0xaf   : > { %v432_v46 = vpack.c.bf16 %v424_v44, %v424_v44  ;;  %v369_v47 = vpop.f32.mrf.mxu2 }
  0xb0   : > { %v399_v48 = vadd.f32 %v398_v43, %v369_v47  ;;  %v361_v49 = vpop.f32.mrf.mxu0 }
  0xb1   : > { %441 = vst.msk [vmem:[%s750_s27] sm:$0xf] %vm440_vm1, %v432_v46  ;;  %v391_v50 = vadd.f32 %v390_v45, %v361_v49 }
  0xb2   : > { %v416_v51 = vmul.f32 %v636_v38, %v399_v48 }
  0xb3   : > { %v413_v52 = vmul.f32 %v636_v38, %v391_v50  ;;  %v400_v53 = vpop.f32.mrf.mxu3 }
  0xb4   : > { %v428_v54 = vadd.f32 %v637_v41, %v416_v51 }
  0xb5   : > { %v425_v55 = vadd.f32 %v637_v41, %v413_v52 }
  0xb6   : > { %v436_v56 = vpack.c.bf16 %v428_v54, %v428_v54 }
  0xb7   : > { %v433_v57 = vpack.c.bf16 %v425_v55, %v425_v55  ;;  %v371_v58 = vpop.f32.mrf.mxu2 }
  0xb8   : > { %445 = vst.msk [vmem:[%s750_s27 + $0x10] sm:$0xf] %vm440_vm1, %v436_v56  ;;  %v401_v59 = vadd.f32 %v400_v53, %v371_v58  ;;  %v364_v60 = vpop.f32.mrf.mxu0 }
  0xb9   : > { %442 = vst.msk [vmem:[%s750_s27 + $0x4] sm:$0xf] %vm440_vm1, %v433_v57  ;;  %v394_v61 = vadd.f32 %v393_v35, %v364_v60 }
  0xba   : > { %v417_v62 = vmul.f32 %v636_v38, %v401_v59 }
  0xbb   : > { %v414_v63 = vmul.f32 %v636_v38, %v394_v61  ;;  %v403_v2 = vpop.f32.mrf.mxu3 }
  0xbc   : > { %v429_v0 = vadd.f32 %v637_v41, %v417_v62 }
  0xbd   : > { %v426_v1 = vadd.f32 %v637_v41, %v414_v63 }
  0xbe   : > { %v437_v3 = vpack.c.bf16 %v429_v0, %v429_v0 }
  0xbf   : > { %v434_v4 = vpack.c.bf16 %v426_v1, %v426_v1  ;;  %v374_v5 = vpop.f32.mrf.mxu2 }
  0xc0   : > { %446 = vst.msk [vmem:[%s750_s27 + $0x14] sm:$0xf] %vm440_vm1, %v437_v3  ;;  %v404_v6 = vadd.f32 %v403_v2, %v374_v5  ;;  %v366_v7 = vpop.f32.mrf.mxu0 }
  0xc1   : > { %443 = vst.msk [vmem:[%s750_s27 + $0x8] sm:$0xf] %vm440_vm1, %v434_v4  ;;  %v396_v8 = vadd.f32 %v395_v36, %v366_v7 }
  0xc2   : > { %v418_v9 = vmul.f32 %v636_v38, %v404_v6 }
  0xc3   : > { %v415_v10 = vmul.f32 %v636_v38, %v396_v8  ;;  %v405_v15 = vpop.f32.mrf.mxu3 }
  0xc4   : > { %v430_v11 = vadd.f32 %v637_v41, %v418_v9 }
  0xc5   : > { %v427_v12 = vadd.f32 %v637_v41, %v415_v10 }
  0xc6   : > { %v438_v13 = vpack.c.bf16 %v430_v11, %v430_v11 }
  0xc7   : > { %v435_v14 = vpack.c.bf16 %v427_v12, %v427_v12  ;;  %v376_v16 = vpop.f32.mrf.mxu2 }
  0xc8   : > { %447 = vst.msk [vmem:[%s750_s27 + $0x18] sm:$0xf] %vm440_vm1, %v438_v13  ;;  %v406_v17 = vadd.f32 %v405_v15, %v376_v16 }
  0xc9   : > { %444 = vst.msk [vmem:[%s750_s27 + $0xc] sm:$0xf] %vm440_vm1, %v435_v14 }
  0xca   : > { %v419_v18 = vmul.f32 %v636_v38, %v406_v17 }
  0xcc   : > { %v431_v19 = vadd.f32 %v637_v41, %v419_v18 }
  0xce   : > { %v439_v20 = vpack.c.bf16 %v431_v19, %v431_v19 }
  0xd0   : > { %448 = vst.msk [vmem:[%s750_s27 + $0x1c] sm:$0xf] %vm440_vm1, %v439_v20 }
  0xd1 PF: > { %s14_s15 = sadd.s32 1, %s644_s15  }
  0xd2   : > { %p11_p4 = scmp.ge.s32.totalorder %s14_s15, 4  }
  0xd4   :  { %13 = sbr.rel (!%p11_p4) target bundleno = 1 (0x1), region = 66 }

// kernel: _lambda_.27
= control target key start
LH: loop header
LB: loop body
LE: loop exit
PB: predicated region body
PF: predicated region fallthrough
CT: control target
= control target key end

     0   :  { %s552_s21 = smov 0   ;;  %s613_s0 = inlined_call_operand.vmem [shape: bf16[128,16], index: 0, kind: input, shape index: {}]   ;;  %s614_s1 = inlined_call_operand.vmem [shape: f32[1,16], index: 1, kind: input, shape index: {}]   ;;  %s615_s2 = inlined_call_operand.vmem [shape: f32[1,16], index: 2, kind: input, shape index: {}]   ;;  %s616_s3 = inlined_call_operand.vmem [shape: bf16[16,32], index: 3, kind: input, shape index: {}]   ;;  %s617_s4 = inlined_call_operand.vmem [shape: f32[1,32], index: 4, kind: input, shape index: {}]   ;;  %s618_s5 = inlined_call_operand.vmem [shape: f32[1,32], index: 5, kind: input, shape index: {}]   ;;  %s619_s6 = inlined_call_operand.vmem [shape: bf16[128,32], index: 6, kind: output, shape index: {}]  }
   0x1 LB: > { %s455_s22 = sadd.s32 4294967295, %s515_s21   ;;  %p459_p0 = scmp.ge.s32.totalorder %s515_s21, 1  ;;  %s515_s21 = sphi %s552_s21, %s16_s21  }
   0x2   : > { %p213_p1 = scmp.lt.s32.totalorder %s515_s21, 3 }
   0x4   : > { %p214_p2 = pnand %p459_p0, %p213_p1 }
   0x5   : > { %s460_s25 = sshll.u32 (!%p214_p2), %s455_s22, 3 }
   0x6   : > { %217 = sbr.rel (%p214_p2) target bundleno = 174 (0xae), region = 44  ;;  %p244_p3 = scmp.lt.s32.totalorder (!%p214_p2), %s460_s25, 15 }
   0xb   : > { %v474_v0 = vld [vmem:[%s616_s3] sm:$0xff]  ;;  %s621_s25 = smov (!%p244_p3, %s460_s25), 15  ;;  %vm316_vm0 = vcmask 130048   ;;  %vm390_vm1 = vcmask 257024  }
   0xc   : > { %336 = vmatpush.bf16.msra.mxu0 %v474_v0  ;;  %494 = vmatpush.bf16.msra.mxu1 %v474_v0  ;;  %s461_s26 = sshll.u32 %s621_s25, 2  ;;  %v505_v1 = vld [vmem:[%s614_s1] ss:$0 sm:$0xff] }
   0xd   : > { %495 = vmatpush.bf16.msra.mxu2 %v474_v0  ;;  %496 = vmatpush.bf16.msra.mxu3 %v474_v0  ;;  %s247_s29 = scalar_lea.vmem %s613_s0, %s461_s26  ;;  %v506_v7 = vld [vmem:[%s615_s2] ss:$0 sm:$0xff]  ;;  %s592_s16 = scalar_lea.vmem %s619_s6, %s461_s26 }
   0xe   : > { %v476_v2 = vld [vmem:[%s247_s29] sm:$0xff]   ;;  %v491_v3 = vld [vmem:[%s247_s29 + $0x8] sm:$0xff]   ;;  %v492_v4 = vld [vmem:[%s247_s29 + $0x10] sm:$0xff]  }
   0xf   : > { %v477_v5 = vunpack.c.l.bf16 %v476_v2  ;;  %v478_v6 = vunpack.c.h.bf16 %v476_v2  ;;  %v481_v8 = vunpack.c.l.bf16 %v491_v3  ;;  %v482_v9 = vunpack.c.h.bf16 %v491_v3  ;;  %v493_v10 = vld [vmem:[%s247_s29 + $0x18] sm:$0xff]   ;;  %v507_v43 = vld [vmem:[%s617_s4] ss:$0 sm:$0xff] }
  0x10   : > { %v485_v11 = vunpack.c.l.bf16 %v492_v4  ;;  %v486_v12 = vunpack.c.h.bf16 %v492_v4  ;;  %v489_v13 = vunpack.c.l.bf16 %v493_v10  ;;  %v490_v14 = vunpack.c.h.bf16 %v493_v10  ;;  %v508_v44 = vld [vmem:[%s618_s5] ss:$0 sm:$0xff] }
  0x11   : > { %v276_v15 = vmul.f32 %v505_v1, %v477_v5  ;;  %v277_v16 = vmul.f32 %v505_v1, %v478_v6  ;;  %v278_v17 = vmul.f32 %v505_v1, %v481_v8  ;;  %v279_v18 = vmul.f32 %v505_v1, %v482_v9 }
  0x12   : > { %v280_v19 = vmul.f32 %v505_v1, %v485_v11  ;;  %v281_v20 = vmul.f32 %v505_v1, %v486_v12  ;;  %v282_v21 = vmul.f32 %v505_v1, %v489_v13  ;;  %v283_v22 = vmul.f32 %v505_v1, %v490_v14 }
  0x13   : > { %v288_v23 = vadd.f32 %v506_v7, %v276_v15  ;;  %v289_v24 = vadd.f32 %v506_v7, %v277_v16  ;;  %v290_v25 = vadd.f32 %v506_v7, %v278_v17  ;;  %v291_v26 = vadd.f32 %v506_v7, %v279_v18 }
  0x14   : > { %v292_v27 = vadd.f32 %v506_v7, %v280_v19  ;;  %v293_v28 = vadd.f32 %v506_v7, %v281_v20  ;;  %v294_v29 = vadd.f32 %v506_v7, %v282_v21  ;;  %v295_v30 = vadd.f32 %v506_v7, %v283_v22 }
  0x15   : > { %v296_v31 = vmax.f32 %v288_v23, 0.0  ;;  %v297_v32 = vmax.f32 %v289_v24, 0.0  ;;  %v298_v33 = vmax.f32 %v290_v25, 0.0  ;;  %v299_v34 = vmax.f32 %v291_v26, 0.0 }
  0x16   : > { %v300_v35 = vmax.f32 %v292_v27, 0.0  ;;  %v301_v36 = vmax.f32 %v293_v28, 0.0  ;;  %v302_v37 = vmax.f32 %v294_v29, 0.0  ;;  %v303_v38 = vmax.f32 %v295_v30, 0.0 }
  0x17   : > { %v304_v39 = vpack.c.bf16 %v297_v32, %v296_v31  ;;  %v305_v40 = vpack.c.bf16 %v299_v34, %v298_v33 }
  0x18   : > { %v306_v41 = vpack.c.bf16 %v301_v36, %v300_v35  ;;  %v307_v42 = vpack.c.bf16 %v303_v38, %v302_v37 }
  0x19   : > { %468 = vmatmul.msk.bf16.vlgmr.msra.gmra.mxu0 %vm316_vm0, %v304_v39  ;;  %469 = vmatmul.msk.bf16.vlgmr.msra.gmra.mxu1 %vm316_vm0, %v305_v40 }
  0x1a   : > { %470 = vmatmul.msk.bf16.vlgmr.msra.gmra.mxu2 %vm316_vm0, %v306_v41  ;;  %471 = vmatmul.msk.bf16.vlgmr.msra.gmra.mxu3 %vm316_vm0, %v307_v42 }
  0x96   : > { %v338_v45 = vpop.f32.mrf.mxu0  ;;  %v343_v46 = vpop.f32.mrf.mxu1 }
  0x97   : > { %v362_v47 = vmul.f32 %v507_v43, %v338_v45  ;;  %v364_v48 = vmul.f32 %v507_v43, %v343_v46 }
  0x99   : > { %v374_v49 = vadd.f32 %v508_v44, %v362_v47  ;;  %v376_v50 = vadd.f32 %v508_v44, %v364_v48 }
  0x9b   : > { %v382_v51 = vpack.c.bf16 %v374_v49, %v374_v49  ;;  %v384_v52 = vpack.c.bf16 %v376_v50, %v376_v50 }
  0x9d   : > { %391 = vst.msk [vmem:[%s592_s16] sm:$0xf] %vm390_vm1, %v382_v51  ;;  %v348_v53 = vpop.f32.mrf.mxu2  ;;  %v353_v54 = vpop.f32.mrf.mxu3 }
  0x9e   : > { %393 = vst.msk [vmem:[%s592_s16 + $0x8] sm:$0xf] %vm390_vm1, %v384_v52  ;;  %v366_v55 = vmul.f32 %v507_v43, %v348_v53  ;;  %v368_v56 = vmul.f32 %v507_v43, %v353_v54  ;;  %v340_v57 = vpop.f32.mrf.mxu0  ;;  %v345_v58 = vpop.f32.mrf.mxu1 }
  0x9f   : > { %v363_v59 = vmul.f32 %v507_v43, %v340_v57  ;;  %v365_v60 = vmul.f32 %v507_v43, %v345_v58 }
  0xa0   : > { %v378_v61 = vadd.f32 %v508_v44, %v366_v55  ;;  %v380_v62 = vadd.f32 %v508_v44, %v368_v56 }
  0xa1   : > { %v375_v63 = vadd.f32 %v508_v44, %v363_v59  ;;  %v377_v0 = vadd.f32 %v508_v44, %v365_v60 }
  0xa2   : > { %v386_v1 = vpack.c.bf16 %v378_v61, %v378_v61  ;;  %v388_v2 = vpack.c.bf16 %v380_v62, %v380_v62 }
  0xa3   : > { %v383_v3 = vpack.c.bf16 %v375_v63, %v375_v63  ;;  %v385_v4 = vpack.c.bf16 %v377_v0, %v377_v0 }
  0xa4   : > { %395 = vst.msk [vmem:[%s592_s16 + $0x10] sm:$0xf] %vm390_vm1, %v386_v1 }
  0xa5   : > { %397 = vst.msk [vmem:[%s592_s16 + $0x18] sm:$0xf] %vm390_vm1, %v388_v2  ;;  %v350_v5 = vpop.f32.mrf.mxu2  ;;  %v355_v6 = vpop.f32.mrf.mxu3 }
  0xa6   : > { %392 = vst.msk [vmem:[%s592_s16 + $0x4] sm:$0xf] %vm390_vm1, %v383_v3  ;;  %v367_v7 = vmul.f32 %v507_v43, %v350_v5  ;;  %v369_v8 = vmul.f32 %v507_v43, %v355_v6 }
  0xa7   : > { %394 = vst.msk [vmem:[%s592_s16 + $0xc] sm:$0xf] %vm390_vm1, %v385_v4 }
  0xa8   : > { %v379_v9 = vadd.f32 %v508_v44, %v367_v7  ;;  %v381_v10 = vadd.f32 %v508_v44, %v369_v8 }
  0xaa   : > { %v387_v11 = vpack.c.bf16 %v379_v9, %v379_v9  ;;  %v389_v12 = vpack.c.bf16 %v381_v10, %v381_v10 }
  0xac   : > { %396 = vst.msk [vmem:[%s592_s16 + $0x14] sm:$0xf] %vm390_vm1, %v387_v11 }
  0xad   : > { %398 = vst.msk [vmem:[%s592_s16 + $0x1c] sm:$0xf] %vm390_vm1, %v389_v12 }
  0xae PF: > { %s16_s21 = sadd.s32 1, %s515_s21  }
  0xaf   : > { %p13_p4 = scmp.ge.s32.totalorder %s16_s21, 4  }
  0xb1   :  { %15 = sbr.rel (!%p13_p4) target bundleno = 1 (0x1), region = 74 }

// kernel: _lambda_.28
= control target key start
LH: loop header
LB: loop body
LE: loop exit
PB: predicated region body
PF: predicated region fallthrough
CT: control target
= control target key end

     0   :  { %s980_s21 = smov 0   ;;  %s1255_s0 = inlined_call_operand.vmem [shape: bf16[512,16], index: 0, kind: input, shape index: {}]   ;;  %s1256_s1 = inlined_call_operand.vmem [shape: f32[1,16], index: 1, kind: input, shape index: {}]   ;;  %s1257_s2 = inlined_call_operand.vmem [shape: f32[1,16], index: 2, kind: input, shape index: {}]   ;;  %s1258_s3 = inlined_call_operand.vmem [shape: bf16[16,8], index: 3, kind: input, shape index: {}]   ;;  %s1259_s4 = inlined_call_operand.vmem [shape: f32[1,8], index: 4, kind: input, shape index: {}]   ;;  %s1260_s5 = inlined_call_operand.vmem [shape: f32[1,8], index: 5, kind: input, shape index: {}]   ;;  %s1261_s6 = inlined_call_operand.vmem [shape: bf16[512,8], index: 6, kind: output, shape index: {}]  }
   0x1 LB: > { %s811_s22 = sadd.s32 4294967295, %s943_s21   ;;  %p815_p0 = scmp.ge.s32.totalorder %s943_s21, 1  ;;  %s943_s21 = sphi %s980_s21, %s16_s21  }
   0x2   : > { %p213_p1 = scmp.lt.s32.totalorder %s943_s21, 3 }
   0x4   : > { %p214_p2 = pnand %p815_p0, %p213_p1 }
   0x5   : > { %s816_s25 = sshll.u32 (!%p214_p2), %s811_s22, 5 }
   0x6   : > { %217 = sbr.rel (%p214_p2) target bundleno = 225 (0xe1), region = 44  ;;  %p244_p3 = scmp.lt.s32.totalorder (!%p214_p2), %s816_s25, 63 }
   0xb   : > { %v842_v0 = vld [vmem:[%s1258_s3] sm:$0xff]  ;;  %s1263_s25 = smov (!%p244_p3, %s816_s25), 63  ;;  %vm448_vm0 = vcmask 130048   ;;  %vm722_vm1 = vcmask 60416  }
   0xc   : > { %504 = vmatpush.bf16.msra.mxu0 %v842_v0  ;;  %922 = vmatpush.bf16.msra.mxu1 %v842_v0  ;;  %s817_s26 = sshll.u32 %s1263_s25, 2  ;;  %v1004_v1 = vld [vmem:[%s1256_s1] ss:$0 sm:$0xff] }
   0xd   : > { %923 = vmatpush.bf16.msra.mxu2 %v842_v0  ;;  %924 = vmatpush.bf16.msra.mxu3 %v842_v0  ;;  %s999_s29 = scalar_lea.vmem %s1255_s0, %s817_s26  ;;  %v1012_v7 = vld [vmem:[%s1257_s2] ss:$0 sm:$0xff]  ;;  %s1126_s16 = scalar_lea.vmem %s1261_s6, %s817_s26 }
   0xe   : > { %v844_v2 = vld [vmem:[%s999_s29] sm:$0xff]   ;;  %v907_v31 = vld [vmem:[%s999_s29 + $0x8] sm:$0xff]  }
   0xf   : > { %v910_v3 = vld [vmem:[%s999_s29 + $0x20] sm:$0xff]   ;;  %v845_v5 = vunpack.c.l.bf16 %v844_v2  ;;  %v846_v6 = vunpack.c.h.bf16 %v844_v2  ;;  %v911_v36 = vld [vmem:[%s999_s29 + $0x28] sm:$0xff]   ;;  %v849_v44 = vunpack.c.l.bf16 %v907_v31  ;;  %v850_v45 = vunpack.c.h.bf16 %v907_v31 }
  0x10   : > { %v914_v4 = vld [vmem:[%s999_s29 + $0x40] sm:$0xff]   ;;  %v861_v8 = vunpack.c.l.bf16 %v910_v3  ;;  %v862_v9 = vunpack.c.h.bf16 %v910_v3  ;;  %v915_v41 = vld [vmem:[%s999_s29 + $0x48] sm:$0xff]   ;;  %v865_v49 = vunpack.c.l.bf16 %v911_v36  ;;  %v866_v50 = vunpack.c.h.bf16 %v911_v36 }
  0x11   : > { %v918_v10 = vld [vmem:[%s999_s29 + $0x60] sm:$0xff]   ;;  %v877_v11 = vunpack.c.l.bf16 %v914_v4  ;;  %v878_v12 = vunpack.c.h.bf16 %v914_v4  ;;  %v324_v15 = vmul.f32 %v1004_v1, %v845_v5  ;;  %v325_v16 = vmul.f32 %v1004_v1, %v846_v6  ;;  %v919_v46 = vld [vmem:[%s999_s29 + $0x68] sm:$0xff]  }
  0x12   : > { %v893_v13 = vunpack.c.l.bf16 %v918_v10  ;;  %v894_v14 = vunpack.c.h.bf16 %v918_v10  ;;  %v332_v17 = vmul.f32 %v1004_v1, %v861_v8  ;;  %v333_v18 = vmul.f32 %v1004_v1, %v862_v9 }
  0x13   : > { %v340_v19 = vmul.f32 %v1004_v1, %v877_v11  ;;  %v341_v20 = vmul.f32 %v1004_v1, %v878_v12  ;;  %v360_v23 = vadd.f32 %v1012_v7, %v324_v15  ;;  %v361_v24 = vadd.f32 %v1012_v7, %v325_v16 }
  0x14   : > { %v348_v21 = vmul.f32 %v1004_v1, %v893_v13  ;;  %v349_v22 = vmul.f32 %v1004_v1, %v894_v14  ;;  %v368_v25 = vadd.f32 %v1012_v7, %v332_v17  ;;  %v369_v26 = vadd.f32 %v1012_v7, %v333_v18  ;;  %v908_v13 = vld [vmem:[%s999_s29 + $0x10] sm:$0xff]  }
  0x15   : > { %v376_v27 = vadd.f32 %v1012_v7, %v340_v19  ;;  %v377_v28 = vadd.f32 %v1012_v7, %v341_v20  ;;  %v392_v32 = vmax.f32 %v360_v23, 0.0  ;;  %v393_v33 = vmax.f32 %v361_v24, 0.0  ;;  %v912_v14 = vld [vmem:[%s999_s29 + $0x30] sm:$0xff]  }
  0x16   : > { %v384_v29 = vadd.f32 %v1012_v7, %v348_v21  ;;  %v385_v30 = vadd.f32 %v1012_v7, %v349_v22  ;;  %v400_v34 = vmax.f32 %v368_v25, 0.0  ;;  %v401_v35 = vmax.f32 %v369_v26, 0.0  ;;  %v916_v19 = vld [vmem:[%s999_s29 + $0x50] sm:$0xff]  }
  0x17   : > { %v408_v37 = vmax.f32 %v376_v27, 0.0  ;;  %v409_v38 = vmax.f32 %v377_v28, 0.0  ;;  %v424_v42 = vpack.c.bf16 %v393_v33, %v392_v32  ;;  %v326_v51 = vmul.f32 %v1004_v1, %v849_v44  ;;  %v920_v20 = vld [vmem:[%s999_s29 + $0x70] sm:$0xff]  }
  0x18   : > { %v416_v39 = vmax.f32 %v384_v29, 0.0  ;;  %v417_v40 = vmax.f32 %v385_v30, 0.0  ;;  %v428_v43 = vpack.c.bf16 %v401_v35, %v400_v34  ;;  %v327_v52 = vmul.f32 %v1004_v1, %v850_v45 }
  0x19   : > { %v432_v47 = vpack.c.bf16 %v409_v38, %v408_v37  ;;  %824 = vmatmul.msk.bf16.vlgmr.msra.gmra.mxu0 %vm448_vm0, %v424_v42  ;;  %v881_v53 = vunpack.c.l.bf16 %v915_v41  ;;  %v882_v54 = vunpack.c.h.bf16 %v915_v41  ;;  %v334_v55 = vmul.f32 %v1004_v1, %v865_v49 }
  0x1a   : > { %v436_v48 = vpack.c.bf16 %v417_v40, %v416_v39  ;;  %828 = vmatmul.msk.bf16.vlgmr.msra.gmra.mxu1 %vm448_vm0, %v428_v43  ;;  %v335_v56 = vmul.f32 %v1004_v1, %v866_v50  ;;  %v897_v57 = vunpack.c.l.bf16 %v919_v46  ;;  %v898_v58 = vunpack.c.h.bf16 %v919_v46 }
  0x1b   : > { %832 = vmatmul.msk.bf16.vlgmr.msra.gmra.mxu2 %vm448_vm0, %v432_v47  ;;  %v342_v59 = vmul.f32 %v1004_v1, %v881_v53  ;;  %v343_v60 = vmul.f32 %v1004_v1, %v882_v54  ;;  %v362_v63 = vadd.f32 %v1012_v7, %v326_v51  ;;  %v363_v0 = vadd.f32 %v1012_v7, %v327_v52 }
  0x1c   : > { %836 = vmatmul.msk.bf16.vlgmr.msra.gmra.mxu3 %vm448_vm0, %v436_v48  ;;  %v350_v61 = vmul.f32 %v1004_v1, %v897_v57  ;;  %v351_v62 = vmul.f32 %v1004_v1, %v898_v58  ;;  %v370_v2 = vadd.f32 %v1012_v7, %v334_v55  ;;  %v371_v3 = vadd.f32 %v1012_v7, %v335_v56  ;;  %v909_v55 = vld [vmem:[%s999_s29 + $0x18] sm:$0xff]  }
  0x1d   : > { %v378_v4 = vadd.f32 %v1012_v7, %v342_v59  ;;  %v379_v5 = vadd.f32 %v1012_v7, %v343_v60  ;;  %v394_v9 = vmax.f32 %v362_v63, 0.0  ;;  %v395_v10 = vmax.f32 %v363_v0, 0.0  ;;  %v913_v58 = vld [vmem:[%s999_s29 + $0x38] sm:$0xff]  }
  0x1e   : > { %v386_v6 = vadd.f32 %v1012_v7, %v350_v61  ;;  %v387_v8 = vadd.f32 %v1012_v7, %v351_v62  ;;  %v402_v11 = vmax.f32 %v370_v2, 0.0  ;;  %v403_v12 = vmax.f32 %v371_v3, 0.0  ;;  %v917_v59 = vld [vmem:[%s999_s29 + $0x58] sm:$0xff]  }
  0x1f   : > { %v410_v15 = vmax.f32 %v378_v4, 0.0  ;;  %v411_v16 = vmax.f32 %v379_v5, 0.0  ;;  %v853_v21 = vunpack.c.l.bf16 %v908_v13  ;;  %v854_v22 = vunpack.c.h.bf16 %v908_v13  ;;  %v921_v60 = vld [vmem:[%s999_s29 + $0x78] sm:$0xff]  }
  0x20   : > { %v418_v17 = vmax.f32 %v386_v6, 0.0  ;;  %v419_v18 = vmax.f32 %v387_v8, 0.0  ;;  %v869_v23 = vunpack.c.l.bf16 %v912_v14  ;;  %v870_v24 = vunpack.c.h.bf16 %v912_v14 }
  0x21   : > { %v425_v25 = vpack.c.bf16 %v395_v10, %v394_v9  ;;  %v429_v26 = vpack.c.bf16 %v403_v12, %v402_v11  ;;  %v885_v27 = vunpack.c.l.bf16 %v916_v19  ;;  %v886_v28 = vunpack.c.h.bf16 %v916_v19 }
  0x22   : > { %v433_v29 = vpack.c.bf16 %v411_v16, %v410_v15  ;;  %v437_v30 = vpack.c.bf16 %v419_v18, %v418_v17  ;;  %v901_v31 = vunpack.c.l.bf16 %v920_v20  ;;  %v902_v32 = vunpack.c.h.bf16 %v920_v20 }
  0x23   : > { %v328_v33 = vmul.f32 %v1004_v1, %v853_v21  ;;  %v329_v34 = vmul.f32 %v1004_v1, %v854_v22  ;;  %v336_v35 = vmul.f32 %v1004_v1, %v869_v23  ;;  %v337_v36 = vmul.f32 %v1004_v1, %v870_v24 }
  0x24   : > { %v344_v37 = vmul.f32 %v1004_v1, %v885_v27  ;;  %v345_v38 = vmul.f32 %v1004_v1, %v886_v28  ;;  %v352_v39 = vmul.f32 %v1004_v1, %v901_v31  ;;  %v353_v40 = vmul.f32 %v1004_v1, %v902_v32 }
  0x25   : > { %v364_v41 = vadd.f32 %v1012_v7, %v328_v33  ;;  %v365_v42 = vadd.f32 %v1012_v7, %v329_v34  ;;  %v372_v43 = vadd.f32 %v1012_v7, %v336_v35  ;;  %v373_v44 = vadd.f32 %v1012_v7, %v337_v36 }
  0x26   : > { %v380_v45 = vadd.f32 %v1012_v7, %v344_v37  ;;  %v381_v46 = vadd.f32 %v1012_v7, %v345_v38  ;;  %v388_v47 = vadd.f32 %v1012_v7, %v352_v39  ;;  %v389_v48 = vadd.f32 %v1012_v7, %v353_v40  ;;  %v1115_v38 = vld [vmem:[%s1260_s5] ss:$0 sm:$0xff] }
  0x27   : > { %v396_v49 = vmax.f32 %v364_v41, 0.0  ;;  %v397_v50 = vmax.f32 %v365_v42, 0.0  ;;  %v404_v51 = vmax.f32 %v372_v43, 0.0  ;;  %v405_v52 = vmax.f32 %v373_v44, 0.0 }
  0x28   : > { %v412_v53 = vmax.f32 %v380_v45, 0.0  ;;  %v413_v54 = vmax.f32 %v381_v46, 0.0  ;;  %v420_v56 = vmax.f32 %v388_v47, 0.0  ;;  %v421_v57 = vmax.f32 %v389_v48, 0.0 }
  0x29   : > { %825 = vmatmul.msk.bf16.gmra.mxu0 %vm448_vm0, %v425_v25  ;;  %v426_v61 = vpack.c.bf16 %v397_v50, %v396_v49  ;;  %v430_v62 = vpack.c.bf16 %v405_v52, %v404_v51  ;;  %v857_v63 = vunpack.c.l.bf16 %v909_v55  ;;  %v858_v0 = vunpack.c.h.bf16 %v909_v55 }
  0x2a   : > { %829 = vmatmul.msk.bf16.gmra.mxu1 %vm448_vm0, %v429_v26  ;;  %v434_v2 = vpack.c.bf16 %v413_v54, %v412_v53  ;;  %v873_v3 = vunpack.c.l.bf16 %v913_v58  ;;  %v874_v4 = vunpack.c.h.bf16 %v913_v58  ;;  %v889_v5 = vunpack.c.l.bf16 %v917_v59 }
  0x2b   : > { %833 = vmatmul.msk.bf16.gmra.mxu2 %vm448_vm0, %v433_v29  ;;  %v438_v6 = vpack.c.bf16 %v421_v57, %v420_v56  ;;  %v890_v8 = vunpack.c.h.bf16 %v917_v59  ;;  %v905_v9 = vunpack.c.l.bf16 %v921_v60  ;;  %v906_v10 = vunpack.c.h.bf16 %v921_v60 }
  0x2c   : > { %837 = vmatmul.msk.bf16.gmra.mxu3 %vm448_vm0, %v437_v30  ;;  %v330_v11 = vmul.f32 %v1004_v1, %v857_v63  ;;  %v331_v12 = vmul.f32 %v1004_v1, %v858_v0  ;;  %v338_v13 = vmul.f32 %v1004_v1, %v873_v3  ;;  %v339_v14 = vmul.f32 %v1004_v1, %v874_v4 }
  0x2d   : > { %v346_v15 = vmul.f32 %v1004_v1, %v889_v5  ;;  %v347_v16 = vmul.f32 %v1004_v1, %v890_v8  ;;  %v354_v17 = vmul.f32 %v1004_v1, %v905_v9  ;;  %v355_v18 = vmul.f32 %v1004_v1, %v906_v10 }
  0x2e   : > { %v366_v19 = vadd.f32 %v1012_v7, %v330_v11  ;;  %v367_v20 = vadd.f32 %v1012_v7, %v331_v12  ;;  %v374_v21 = vadd.f32 %v1012_v7, %v338_v13  ;;  %v375_v22 = vadd.f32 %v1012_v7, %v339_v14 }
  0x2f   : > { %v382_v23 = vadd.f32 %v1012_v7, %v346_v15  ;;  %v383_v24 = vadd.f32 %v1012_v7, %v347_v16  ;;  %v390_v25 = vadd.f32 %v1012_v7, %v354_v17  ;;  %v391_v26 = vadd.f32 %v1012_v7, %v355_v18  ;;  %v1110_v7 = vld [vmem:[%s1259_s4] ss:$0 sm:$0xff] }
  0x30   : > { %v398_v27 = vmax.f32 %v366_v19, 0.0  ;;  %v399_v28 = vmax.f32 %v367_v20, 0.0  ;;  %v406_v29 = vmax.f32 %v374_v21, 0.0  ;;  %v407_v1 = vmax.f32 %v375_v22, 0.0 }
  0x31   : > { %v414_v30 = vmax.f32 %v382_v23, 0.0  ;;  %v415_v31 = vmax.f32 %v383_v24, 0.0  ;;  %v422_v32 = vmax.f32 %v390_v25, 0.0  ;;  %v423_v33 = vmax.f32 %v391_v26, 0.0 }
  0x32   : > { %v427_v34 = vpack.c.bf16 %v399_v28, %v398_v27  ;;  %v431_v35 = vpack.c.bf16 %v407_v1, %v406_v29 }
  0x33   : > { %v435_v36 = vpack.c.bf16 %v415_v31, %v414_v30  ;;  %v439_v37 = vpack.c.bf16 %v423_v33, %v422_v32 }
  0x39   : > { %826 = vmatmul.msk.bf16.gmra.mxu0 %vm448_vm0, %v426_v61 }
  0x3a   : > { %830 = vmatmul.msk.bf16.gmra.mxu1 %vm448_vm0, %v430_v62 }
  0x3b   : > { %834 = vmatmul.msk.bf16.gmra.mxu2 %vm448_vm0, %v434_v2 }
  0x3c   : > { %838 = vmatmul.msk.bf16.gmra.mxu3 %vm448_vm0, %v438_v6 }
  0x49   : > { %827 = vmatmul.msk.bf16.gmra.mxu0 %vm448_vm0, %v427_v34 }
  0x4a   : > { %831 = vmatmul.msk.bf16.gmra.mxu1 %vm448_vm0, %v431_v35 }
  0x4b   : > { %835 = vmatmul.msk.bf16.gmra.mxu2 %vm448_vm0, %v435_v36 }
  0x4c   : > { %839 = vmatmul.msk.bf16.gmra.mxu3 %vm448_vm0, %v439_v37 }
  0x96   : > { %v506_v39 = vpop.f32.mrf.mxu0 }
  0x97   : > { %v526_v40 = vpop.f32.mrf.mxu1  ;;  %v590_v41 = vmul.f32 %v1110_v7, %v506_v39 }
  0x98   : > { %v598_v42 = vmul.f32 %v1110_v7, %v526_v40 }
  0x99   : > { %v626_v43 = vadd.f32 %v1115_v38, %v590_v41 }
  0x9a   : > { %v634_v44 = vadd.f32 %v1115_v38, %v598_v42 }
  0x9b   : > { %v658_v45 = vmax.f32 %v626_v43, 0.0 }
  0x9c   : > { %v666_v46 = vmax.f32 %v634_v44, 0.0 }
  0x9d   : > { %v690_v47 = vpack.c.bf16 %v658_v45, %v658_v45 }
  0x9e   : > { %v698_v48 = vpack.c.bf16 %v666_v46, %v666_v46  ;;  %v546_v49 = vpop.f32.mrf.mxu2  ;;  %v508_v53 = vpop.f32.mrf.mxu0 }
  0x9f   : > { %v566_v50 = vpop.f32.mrf.mxu3  ;;  %v606_v51 = vmul.f32 %v1110_v7, %v546_v49  ;;  %v528_v54 = vpop.f32.mrf.mxu1  ;;  %723 = vst.msk [vmem:[%s1126_s16] sm:$0xf] %vm722_vm1, %v690_v47  ;;  %v591_v55 = vmul.f32 %v1110_v7, %v508_v53 }
  0xa0   : > { %v614_v52 = vmul.f32 %v1110_v7, %v566_v50  ;;  %v599_v56 = vmul.f32 %v1110_v7, %v528_v54  ;;  %731 = vst.msk [vmem:[%s1126_s16 + $0x20] sm:$0xf] %vm722_vm1, %v698_v48 }
  0xa1   : > { %v642_v57 = vadd.f32 %v1115_v38, %v606_v51  ;;  %v627_v59 = vadd.f32 %v1115_v38, %v591_v55 }
  0xa2   : > { %v650_v58 = vadd.f32 %v1115_v38, %v614_v52  ;;  %v635_v60 = vadd.f32 %v1115_v38, %v599_v56 }
  0xa3   : > { %v674_v61 = vmax.f32 %v642_v57, 0.0  ;;  %v659_v63 = vmax.f32 %v627_v59, 0.0 }
  0xa4   : > { %v682_v62 = vmax.f32 %v650_v58, 0.0  ;;  %v667_v0 = vmax.f32 %v635_v60, 0.0 }
  0xa5   : > { %v706_v2 = vpack.c.bf16 %v674_v61, %v674_v61  ;;  %v691_v4 = vpack.c.bf16 %v659_v63, %v659_v63 }
  0xa6   : > { %v714_v3 = vpack.c.bf16 %v682_v62, %v682_v62  ;;  %v699_v5 = vpack.c.bf16 %v667_v0, %v667_v0  ;;  %v548_v6 = vpop.f32.mrf.mxu2  ;;  %v511_v11 = vpop.f32.mrf.mxu0 }
  0xa7   : > { %v568_v8 = vpop.f32.mrf.mxu3  ;;  %739 = vst.msk [vmem:[%s1126_s16 + $0x40] sm:$0xf] %vm722_vm1, %v706_v2  ;;  %v607_v9 = vmul.f32 %v1110_v7, %v548_v6  ;;  %v531_v12 = vpop.f32.mrf.mxu1  ;;  %v592_v13 = vmul.f32 %v1110_v7, %v511_v11 }
  0xa8   : > { %v615_v10 = vmul.f32 %v1110_v7, %v568_v8  ;;  %747 = vst.msk [vmem:[%s1126_s16 + $0x60] sm:$0xf] %vm722_vm1, %v714_v3  ;;  %v600_v14 = vmul.f32 %v1110_v7, %v531_v12 }
  0xa9   : > { %724 = vst.msk [vmem:[%s1126_s16 + $0x4] sm:$0xf] %vm722_vm1, %v691_v4  ;;  %v643_v15 = vadd.f32 %v1115_v38, %v607_v9  ;;  %v628_v17 = vadd.f32 %v1115_v38, %v592_v13 }
  0xaa   : > { %v651_v16 = vadd.f32 %v1115_v38, %v615_v10  ;;  %732 = vst.msk [vmem:[%s1126_s16 + $0x24] sm:$0xf] %vm722_vm1, %v699_v5  ;;  %v636_v18 = vadd.f32 %v1115_v38, %v600_v14 }
  0xab   : > { %v675_v19 = vmax.f32 %v643_v15, 0.0  ;;  %v660_v21 = vmax.f32 %v628_v17, 0.0 }
  0xac   : > { %v683_v20 = vmax.f32 %v651_v16, 0.0  ;;  %v668_v22 = vmax.f32 %v636_v18, 0.0 }
  0xad   : > { %v707_v23 = vpack.c.bf16 %v675_v19, %v675_v19  ;;  %v692_v25 = vpack.c.bf16 %v660_v21, %v660_v21 }
  0xae   : > { %v715_v24 = vpack.c.bf16 %v683_v20, %v683_v20  ;;  %v700_v26 = vpack.c.bf16 %v668_v22, %v668_v22  ;;  %v551_v27 = vpop.f32.mrf.mxu2  ;;  %v513_v30 = vpop.f32.mrf.mxu0 }
  0xaf   : > { %v571_v28 = vpop.f32.mrf.mxu3  ;;  %740 = vst.msk [vmem:[%s1126_s16 + $0x44] sm:$0xf] %vm722_vm1, %v707_v23  ;;  %v608_v29 = vmul.f32 %v1110_v7, %v551_v27  ;;  %v533_v31 = vpop.f32.mrf.mxu1  ;;  %v593_v32 = vmul.f32 %v1110_v7, %v513_v30 }
  0xb0   : > { %v616_v1 = vmul.f32 %v1110_v7, %v571_v28  ;;  %748 = vst.msk [vmem:[%s1126_s16 + $0x64] sm:$0xf] %vm722_vm1, %v715_v24  ;;  %v601_v33 = vmul.f32 %v1110_v7, %v533_v31 }
  0xb1   : > { %725 = vst.msk [vmem:[%s1126_s16 + $0x8] sm:$0xf] %vm722_vm1, %v692_v25  ;;  %v644_v34 = vadd.f32 %v1115_v38, %v608_v29  ;;  %v629_v36 = vadd.f32 %v1115_v38, %v593_v32 }
  0xb2   : > { %v652_v35 = vadd.f32 %v1115_v38, %v616_v1  ;;  %733 = vst.msk [vmem:[%s1126_s16 + $0x28] sm:$0xf] %vm722_vm1, %v700_v26  ;;  %v637_v37 = vadd.f32 %v1115_v38, %v601_v33 }
  0xb3   : > { %v676_v39 = vmax.f32 %v644_v34, 0.0  ;;  %v661_v41 = vmax.f32 %v629_v36, 0.0 }
  0xb4   : > { %v684_v40 = vmax.f32 %v652_v35, 0.0  ;;  %v669_v42 = vmax.f32 %v637_v37, 0.0 }
  0xb5   : > { %v708_v43 = vpack.c.bf16 %v676_v39, %v676_v39  ;;  %v693_v45 = vpack.c.bf16 %v661_v41, %v661_v41 }
  0xb6   : > { %v716_v44 = vpack.c.bf16 %v684_v40, %v684_v40  ;;  %v701_v46 = vpack.c.bf16 %v669_v42, %v669_v42  ;;  %v553_v47 = vpop.f32.mrf.mxu2  ;;  %v516_v51 = vpop.f32.mrf.mxu0 }
  0xb7   : > { %v573_v48 = vpop.f32.mrf.mxu3  ;;  %741 = vst.msk [vmem:[%s1126_s16 + $0x48] sm:$0xf] %vm722_vm1, %v708_v43  ;;  %v609_v49 = vmul.f32 %v1110_v7, %v553_v47  ;;  %v536_v52 = vpop.f32.mrf.mxu1  ;;  %v594_v53 = vmul.f32 %v1110_v7, %v516_v51 }
  0xb8   : > { %v617_v50 = vmul.f32 %v1110_v7, %v573_v48  ;;  %749 = vst.msk [vmem:[%s1126_s16 + $0x68] sm:$0xf] %vm722_vm1, %v716_v44  ;;  %v602_v54 = vmul.f32 %v1110_v7, %v536_v52 }
  0xb9   : > { %726 = vst.msk [vmem:[%s1126_s16 + $0xc] sm:$0xf] %vm722_vm1, %v693_v45  ;;  %v645_v55 = vadd.f32 %v1115_v38, %v609_v49  ;;  %v630_v57 = vadd.f32 %v1115_v38, %v594_v53 }
  0xba   : > { %v653_v56 = vadd.f32 %v1115_v38, %v617_v50  ;;  %734 = vst.msk [vmem:[%s1126_s16 + $0x2c] sm:$0xf] %vm722_vm1, %v701_v46  ;;  %v638_v58 = vadd.f32 %v1115_v38, %v602_v54 }
  0xbb   : > { %v677_v59 = vmax.f32 %v645_v55, 0.0  ;;  %v662_v61 = vmax.f32 %v630_v57, 0.0 }
  0xbc   : > { %v685_v60 = vmax.f32 %v653_v56, 0.0  ;;  %v670_v62 = vmax.f32 %v638_v58, 0.0 }
  0xbd   : > { %v709_v63 = vpack.c.bf16 %v677_v59, %v677_v59  ;;  %v694_v2 = vpack.c.bf16 %v662_v61, %v662_v61 }
  0xbe   : > { %v717_v0 = vpack.c.bf16 %v685_v60, %v685_v60  ;;  %v702_v3 = vpack.c.bf16 %v670_v62, %v670_v62  ;;  %v556_v4 = vpop.f32.mrf.mxu2  ;;  %v518_v9 = vpop.f32.mrf.mxu0 }
  0xbf   : > { %v576_v5 = vpop.f32.mrf.mxu3  ;;  %742 = vst.msk [vmem:[%s1126_s16 + $0x4c] sm:$0xf] %vm722_vm1, %v709_v63  ;;  %v610_v6 = vmul.f32 %v1110_v7, %v556_v4  ;;  %v538_v10 = vpop.f32.mrf.mxu1  ;;  %v595_v11 = vmul.f32 %v1110_v7, %v518_v9 }
  0xc0   : > { %v618_v8 = vmul.f32 %v1110_v7, %v576_v5  ;;  %750 = vst.msk [vmem:[%s1126_s16 + $0x6c] sm:$0xf] %vm722_vm1, %v717_v0  ;;  %v603_v12 = vmul.f32 %v1110_v7, %v538_v10 }
  0xc1   : > { %727 = vst.msk [vmem:[%s1126_s16 + $0x10] sm:$0xf] %vm722_vm1, %v694_v2  ;;  %v646_v13 = vadd.f32 %v1115_v38, %v610_v6  ;;  %v631_v15 = vadd.f32 %v1115_v38, %v595_v11 }
  0xc2   : > { %v654_v14 = vadd.f32 %v1115_v38, %v618_v8  ;;  %735 = vst.msk [vmem:[%s1126_s16 + $0x30] sm:$0xf] %vm722_vm1, %v702_v3  ;;  %v639_v16 = vadd.f32 %v1115_v38, %v603_v12 }
  0xc3   : > { %v678_v17 = vmax.f32 %v646_v13, 0.0  ;;  %v663_v19 = vmax.f32 %v631_v15, 0.0 }
  0xc4   : > { %v686_v18 = vmax.f32 %v654_v14, 0.0  ;;  %v671_v20 = vmax.f32 %v639_v16, 0.0 }
  0xc5   : > { %v710_v21 = vpack.c.bf16 %v678_v17, %v678_v17  ;;  %v695_v23 = vpack.c.bf16 %v663_v19, %v663_v19 }
  0xc6   : > { %v718_v22 = vpack.c.bf16 %v686_v18, %v686_v18  ;;  %v703_v24 = vpack.c.bf16 %v671_v20, %v671_v20  ;;  %v558_v25 = vpop.f32.mrf.mxu2  ;;  %v521_v29 = vpop.f32.mrf.mxu0 }
  0xc7   : > { %v578_v26 = vpop.f32.mrf.mxu3  ;;  %743 = vst.msk [vmem:[%s1126_s16 + $0x50] sm:$0xf] %vm722_vm1, %v710_v21  ;;  %v611_v27 = vmul.f32 %v1110_v7, %v558_v25  ;;  %v541_v1 = vpop.f32.mrf.mxu1  ;;  %v596_v30 = vmul.f32 %v1110_v7, %v521_v29 }
  0xc8   : > { %v619_v28 = vmul.f32 %v1110_v7, %v578_v26  ;;  %751 = vst.msk [vmem:[%s1126_s16 + $0x70] sm:$0xf] %vm722_vm1, %v718_v22  ;;  %v604_v31 = vmul.f32 %v1110_v7, %v541_v1 }
  0xc9   : > { %728 = vst.msk [vmem:[%s1126_s16 + $0x14] sm:$0xf] %vm722_vm1, %v695_v23  ;;  %v647_v32 = vadd.f32 %v1115_v38, %v611_v27  ;;  %v632_v34 = vadd.f32 %v1115_v38, %v596_v30 }
  0xca   : > { %v655_v33 = vadd.f32 %v1115_v38, %v619_v28  ;;  %736 = vst.msk [vmem:[%s1126_s16 + $0x34] sm:$0xf] %vm722_vm1, %v703_v24  ;;  %v640_v35 = vadd.f32 %v1115_v38, %v604_v31 }
  0xcb   : > { %v679_v36 = vmax.f32 %v647_v32, 0.0  ;;  %v664_v39 = vmax.f32 %v632_v34, 0.0 }
  0xcc   : > { %v687_v37 = vmax.f32 %v655_v33, 0.0  ;;  %v672_v40 = vmax.f32 %v640_v35, 0.0 }
  0xcd   : > { %v711_v41 = vpack.c.bf16 %v679_v36, %v679_v36  ;;  %v696_v43 = vpack.c.bf16 %v664_v39, %v664_v39 }
  0xce   : > { %v719_v42 = vpack.c.bf16 %v687_v37, %v687_v37  ;;  %v704_v44 = vpack.c.bf16 %v672_v40, %v672_v40  ;;  %v561_v45 = vpop.f32.mrf.mxu2  ;;  %v523_v49 = vpop.f32.mrf.mxu0 }
  0xcf   : > { %v581_v46 = vpop.f32.mrf.mxu3  ;;  %744 = vst.msk [vmem:[%s1126_s16 + $0x54] sm:$0xf] %vm722_vm1, %v711_v41  ;;  %v612_v47 = vmul.f32 %v1110_v7, %v561_v45  ;;  %v543_v50 = vpop.f32.mrf.mxu1  ;;  %v597_v51 = vmul.f32 %v1110_v7, %v523_v49 }
  0xd0   : > { %v620_v48 = vmul.f32 %v1110_v7, %v581_v46  ;;  %752 = vst.msk [vmem:[%s1126_s16 + $0x74] sm:$0xf] %vm722_vm1, %v719_v42  ;;  %v605_v52 = vmul.f32 %v1110_v7, %v543_v50 }
  0xd1   : > { %729 = vst.msk [vmem:[%s1126_s16 + $0x18] sm:$0xf] %vm722_vm1, %v696_v43  ;;  %v648_v53 = vadd.f32 %v1115_v38, %v612_v47  ;;  %v633_v55 = vadd.f32 %v1115_v38, %v597_v51 }
  0xd2   : > { %v656_v54 = vadd.f32 %v1115_v38, %v620_v48  ;;  %737 = vst.msk [vmem:[%s1126_s16 + $0x38] sm:$0xf] %vm722_vm1, %v704_v44  ;;  %v641_v56 = vadd.f32 %v1115_v38, %v605_v52 }
  0xd3   : > { %v680_v57 = vmax.f32 %v648_v53, 0.0  ;;  %v665_v59 = vmax.f32 %v633_v55, 0.0 }
  0xd4   : > { %v688_v58 = vmax.f32 %v656_v54, 0.0  ;;  %v673_v60 = vmax.f32 %v641_v56, 0.0 }
  0xd5   : > { %v712_v61 = vpack.c.bf16 %v680_v57, %v680_v57  ;;  %v697_v63 = vpack.c.bf16 %v665_v59, %v665_v59 }
  0xd6   : > { %v720_v62 = vpack.c.bf16 %v688_v58, %v688_v58  ;;  %v705_v0 = vpack.c.bf16 %v673_v60, %v673_v60  ;;  %v563_v2 = vpop.f32.mrf.mxu2 }
  0xd7   : > { %v583_v3 = vpop.f32.mrf.mxu3  ;;  %745 = vst.msk [vmem:[%s1126_s16 + $0x58] sm:$0xf] %vm722_vm1, %v712_v61  ;;  %v613_v4 = vmul.f32 %v1110_v7, %v563_v2 }
  0xd8   : > { %v621_v5 = vmul.f32 %v1110_v7, %v583_v3  ;;  %753 = vst.msk [vmem:[%s1126_s16 + $0x78] sm:$0xf] %vm722_vm1, %v720_v62 }
  0xd9   : > { %730 = vst.msk [vmem:[%s1126_s16 + $0x1c] sm:$0xf] %vm722_vm1, %v697_v63  ;;  %v649_v6 = vadd.f32 %v1115_v38, %v613_v4 }
  0xda   : > { %v657_v8 = vadd.f32 %v1115_v38, %v621_v5  ;;  %738 = vst.msk [vmem:[%s1126_s16 + $0x3c] sm:$0xf] %vm722_vm1, %v705_v0 }
  0xdb   : > { %v681_v9 = vmax.f32 %v649_v6, 0.0 }
  0xdc   : > { %v689_v10 = vmax.f32 %v657_v8, 0.0 }
  0xdd   : > { %v713_v11 = vpack.c.bf16 %v681_v9, %v681_v9 }
  0xde   : > { %v721_v12 = vpack.c.bf16 %v689_v10, %v689_v10 }
  0xdf   : > { %746 = vst.msk [vmem:[%s1126_s16 + $0x5c] sm:$0xf] %vm722_vm1, %v713_v11 }
  0xe0   : > { %754 = vst.msk [vmem:[%s1126_s16 + $0x7c] sm:$0xf] %vm722_vm1, %v721_v12 }
  0xe1 PF: > { %s16_s21 = sadd.s32 1, %s943_s21  }
  0xe2   : > { %p13_p4 = scmp.ge.s32.totalorder %s16_s21, 4  }
  0xe4   :  { %15 = sbr.rel (!%p13_p4) target bundleno = 1 (0x1), region = 74 }

// kernel: _lambda_.29
= control target key start
LH: loop header
LB: loop body
LE: loop exit
PB: predicated region body
PF: predicated region fallthrough
CT: control target
= control target key end

     0   :  { %s886_s15 = smov 0   ;;  %s1102_s0 = inlined_call_operand.vmem [shape: bf16[512,88], index: 0, kind: input, shape index: {}]   ;;  %s1103_s1 = inlined_call_operand.vmem [shape: bf16[88,8], index: 1, kind: input, shape index: {}]   ;;  %s1104_s2 = inlined_call_operand.vmem [shape: f32[1,8], index: 2, kind: input, shape index: {}]   ;;  %s1105_s3 = inlined_call_operand.vmem [shape: f32[1,8], index: 3, kind: input, shape index: {}]   ;;  %s1106_s4 = inlined_call_operand.vmem [shape: bf16[512,8], index: 4, kind: output, shape index: {}]  }
   0x1 LB: > { %s693_s16 = sadd.s32 4294967295, %s859_s15   ;;  %p697_p0 = scmp.ge.s32.totalorder %s859_s15, 1  ;;  %s859_s15 = sphi %s886_s15, %s14_s15  }
   0x2   : > { %p163_p1 = scmp.lt.s32.totalorder %s859_s15, 3 }
   0x4   : > { %p164_p2 = pnand %p697_p0, %p163_p1 }
   0x5   : > { %s698_s21 = sshll.u32 (!%p164_p2), %s693_s16, 5 }
   0x6   : > { %167 = sbr.rel (%p164_p2) target bundleno = 237 (0xed), region = 36  ;;  %p190_p3 = scmp.lt.s32.totalorder (!%p164_p2), %s698_s21, 63 }
   0xb   : > { %v244_v0 = vld [vmem:[%s1103_s1 + $0x28] sm:$0xf]  ;;  %vm407_vm0 = vcmask 1043456   ;;  %v824_v4 = vld [vmem:[%s1103_s1 + $0x20] sm:$0xff]  ;;  %v823_v5 = vld [vmem:[%s1103_s1 + $0x18] sm:$0xff]  ;;  %s1108_s21 = smov (!%p190_p3, %s698_s21), 63 }
   0xc   : > { %v346_v1 = vunpack.c.l.b16 %v244_v0  ;;  %v822_v6 = vld [vmem:[%s1103_s1 + $0x10] sm:$0xff]  ;;  %v821_v7 = vld [vmem:[%s1103_s1 + $0x8] sm:$0xff]  ;;  %s699_s28 = sshll.u32 %s1108_s21, 2  ;;  %v820_v8 = vld [vmem:[%s1103_s1] sm:$0xff]  ;;  %vm358_vm1 = vcmask 719872   ;;  %vm604_vm2 = vcmask 60416  }
   0xd   : > { %s920_s7 = scalar_lea.vmem %s1102_s0, %s699_s28  ;;  %v957_v25 = vld [vmem:[%s1104_s2] ss:$0 sm:$0xff]  ;;  %s973_s14 = scalar_lea.vmem %s1106_s4, %s699_s28 }
   0xe   : > { %v352_v2 = vpack.c.b16 %v346_v1, %v346_v1  ;;  %v804_v9 = vld [vmem:[%s920_s7] sm:$0xff]  ;;  %v805_v13 = vld [vmem:[%s920_s7 + $0x8] sm:$0xff]  ;;  %v806_v17 = vld [vmem:[%s920_s7 + $0x10] sm:$0xff] }
   0xf   : > { %v808_v10 = vld [vmem:[%s920_s7 + $0x20] sm:$0xff]  ;;  %v809_v14 = vld [vmem:[%s920_s7 + $0x28] sm:$0xff]  ;;  %v810_v18 = vld [vmem:[%s920_s7 + $0x30] sm:$0xff] }
  0x10   : > { %v409_v3 = vsel %vm407_vm0, %v352_v2, 0  ;;  %v812_v11 = vld [vmem:[%s920_s7 + $0x40] sm:$0xff]  ;;  %v813_v15 = vld [vmem:[%s920_s7 + $0x48] sm:$0xff]  ;;  %v814_v19 = vld [vmem:[%s920_s7 + $0x50] sm:$0xff] }
  0x11   : > { %413 = vmatpush.bf16.msra.mxu0 %v409_v3  ;;  %825 = vmatpush.bf16.msra.mxu1 %v409_v3  ;;  %v816_v12 = vld [vmem:[%s920_s7 + $0x60] sm:$0xff]  ;;  %v817_v16 = vld [vmem:[%s920_s7 + $0x68] sm:$0xff]  ;;  %v818_v20 = vld [vmem:[%s920_s7 + $0x70] sm:$0xff] }
  0x12   : > { %826 = vmatpush.bf16.msra.mxu2 %v409_v3  ;;  %827 = vmatpush.bf16.msra.mxu3 %v409_v3  ;;  %v807_v21 = vld [vmem:[%s920_s7 + $0x18] sm:$0xff]  ;;  %v962_v26 = vld [vmem:[%s1105_s3] ss:$0 sm:$0xff] }
  0x13   : > { %v811_v22 = vld [vmem:[%s920_s7 + $0x38] sm:$0xff] }
  0x14   : > { %v815_v23 = vld [vmem:[%s920_s7 + $0x58] sm:$0xff] }
  0x15   : > { %414 = vmatpush.bf16.msra.mxu0 %v824_v4  ;;  %828 = vmatpush.bf16.msra.mxu1 %v824_v4  ;;  %v819_v24 = vld [vmem:[%s920_s7 + $0x78] sm:$0xff] }
  0x16   : > { %829 = vmatpush.bf16.msra.mxu2 %v824_v4  ;;  %830 = vmatpush.bf16.msra.mxu3 %v824_v4 }
  0x19   : > { %415 = vmatpush.bf16.msra.mxu0 %v823_v5  ;;  %831 = vmatpush.bf16.msra.mxu1 %v823_v5 }
  0x1a   : > { %832 = vmatpush.bf16.msra.mxu2 %v823_v5  ;;  %833 = vmatpush.bf16.msra.mxu3 %v823_v5 }
  0x1d   : > { %416 = vmatpush.bf16.msra.mxu0 %v822_v6  ;;  %834 = vmatpush.bf16.msra.mxu1 %v822_v6 }
  0x1e   : > { %835 = vmatpush.bf16.msra.mxu2 %v822_v6  ;;  %836 = vmatpush.bf16.msra.mxu3 %v822_v6 }
  0x21   : > { %417 = vmatpush.bf16.msra.mxu0 %v821_v7  ;;  %837 = vmatpush.bf16.msra.mxu1 %v821_v7 }
  0x22   : > { %838 = vmatpush.bf16.msra.mxu2 %v821_v7  ;;  %839 = vmatpush.bf16.msra.mxu3 %v821_v7 }
  0x25   : > { %418 = vmatpush.bf16.msra.mxu0 %v820_v8  ;;  %840 = vmatpush.bf16.msra.mxu1 %v820_v8 }
  0x26   : > { %841 = vmatpush.bf16.msra.mxu2 %v820_v8  ;;  %842 = vmatpush.bf16.msra.mxu3 %v820_v8 }
  0x28   : > { %786 = vmatmul.msk.bf16.vlgmr.msra.gmra.mxu0 %vm358_vm1, %v804_v9  ;;  %790 = vmatmul.msk.bf16.vlgmr.msra.gmra.mxu1 %vm358_vm1, %v808_v10 }
  0x29   : > { %794 = vmatmul.msk.bf16.vlgmr.msra.gmra.mxu2 %vm358_vm1, %v812_v11  ;;  %798 = vmatmul.msk.bf16.vlgmr.msra.gmra.mxu3 %vm358_vm1, %v816_v12 }
  0x38   : > { %787 = vmatmul.msk.bf16.gmra.mxu0 %vm358_vm1, %v805_v13  ;;  %791 = vmatmul.msk.bf16.gmra.mxu1 %vm358_vm1, %v809_v14 }
  0x39   : > { %795 = vmatmul.msk.bf16.gmra.mxu2 %vm358_vm1, %v813_v15  ;;  %799 = vmatmul.msk.bf16.gmra.mxu3 %vm358_vm1, %v817_v16 }
  0x48   : > { %788 = vmatmul.msk.bf16.gmra.mxu0 %vm358_vm1, %v806_v17  ;;  %792 = vmatmul.msk.bf16.gmra.mxu1 %vm358_vm1, %v810_v18 }
  0x49   : > { %796 = vmatmul.msk.bf16.gmra.mxu2 %vm358_vm1, %v814_v19  ;;  %800 = vmatmul.msk.bf16.gmra.mxu3 %vm358_vm1, %v818_v20 }
  0x58   : > { %789 = vmatmul.msk.bf16.gmra.mxu0 %vm358_vm1, %v807_v21  ;;  %793 = vmatmul.msk.bf16.gmra.mxu1 %vm358_vm1, %v811_v22 }
  0x59   : > { %797 = vmatmul.msk.bf16.gmra.mxu2 %vm358_vm1, %v815_v23  ;;  %801 = vmatmul.msk.bf16.gmra.mxu3 %vm358_vm1, %v819_v24 }
  0xa5   : > { %v420_v27 = vpop.f32.mrf.mxu0  ;;  %v440_v28 = vpop.f32.mrf.mxu1 }
  0xa6   : > { %v504_v29 = vmul.f32 %v957_v25, %v420_v27  ;;  %v512_v30 = vmul.f32 %v957_v25, %v440_v28 }
  0xa8   : > { %v540_v31 = vadd.f32 %v962_v26, %v504_v29  ;;  %v548_v32 = vadd.f32 %v962_v26, %v512_v30 }
  0xaa   : > { %v572_v33 = vpack.c.bf16 %v540_v31, %v540_v31  ;;  %v580_v34 = vpack.c.bf16 %v548_v32, %v548_v32 }
  0xac   : > { %605 = vst.msk [vmem:[%s973_s14] sm:$0xf] %vm604_vm2, %v572_v33  ;;  %v460_v35 = vpop.f32.mrf.mxu2  ;;  %v480_v36 = vpop.f32.mrf.mxu3 }
  0xad   : > { %613 = vst.msk [vmem:[%s973_s14 + $0x20] sm:$0xf] %vm604_vm2, %v580_v34  ;;  %v520_v37 = vmul.f32 %v957_v25, %v460_v35  ;;  %v528_v38 = vmul.f32 %v957_v25, %v480_v36  ;;  %v422_v39 = vpop.f32.mrf.mxu0  ;;  %v442_v40 = vpop.f32.mrf.mxu1 }
  0xae   : > { %v505_v41 = vmul.f32 %v957_v25, %v422_v39  ;;  %v513_v42 = vmul.f32 %v957_v25, %v442_v40 }
  0xaf   : > { %v556_v43 = vadd.f32 %v962_v26, %v520_v37  ;;  %v564_v44 = vadd.f32 %v962_v26, %v528_v38 }
  0xb0   : > { %v541_v45 = vadd.f32 %v962_v26, %v505_v41  ;;  %v549_v46 = vadd.f32 %v962_v26, %v513_v42 }
  0xb1   : > { %v588_v47 = vpack.c.bf16 %v556_v43, %v556_v43  ;;  %v596_v48 = vpack.c.bf16 %v564_v44, %v564_v44 }
  0xb2   : > { %v573_v49 = vpack.c.bf16 %v541_v45, %v541_v45  ;;  %v581_v50 = vpack.c.bf16 %v549_v46, %v549_v46 }
  0xb3   : > { %621 = vst.msk [vmem:[%s973_s14 + $0x40] sm:$0xf] %vm604_vm2, %v588_v47 }
  0xb4   : > { %629 = vst.msk [vmem:[%s973_s14 + $0x60] sm:$0xf] %vm604_vm2, %v596_v48  ;;  %v462_v51 = vpop.f32.mrf.mxu2  ;;  %v482_v52 = vpop.f32.mrf.mxu3 }
  0xb5   : > { %606 = vst.msk [vmem:[%s973_s14 + $0x4] sm:$0xf] %vm604_vm2, %v573_v49  ;;  %v521_v53 = vmul.f32 %v957_v25, %v462_v51  ;;  %v529_v54 = vmul.f32 %v957_v25, %v482_v52  ;;  %v425_v55 = vpop.f32.mrf.mxu0  ;;  %v445_v56 = vpop.f32.mrf.mxu1 }
  0xb6   : > { %614 = vst.msk [vmem:[%s973_s14 + $0x24] sm:$0xf] %vm604_vm2, %v581_v50  ;;  %v506_v57 = vmul.f32 %v957_v25, %v425_v55  ;;  %v514_v58 = vmul.f32 %v957_v25, %v445_v56 }
  0xb7   : > { %v557_v59 = vadd.f32 %v962_v26, %v521_v53  ;;  %v565_v60 = vadd.f32 %v962_v26, %v529_v54 }
  0xb8   : > { %v542_v61 = vadd.f32 %v962_v26, %v506_v57  ;;  %v550_v62 = vadd.f32 %v962_v26, %v514_v58 }
  0xb9   : > { %v589_v63 = vpack.c.bf16 %v557_v59, %v557_v59  ;;  %v597_v0 = vpack.c.bf16 %v565_v60, %v565_v60 }
  0xba   : > { %v574_v1 = vpack.c.bf16 %v542_v61, %v542_v61  ;;  %v582_v2 = vpack.c.bf16 %v550_v62, %v550_v62 }
  0xbb   : > { %622 = vst.msk [vmem:[%s973_s14 + $0x44] sm:$0xf] %vm604_vm2, %v589_v63 }
  0xbc   : > { %630 = vst.msk [vmem:[%s973_s14 + $0x64] sm:$0xf] %vm604_vm2, %v597_v0  ;;  %v465_v3 = vpop.f32.mrf.mxu2  ;;  %v485_v4 = vpop.f32.mrf.mxu3 }
  0xbd   : > { %607 = vst.msk [vmem:[%s973_s14 + $0x8] sm:$0xf] %vm604_vm2, %v574_v1  ;;  %v522_v5 = vmul.f32 %v957_v25, %v465_v3  ;;  %v530_v6 = vmul.f32 %v957_v25, %v485_v4  ;;  %v427_v7 = vpop.f32.mrf.mxu0  ;;  %v447_v8 = vpop.f32.mrf.mxu1 }
  0xbe   : > { %615 = vst.msk [vmem:[%s973_s14 + $0x28] sm:$0xf] %vm604_vm2, %v582_v2  ;;  %v507_v9 = vmul.f32 %v957_v25, %v427_v7  ;;  %v515_v10 = vmul.f32 %v957_v25, %v447_v8 }
  0xbf   : > { %v558_v11 = vadd.f32 %v962_v26, %v522_v5  ;;  %v566_v12 = vadd.f32 %v962_v26, %v530_v6 }
  0xc0   : > { %v543_v13 = vadd.f32 %v962_v26, %v507_v9  ;;  %v551_v14 = vadd.f32 %v962_v26, %v515_v10 }
  0xc1   : > { %v590_v15 = vpack.c.bf16 %v558_v11, %v558_v11  ;;  %v598_v16 = vpack.c.bf16 %v566_v12, %v566_v12 }
  0xc2   : > { %v575_v17 = vpack.c.bf16 %v543_v13, %v543_v13  ;;  %v583_v18 = vpack.c.bf16 %v551_v14, %v551_v14 }
  0xc3   : > { %623 = vst.msk [vmem:[%s973_s14 + $0x48] sm:$0xf] %vm604_vm2, %v590_v15 }
  0xc4   : > { %631 = vst.msk [vmem:[%s973_s14 + $0x68] sm:$0xf] %vm604_vm2, %v598_v16  ;;  %v467_v19 = vpop.f32.mrf.mxu2  ;;  %v487_v20 = vpop.f32.mrf.mxu3 }
  0xc5   : > { %608 = vst.msk [vmem:[%s973_s14 + $0xc] sm:$0xf] %vm604_vm2, %v575_v17  ;;  %v523_v21 = vmul.f32 %v957_v25, %v467_v19  ;;  %v531_v22 = vmul.f32 %v957_v25, %v487_v20  ;;  %v430_v23 = vpop.f32.mrf.mxu0  ;;  %v450_v24 = vpop.f32.mrf.mxu1 }
  0xc6   : > { %616 = vst.msk [vmem:[%s973_s14 + $0x2c] sm:$0xf] %vm604_vm2, %v583_v18  ;;  %v508_v27 = vmul.f32 %v957_v25, %v430_v23  ;;  %v516_v28 = vmul.f32 %v957_v25, %v450_v24 }
  0xc7   : > { %v559_v29 = vadd.f32 %v962_v26, %v523_v21  ;;  %v567_v30 = vadd.f32 %v962_v26, %v531_v22 }
  0xc8   : > { %v544_v31 = vadd.f32 %v962_v26, %v508_v27  ;;  %v552_v32 = vadd.f32 %v962_v26, %v516_v28 }
  0xc9   : > { %v591_v33 = vpack.c.bf16 %v559_v29, %v559_v29  ;;  %v599_v34 = vpack.c.bf16 %v567_v30, %v567_v30 }
  0xca   : > { %v576_v35 = vpack.c.bf16 %v544_v31, %v544_v31  ;;  %v584_v36 = vpack.c.bf16 %v552_v32, %v552_v32 }
  0xcb   : > { %624 = vst.msk [vmem:[%s973_s14 + $0x4c] sm:$0xf] %vm604_vm2, %v591_v33 }
  0xcc   : > { %632 = vst.msk [vmem:[%s973_s14 + $0x6c] sm:$0xf] %vm604_vm2, %v599_v34  ;;  %v470_v37 = vpop.f32.mrf.mxu2  ;;  %v490_v38 = vpop.f32.mrf.mxu3 }
  0xcd   : > { %609 = vst.msk [vmem:[%s973_s14 + $0x10] sm:$0xf] %vm604_vm2, %v576_v35  ;;  %v524_v39 = vmul.f32 %v957_v25, %v470_v37  ;;  %v532_v40 = vmul.f32 %v957_v25, %v490_v38  ;;  %v432_v41 = vpop.f32.mrf.mxu0  ;;  %v452_v42 = vpop.f32.mrf.mxu1 }
  0xce   : > { %617 = vst.msk [vmem:[%s973_s14 + $0x30] sm:$0xf] %vm604_vm2, %v584_v36  ;;  %v509_v43 = vmul.f32 %v957_v25, %v432_v41  ;;  %v517_v44 = vmul.f32 %v957_v25, %v452_v42 }
  0xcf   : > { %v560_v45 = vadd.f32 %v962_v26, %v524_v39  ;;  %v568_v46 = vadd.f32 %v962_v26, %v532_v40 }
  0xd0   : > { %v545_v47 = vadd.f32 %v962_v26, %v509_v43  ;;  %v553_v48 = vadd.f32 %v962_v26, %v517_v44 }
  0xd1   : > { %v592_v49 = vpack.c.bf16 %v560_v45, %v560_v45  ;;  %v600_v50 = vpack.c.bf16 %v568_v46, %v568_v46 }
  0xd2   : > { %v577_v51 = vpack.c.bf16 %v545_v47, %v545_v47  ;;  %v585_v52 = vpack.c.bf16 %v553_v48, %v553_v48 }
  0xd3   : > { %625 = vst.msk [vmem:[%s973_s14 + $0x50] sm:$0xf] %vm604_vm2, %v592_v49 }
  0xd4   : > { %633 = vst.msk [vmem:[%s973_s14 + $0x70] sm:$0xf] %vm604_vm2, %v600_v50  ;;  %v472_v53 = vpop.f32.mrf.mxu2  ;;  %v492_v54 = vpop.f32.mrf.mxu3 }
  0xd5   : > { %610 = vst.msk [vmem:[%s973_s14 + $0x14] sm:$0xf] %vm604_vm2, %v577_v51  ;;  %v525_v55 = vmul.f32 %v957_v25, %v472_v53  ;;  %v533_v56 = vmul.f32 %v957_v25, %v492_v54  ;;  %v435_v57 = vpop.f32.mrf.mxu0  ;;  %v455_v58 = vpop.f32.mrf.mxu1 }
  0xd6   : > { %618 = vst.msk [vmem:[%s973_s14 + $0x34] sm:$0xf] %vm604_vm2, %v585_v52  ;;  %v510_v59 = vmul.f32 %v957_v25, %v435_v57  ;;  %v518_v60 = vmul.f32 %v957_v25, %v455_v58 }
  0xd7   : > { %v561_v61 = vadd.f32 %v962_v26, %v525_v55  ;;  %v569_v62 = vadd.f32 %v962_v26, %v533_v56 }
  0xd8   : > { %v546_v63 = vadd.f32 %v962_v26, %v510_v59  ;;  %v554_v0 = vadd.f32 %v962_v26, %v518_v60 }
  0xd9   : > { %v593_v1 = vpack.c.bf16 %v561_v61, %v561_v61  ;;  %v601_v2 = vpack.c.bf16 %v569_v62, %v569_v62 }
  0xda   : > { %v578_v3 = vpack.c.bf16 %v546_v63, %v546_v63  ;;  %v586_v4 = vpack.c.bf16 %v554_v0, %v554_v0 }
  0xdb   : > { %626 = vst.msk [vmem:[%s973_s14 + $0x54] sm:$0xf] %vm604_vm2, %v593_v1 }
  0xdc   : > { %634 = vst.msk [vmem:[%s973_s14 + $0x74] sm:$0xf] %vm604_vm2, %v601_v2  ;;  %v475_v5 = vpop.f32.mrf.mxu2  ;;  %v495_v6 = vpop.f32.mrf.mxu3 }
  0xdd   : > { %611 = vst.msk [vmem:[%s973_s14 + $0x18] sm:$0xf] %vm604_vm2, %v578_v3  ;;  %v526_v7 = vmul.f32 %v957_v25, %v475_v5  ;;  %v534_v8 = vmul.f32 %v957_v25, %v495_v6  ;;  %v437_v9 = vpop.f32.mrf.mxu0  ;;  %v457_v10 = vpop.f32.mrf.mxu1 }
  0xde   : > { %619 = vst.msk [vmem:[%s973_s14 + $0x38] sm:$0xf] %vm604_vm2, %v586_v4  ;;  %v511_v11 = vmul.f32 %v957_v25, %v437_v9  ;;  %v519_v12 = vmul.f32 %v957_v25, %v457_v10 }
  0xdf   : > { %v562_v13 = vadd.f32 %v962_v26, %v526_v7  ;;  %v570_v14 = vadd.f32 %v962_v26, %v534_v8 }
  0xe0   : > { %v547_v15 = vadd.f32 %v962_v26, %v511_v11  ;;  %v555_v16 = vadd.f32 %v962_v26, %v519_v12 }
  0xe1   : > { %v594_v17 = vpack.c.bf16 %v562_v13, %v562_v13  ;;  %v602_v18 = vpack.c.bf16 %v570_v14, %v570_v14 }
  0xe2   : > { %v579_v19 = vpack.c.bf16 %v547_v15, %v547_v15  ;;  %v587_v20 = vpack.c.bf16 %v555_v16, %v555_v16 }
  0xe3   : > { %627 = vst.msk [vmem:[%s973_s14 + $0x58] sm:$0xf] %vm604_vm2, %v594_v17 }
  0xe4   : > { %635 = vst.msk [vmem:[%s973_s14 + $0x78] sm:$0xf] %vm604_vm2, %v602_v18  ;;  %v477_v21 = vpop.f32.mrf.mxu2  ;;  %v497_v22 = vpop.f32.mrf.mxu3 }
  0xe5   : > { %612 = vst.msk [vmem:[%s973_s14 + $0x1c] sm:$0xf] %vm604_vm2, %v579_v19  ;;  %v527_v23 = vmul.f32 %v957_v25, %v477_v21  ;;  %v535_v24 = vmul.f32 %v957_v25, %v497_v22 }
  0xe6   : > { %620 = vst.msk [vmem:[%s973_s14 + $0x3c] sm:$0xf] %vm604_vm2, %v587_v20 }
  0xe7   : > { %v563_v27 = vadd.f32 %v962_v26, %v527_v23  ;;  %v571_v28 = vadd.f32 %v962_v26, %v535_v24 }
  0xe9   : > { %v595_v29 = vpack.c.bf16 %v563_v27, %v563_v27  ;;  %v603_v30 = vpack.c.bf16 %v571_v28, %v571_v28 }
  0xeb   : > { %628 = vst.msk [vmem:[%s973_s14 + $0x5c] sm:$0xf] %vm604_vm2, %v595_v29 }
  0xec   : > { %636 = vst.msk [vmem:[%s973_s14 + $0x7c] sm:$0xf] %vm604_vm2, %v603_v30 }
  0xed PF: > { %s14_s15 = sadd.s32 1, %s859_s15  }
  0xee   : > { %p11_p4 = scmp.ge.s32.totalorder %s14_s15, 4  }
  0xf0   :  { %13 = sbr.rel (!%p11_p4) target bundleno = 1 (0x1), region = 66 }

</bundles_post_ra>
